<compile_context>
chip_gen: v7x
topology: tpu7x:2x2x1
jax: 0.10.0
libtpu: 0.0.40
codegen_flags: <defaults>
</compile_context>

<pallas_src>
import functools
import math

import jax
import jax.numpy as jnp
from jax.experimental import pallas as pl
from jax.experimental.pallas import tpu as pltpu

NHEAD = 2


# ---------------------------------------------------------------------------
# Fused transformer encoder layer (post-norm, relu activation)
# ---------------------------------------------------------------------------
def _encoder_layer_kernel(x_ref, wqkv_ref, bqkv_ref, wo_ref, bo_ref,
                          ln1g_ref, ln1b_ref, w1_ref, b1_ref,
                          w2_ref, b2_ref, ln2g_ref, ln2b_ref,
                          o_ref, *, batch, seq, nhead, eps=1e-5):
    x = x_ref[...]                                    # (B*S, D) f32, rows b-major
    D = x.shape[-1]
    HD = D // nhead
    scale = 1.0 / math.sqrt(HD)

    # --- fused QKV projection (bf16 MXU inputs, f32 accumulation) ---
    qkv = jnp.dot(x.astype(jnp.bfloat16), wqkv_ref[...],
                  preferred_element_type=jnp.float32) + bqkv_ref[...]
    q = qkv[:, 0:D]
    k = qkv[:, D:2 * D]
    v = qkv[:, 2 * D:3 * D]

    # --- attention with the output projection fused per head ---
    wo = wo_ref[...]                                  # (D, D) bf16  (= out_proj_w.T)
    batch_rows = []
    for b in range(batch):                            # static unroll
        r0, r1 = b * seq, (b + 1) * seq
        acc = None
        for h in range(nhead):                        # static unroll
            c0, c1 = h * HD, (h + 1) * HD
            qh = q[r0:r1, c0:c1]                      # (S, HD) f32
            kh = k[r0:r1, c0:c1]
            vh = v[r0:r1, c0:c1]
            s = jnp.dot(qh, kh.T, preferred_element_type=jnp.float32) * scale
            m = jnp.max(s, axis=-1, keepdims=True)
            p = jnp.exp(s - m)
            p = p * pl.reciprocal(jnp.sum(p, axis=-1, keepdims=True), approx=True)
            o_bh = jnp.dot(p, vh, preferred_element_type=jnp.float32)   # (S, HD)
            contrib = jnp.dot(o_bh.astype(jnp.bfloat16), wo[c0:c1, :],
                              preferred_element_type=jnp.float32)       # (S, D)
            acc = contrib if acc is None else acc + contrib
        batch_rows.append(acc)
    attn = jnp.concatenate(batch_rows, axis=0) + bo_ref[...]            # (B*S, D)

    # --- residual + LayerNorm 1 (fused epilogue) ---
    y = x + attn
    mu = jnp.mean(y, axis=-1, keepdims=True)
    var = jnp.mean(jnp.square(y - mu), axis=-1, keepdims=True)
    y = (y - mu) * jax.lax.rsqrt(var + eps) * ln1g_ref[...] + ln1b_ref[...]

    # --- feed-forward (bf16 MXU inputs) ---
    ff = jnp.dot(y.astype(jnp.bfloat16), w1_ref[...],
                 preferred_element_type=jnp.float32) + b1_ref[...]
    ff = jnp.maximum(ff, 0.0)
    ff = jnp.dot(ff.astype(jnp.bfloat16), w2_ref[...],
                 preferred_element_type=jnp.float32) + b2_ref[...]

    # --- residual + LayerNorm 2 ---
    z = y + ff
    mu2 = jnp.mean(z, axis=-1, keepdims=True)
    var2 = jnp.mean(jnp.square(z - mu2), axis=-1, keepdims=True)
    z = (z - mu2) * jax.lax.rsqrt(var2 + eps) * ln2g_ref[...] + ln2b_ref[...]

    o_ref[...] = z.astype(o_ref.dtype)


def encoder_layer(x2d, p, batch, seq):
    """x2d: (B*S, D) f32 -> (B*S, D) f32, one fused pallas_call per layer."""
    D = x2d.shape[-1]
    F = p["ff1_w"].shape[0]
    kernel = functools.partial(_encoder_layer_kernel,
                               batch=batch, seq=seq, nhead=NHEAD)
    return pl.pallas_call(
        kernel,
        out_shape=jax.ShapeDtypeStruct((batch * seq, D), jnp.float32),
    )(x2d,
      p["in_proj_w"].T.astype(jnp.bfloat16), p["in_proj_b"].reshape(1, 3 * D),
      p["out_proj_w"].T.astype(jnp.bfloat16), p["out_proj_b"].reshape(1, D),
      p["ln1_w"].reshape(1, D), p["ln1_b"].reshape(1, D),
      p["ff1_w"].T.astype(jnp.bfloat16), p["ff1_b"].reshape(1, F),
      p["ff2_w"].T.astype(jnp.bfloat16), p["ff2_b"].reshape(1, D),
      p["ln2_w"].reshape(1, D), p["ln2_b"].reshape(1, D))


# ---------------------------------------------------------------------------
# Fused bidirectional LSTM layer (both directions in one kernel,
# input projection hoisted out of the recurrence)
# ---------------------------------------------------------------------------
def _bilstm_kernel(x_ref, wihf_ref, wihb_ref, whhf_ref, whhb_ref,
                   bf_ref, bb_ref,
                   outf_ref, outb_ref, hf_ref, cf_ref, hb_ref, cb_ref,
                   ginf_ref, ginb_ref):
    T, N, Din = x_ref.shape
    D = hf_ref.shape[-1]

    # Hoisted input projection for both directions: one large MXU matmul each,
    # done once before the serial recurrence (torch gate order i, f, g, o).
    x2 = x_ref[...].reshape(T * N, Din).astype(jnp.bfloat16)
    ginf_ref[...] = (jnp.dot(x2, wihf_ref[...], preferred_element_type=jnp.float32)
                     + bf_ref[...]).reshape(T, N, 4 * D)
    ginb_ref[...] = (jnp.dot(x2, wihb_ref[...], preferred_element_type=jnp.float32)
                     + bb_ref[...]).reshape(T, N, 4 * D)

    # Final-state output refs double as the running state (zero init = hidden=None).
    hf_ref[...] = jnp.zeros_like(hf_ref)
    cf_ref[...] = jnp.zeros_like(cf_ref)
    hb_ref[...] = jnp.zeros_like(hb_ref)
    cb_ref[...] = jnp.zeros_like(cb_ref)

    def cell(gates, c_prev):
        i_g = jax.nn.sigmoid(gates[:, 0 * D:1 * D])
        f_g = jax.nn.sigmoid(gates[:, 1 * D:2 * D])
        g_g = jnp.tanh(gates[:, 2 * D:3 * D])
        o_g = jax.nn.sigmoid(gates[:, 3 * D:4 * D])
        c_new = f_g * c_prev + i_g * g_g
        h_new = o_g * jnp.tanh(c_new)
        return h_new, c_new

    def step(t, carry):
        rt = T - 1 - t                                # in-kernel reversal (no flips)
        g_f = ginf_ref[t] + jnp.dot(hf_ref[...].astype(jnp.bfloat16), whhf_ref[...],
                                    preferred_element_type=jnp.float32)
        g_b = ginb_ref[rt] + jnp.dot(hb_ref[...].astype(jnp.bfloat16), whhb_ref[...],
                                     preferred_element_type=jnp.float32)
        h_f, c_f = cell(g_f, cf_ref[...])
        h_b, c_b = cell(g_b, cb_ref[...])
        hf_ref[...] = h_f
        cf_ref[...] = c_f
        hb_ref[...] = h_b
        cb_ref[...] = c_b
        outf_ref[t] = h_f
        outb_ref[rt] = h_b
        return carry

    jax.lax.fori_loop(0, T, step, 0, unroll=True)


def run_bilstm_layer(x_seq, lp):
    """x_seq: (T, N, Din) f32; torch weights (4D,Din),(4D,D),(4D,),(4D,) per dir.

    Returns (out_f, out_b, h_f, c_f, h_b, c_b)."""
    T, N, Din = x_seq.shape
    D = lp["w_hh_f"].shape[1]
    return pl.pallas_call(
        _bilstm_kernel,
        out_shape=(jax.ShapeDtypeStruct((T, N, D), jnp.float32),
                   jax.ShapeDtypeStruct((T, N, D), jnp.float32),
                   jax.ShapeDtypeStruct((N, D), jnp.float32),
                   jax.ShapeDtypeStruct((N, D), jnp.float32),
                   jax.ShapeDtypeStruct((N, D), jnp.float32),
                   jax.ShapeDtypeStruct((N, D), jnp.float32)),
        scratch_shapes=[pltpu.VMEM((T, N, 4 * D), jnp.float32),
                        pltpu.VMEM((T, N, 4 * D), jnp.float32)],
    )(x_seq,
      lp["w_ih_f"].T.astype(jnp.bfloat16), lp["w_ih_b"].T.astype(jnp.bfloat16),
      lp["w_hh_f"].T.astype(jnp.bfloat16), lp["w_hh_b"].T.astype(jnp.bfloat16),
      (lp["b_ih_f"] + lp["b_hh_f"]).reshape(1, 4 * D),
      (lp["b_ih_b"] + lp["b_hh_b"]).reshape(1, 4 * D))


# ---------------------------------------------------------------------------
# Final Linear(2*dim -> dim), with the fwd/bwd concat folded into split weights
# ---------------------------------------------------------------------------
def _final_linear_kernel(xf_ref, xb_ref, wf_ref, wb_ref, b_ref, o_ref):
    y = (jnp.dot(xf_ref[...].astype(jnp.bfloat16), wf_ref[...],
                 preferred_element_type=jnp.float32)
         + jnp.dot(xb_ref[...].astype(jnp.bfloat16), wb_ref[...],
                   preferred_element_type=jnp.float32)
         + b_ref[...])
    o_ref[...] = y.astype(o_ref.dtype)


def final_linear(xf, xb, w, b):
    """xf, xb: (M, D); w: (out, 2D) torch-style; b: (out,) -> (M, out)."""
    M, D = xf.shape
    out_dim = w.shape[0]
    return pl.pallas_call(
        _final_linear_kernel,
        out_shape=jax.ShapeDtypeStruct((M, out_dim), jnp.float32),
    )(xf, xb,
      w[:, :D].T.astype(jnp.bfloat16), w[:, D:].T.astype(jnp.bfloat16),
      b.reshape(1, out_dim))


# ---------------------------------------------------------------------------
# Model forward (glue: embedding gather, reshapes, one concat per LSTM layer)
# ---------------------------------------------------------------------------
def transformer_blstm_forward(x_tokens, params):
    B, S = x_tokens.shape
    emb = params["embedding"]
    D = emb.shape[1]

    # Embedding lookup (XLA gather), then run the encoder in batch-major
    # (B*S, D) layout — equivalent to the reference (S, B, D) ordering.
    x = jnp.take(emb, x_tokens, axis=0).reshape(B * S, D)
    for p in params["encoder_layers"]:
        x = encoder_layer(x, p, B, S)

    # Reference permutes encoder output back to (B, S, D) and feeds torch's
    # seq-first LSTM, so "time" axis is B and "batch" axis is S here.
    seq_f = x.reshape(B, S, D)
    seq_b = None
    h_n, c_n = [], []
    for li, lp in enumerate(params["lstm_layers"]):
        seq_in = seq_f if li == 0 else jnp.concatenate([seq_f, seq_b], axis=-1)
        seq_f, seq_b, hf, cf, hb, cb = run_bilstm_layer(seq_in, lp)
        h_n += [hf, hb]
        c_n += [cf, cb]
    h_n = jnp.stack(h_n, axis=0)                       # (2*layers, S, D)
    c_n = jnp.stack(c_n, axis=0)

    y = final_linear(seq_f.reshape(B * S, D), seq_b.reshape(B * S, D),
                     params["linear_w"], params["linear_b"])
    return y.reshape(B, S, -1), (h_n, c_n)


# ---------------------------------------------------------------------------
# Deterministic parameter init (shapes from the module __init__)
# ---------------------------------------------------------------------------
def init_params(key, dim, layers=2, dim_feedforward=2048):
    keys = iter(jax.random.split(key, 64))

    def w(shape, scale=0.02):
        return scale * jax.random.normal(next(keys), shape, jnp.float32)

    params = {"embedding": jax.random.normal(next(keys), (dim, dim), jnp.float32)}

    enc = []
    for _ in range(layers):
        enc.append(dict(
            in_proj_w=w((3 * dim, dim)), in_proj_b=w((3 * dim,)),
            out_proj_w=w((dim, dim)), out_proj_b=w((dim,)),
            ff1_w=w((dim_feedforward, dim)), ff1_b=w((dim_feedforward,)),
            ff2_w=w((dim, dim_feedforward)), ff2_b=w((dim,)),
            ln1_w=jnp.ones((dim,), jnp.float32), ln1_b=jnp.zeros((dim,), jnp.float32),
            ln2_w=jnp.ones((dim,), jnp.float32), ln2_b=jnp.zeros((dim,), jnp.float32),
        ))
    params["encoder_layers"] = enc

    lstm = []
    in_size = dim
    for _ in range(layers):
        lstm.append(dict(
            w_ih_f=w((4 * dim, in_size)), w_hh_f=w((4 * dim, dim)),
            b_ih_f=w((4 * dim,)), b_hh_f=w((4 * dim,)),
            w_ih_b=w((4 * dim, in_size)), w_hh_b=w((4 * dim, dim)),
            b_ih_b=w((4 * dim,)), b_hh_b=w((4 * dim,)),
        ))
        in_size = 2 * dim
    params["lstm_layers"] = lstm

    params["linear_w"] = w((dim, 2 * dim))
    params["linear_b"] = w((dim,))
    return params


if __name__ == "__main__":
    dim, layers = 32, 2
    B, S = 2, 8

    key = jax.random.PRNGKey(0)
    pkey, xkey = jax.random.split(key)
    params = init_params(pkey, dim, layers)
    x_tokens = jax.random.randint(xkey, (B, S), 0, dim, dtype=jnp.int32)

    y, (h_n, c_n) = jax.jit(transformer_blstm_forward)(x_tokens, params)
    jax.block_until_ready((y, h_n, c_n))

    assert y.shape == (B, S, dim)
    assert h_n.shape == (2 * layers, S, dim)
    assert c_n.shape == (2 * layers, S, dim)
    assert jnp.all(jnp.isfinite(y))
    assert jnp.all(jnp.isfinite(h_n)) and jnp.all(jnp.isfinite(c_n))
    print("KERNEL_OK")
</pallas_src>

<mosaic_0001>
module attributes {stable_mosaic.version = 11 : i64} {
  func.func @_encoder_layer_kernel(%arg0: memref<16x32xf32, #tpu.memory_space<vmem>>, %arg1: memref<32x96xbf16, #tpu.memory_space<vmem>>, %arg2: memref<1x96xf32, #tpu.memory_space<vmem>>, %arg3: memref<32x32xbf16, #tpu.memory_space<vmem>>, %arg4: memref<1x32xf32, #tpu.memory_space<vmem>>, %arg5: memref<1x32xf32, #tpu.memory_space<vmem>>, %arg6: memref<1x32xf32, #tpu.memory_space<vmem>>, %arg7: memref<32x2048xbf16, #tpu.memory_space<vmem>>, %arg8: memref<1x2048xf32, #tpu.memory_space<vmem>>, %arg9: memref<2048x32xbf16, #tpu.memory_space<vmem>>, %arg10: memref<1x32xf32, #tpu.memory_space<vmem>>, %arg11: memref<1x32xf32, #tpu.memory_space<vmem>>, %arg12: memref<1x32xf32, #tpu.memory_space<vmem>>, %arg13: memref<16x32xf32, #tpu.memory_space<vmem>>) attributes {dimension_semantics = [], scalar_prefetch = 0 : i64, scratch_operands = 0 : i64, tpu.core_type = #tpu.core_type<tc>} {
    %c0 = arith.constant 0 : index
    %c0_0 = arith.constant 0 : index
    %0 = vector.load %arg0[%c0, %c0_0] : memref<16x32xf32, #tpu.memory_space<vmem>>, vector<16x32xf32>
    %1 = arith.truncf %0 : vector<16x32xf32> to vector<16x32xbf16>
    %c0_1 = arith.constant 0 : index
    %c0_2 = arith.constant 0 : index
    %2 = vector.load %arg1[%c0_1, %c0_2] : memref<32x96xbf16, #tpu.memory_space<vmem>>, vector<32x96xbf16>
    %cst = arith.constant dense<0.000000e+00> : vector<16x96xf32>
    %3 = tpu.matmul %1, %2, %cst {dimension_numbers = #tpu.dot_dimension_numbers<[1], [0], [0], [1], [0, 0, 1, 1], [], []>} : vector<16x32xbf16>, vector<32x96xbf16>, vector<16x96xf32> -> vector<16x96xf32>
    %c0_3 = arith.constant 0 : index
    %c0_4 = arith.constant 0 : index
    %4 = vector.load %arg2[%c0_3, %c0_4] : memref<1x96xf32, #tpu.memory_space<vmem>>, vector<1x96xf32>
    %5 = vector.broadcast %4 : vector<1x96xf32> to vector<16x96xf32>
    %6 = arith.addf %3, %5 : vector<16x96xf32>
    %7 = vector.extract_strided_slice %6 {offsets = [0, 0], sizes = [16, 32], strides = [1, 1]} : vector<16x96xf32> to vector<16x32xf32>
    %8 = vector.extract_strided_slice %6 {offsets = [0, 32], sizes = [16, 32], strides = [1, 1]} : vector<16x96xf32> to vector<16x32xf32>
    %9 = vector.extract_strided_slice %6 {offsets = [0, 64], sizes = [16, 32], strides = [1, 1]} : vector<16x96xf32> to vector<16x32xf32>
    %c0_5 = arith.constant 0 : index
    %c0_6 = arith.constant 0 : index
    %10 = vector.load %arg3[%c0_5, %c0_6] : memref<32x32xbf16, #tpu.memory_space<vmem>>, vector<32x32xbf16>
    %11 = vector.extract_strided_slice %7 {offsets = [0, 0], sizes = [8, 16], strides = [1, 1]} : vector<16x32xf32> to vector<8x16xf32>
    %12 = vector.extract_strided_slice %8 {offsets = [0, 0], sizes = [8, 16], strides = [1, 1]} : vector<16x32xf32> to vector<8x16xf32>
    %13 = vector.extract_strided_slice %9 {offsets = [0, 0], sizes = [8, 16], strides = [1, 1]} : vector<16x32xf32> to vector<8x16xf32>
    %14 = tpu.transpose %12, [1, 0] : vector<8x16xf32> -> vector<16x8xf32>
    %cst_7 = arith.constant dense<0.000000e+00> : vector<8x8xf32>
    %15 = tpu.matmul %11, %14, %cst_7 {dimension_numbers = #tpu.dot_dimension_numbers<[1], [0], [0], [1], [0, 0, 1, 1], [], []>} : vector<8x16xf32>, vector<16x8xf32>, vector<8x8xf32> -> vector<8x8xf32>
    %cst_8 = arith.constant 2.500000e-01 : f32
    %16 = vector.broadcast %cst_8 : f32 to vector<8x8xf32>
    %17 = arith.mulf %15, %16 : vector<8x8xf32>
    %cst_9 = arith.constant dense<0xFF800000> : vector<8xf32>
    %18 = vector.multi_reduction <maximumf>, %17, %cst_9 [1] : vector<8x8xf32> to vector<8xf32>
    %19 = vector.shape_cast %18 : vector<8xf32> to vector<8x1xf32>
    %20 = vector.broadcast %19 : vector<8x1xf32> to vector<8x8xf32>
    %21 = arith.subf %17, %20 : vector<8x8xf32>
    %22 = math.exp %21 : vector<8x8xf32>
    %cst_10 = arith.constant dense<0.000000e+00> : vector<8xf32>
    %23 = vector.multi_reduction <add>, %22, %cst_10 [1] : vector<8x8xf32> to vector<8xf32>
    %24 = vector.shape_cast %23 : vector<8xf32> to vector<8x1xf32>
    %25 = tpu.reciprocal %24 {approx = true} : vector<8x1xf32> -> vector<8x1xf32>
    %26 = vector.broadcast %25 : vector<8x1xf32> to vector<8x8xf32>
    %27 = arith.mulf %22, %26 : vector<8x8xf32>
    %cst_11 = arith.constant dense<0.000000e+00> : vector<8x16xf32>
    %28 = tpu.matmul %27, %13, %cst_11 {dimension_numbers = #tpu.dot_dimension_numbers<[1], [0], [0], [1], [0, 0, 1, 1], [], []>} : vector<8x8xf32>, vector<8x16xf32>, vector<8x16xf32> -> vector<8x16xf32>
    %29 = arith.truncf %28 : vector<8x16xf32> to vector<8x16xbf16>
    %30 = vector.extract_strided_slice %10 {offsets = [0, 0], sizes = [16, 32], strides = [1, 1]} : vector<32x32xbf16> to vector<16x32xbf16>
    %cst_12 = arith.constant dense<0.000000e+00> : vector<8x32xf32>
    %31 = tpu.matmul %29, %30, %cst_12 {dimension_numbers = #tpu.dot_dimension_numbers<[1], [0], [0], [1], [0, 0, 1, 1], [], []>} : vector<8x16xbf16>, vector<16x32xbf16>, vector<8x32xf32> -> vector<8x32xf32>
    %32 = vector.extract_strided_slice %7 {offsets = [0, 16], sizes = [8, 16], strides = [1, 1]} : vector<16x32xf32> to vector<8x16xf32>
    %33 = vector.extract_strided_slice %8 {offsets = [0, 16], sizes = [8, 16], strides = [1, 1]} : vector<16x32xf32> to vector<8x16xf32>
    %34 = vector.extract_strided_slice %9 {offsets = [0, 16], sizes = [8, 16], strides = [1, 1]} : vector<16x32xf32> to vector<8x16xf32>
    %35 = tpu.transpose %33, [1, 0] : vector<8x16xf32> -> vector<16x8xf32>
    %cst_13 = arith.constant dense<0.000000e+00> : vector<8x8xf32>
    %36 = tpu.matmul %32, %35, %cst_13 {dimension_numbers = #tpu.dot_dimension_numbers<[1], [0], [0], [1], [0, 0, 1, 1], [], []>} : vector<8x16xf32>, vector<16x8xf32>, vector<8x8xf32> -> vector<8x8xf32>
    %cst_14 = arith.constant 2.500000e-01 : f32
    %37 = vector.broadcast %cst_14 : f32 to vector<8x8xf32>
    %38 = arith.mulf %36, %37 : vector<8x8xf32>
    %cst_15 = arith.constant dense<0xFF800000> : vector<8xf32>
    %39 = vector.multi_reduction <maximumf>, %38, %cst_15 [1] : vector<8x8xf32> to vector<8xf32>
    %40 = vector.shape_cast %39 : vector<8xf32> to vector<8x1xf32>
    %41 = vector.broadcast %40 : vector<8x1xf32> to vector<8x8xf32>
    %42 = arith.subf %38, %41 : vector<8x8xf32>
    %43 = math.exp %42 : vector<8x8xf32>
    %cst_16 = arith.constant dense<0.000000e+00> : vector<8xf32>
    %44 = vector.multi_reduction <add>, %43, %cst_16 [1] : vector<8x8xf32> to vector<8xf32>
    %45 = vector.shape_cast %44 : vector<8xf32> to vector<8x1xf32>
    %46 = tpu.reciprocal %45 {approx = true} : vector<8x1xf32> -> vector<8x1xf32>
    %47 = vector.broadcast %46 : vector<8x1xf32> to vector<8x8xf32>
    %48 = arith.mulf %43, %47 : vector<8x8xf32>
    %cst_17 = arith.constant dense<0.000000e+00> : vector<8x16xf32>
    %49 = tpu.matmul %48, %34, %cst_17 {dimension_numbers = #tpu.dot_dimension_numbers<[1], [0], [0], [1], [0, 0, 1, 1], [], []>} : vector<8x8xf32>, vector<8x16xf32>, vector<8x16xf32> -> vector<8x16xf32>
    %50 = arith.truncf %49 : vector<8x16xf32> to vector<8x16xbf16>
    %51 = vector.extract_strided_slice %10 {offsets = [16, 0], sizes = [16, 32], strides = [1, 1]} : vector<32x32xbf16> to vector<16x32xbf16>
    %cst_18 = arith.constant dense<0.000000e+00> : vector<8x32xf32>
    %52 = tpu.matmul %50, %51, %cst_18 {dimension_numbers = #tpu.dot_dimension_numbers<[1], [0], [0], [1], [0, 0, 1, 1], [], []>} : vector<8x16xbf16>, vector<16x32xbf16>, vector<8x32xf32> -> vector<8x32xf32>
    %53 = arith.addf %31, %52 : vector<8x32xf32>
    %54 = vector.extract_strided_slice %7 {offsets = [8, 0], sizes = [8, 16], strides = [1, 1]} : vector<16x32xf32> to vector<8x16xf32>
    %55 = vector.extract_strided_slice %8 {offsets = [8, 0], sizes = [8, 16], strides = [1, 1]} : vector<16x32xf32> to vector<8x16xf32>
    %56 = vector.extract_strided_slice %9 {offsets = [8, 0], sizes = [8, 16], strides = [1, 1]} : vector<16x32xf32> to vector<8x16xf32>
    %57 = tpu.transpose %55, [1, 0] : vector<8x16xf32> -> vector<16x8xf32>
    %cst_19 = arith.constant dense<0.000000e+00> : vector<8x8xf32>
    %58 = tpu.matmul %54, %57, %cst_19 {dimension_numbers = #tpu.dot_dimension_numbers<[1], [0], [0], [1], [0, 0, 1, 1], [], []>} : vector<8x16xf32>, vector<16x8xf32>, vector<8x8xf32> -> vector<8x8xf32>
    %cst_20 = arith.constant 2.500000e-01 : f32
    %59 = vector.broadcast %cst_20 : f32 to vector<8x8xf32>
    %60 = arith.mulf %58, %59 : vector<8x8xf32>
    %cst_21 = arith.constant dense<0xFF800000> : vector<8xf32>
    %61 = vector.multi_reduction <maximumf>, %60, %cst_21 [1] : vector<8x8xf32> to vector<8xf32>
    %62 = vector.shape_cast %61 : vector<8xf32> to vector<8x1xf32>
    %63 = vector.broadcast %62 : vector<8x1xf32> to vector<8x8xf32>
    %64 = arith.subf %60, %63 : vector<8x8xf32>
    %65 = math.exp %64 : vector<8x8xf32>
    %cst_22 = arith.constant dense<0.000000e+00> : vector<8xf32>
    %66 = vector.multi_reduction <add>, %65, %cst_22 [1] : vector<8x8xf32> to vector<8xf32>
    %67 = vector.shape_cast %66 : vector<8xf32> to vector<8x1xf32>
    %68 = tpu.reciprocal %67 {approx = true} : vector<8x1xf32> -> vector<8x1xf32>
    %69 = vector.broadcast %68 : vector<8x1xf32> to vector<8x8xf32>
    %70 = arith.mulf %65, %69 : vector<8x8xf32>
    %cst_23 = arith.constant dense<0.000000e+00> : vector<8x16xf32>
    %71 = tpu.matmul %70, %56, %cst_23 {dimension_numbers = #tpu.dot_dimension_numbers<[1], [0], [0], [1], [0, 0, 1, 1], [], []>} : vector<8x8xf32>, vector<8x16xf32>, vector<8x16xf32> -> vector<8x16xf32>
    %72 = arith.truncf %71 : vector<8x16xf32> to vector<8x16xbf16>
    %73 = vector.extract_strided_slice %10 {offsets = [0, 0], sizes = [16, 32], strides = [1, 1]} : vector<32x32xbf16> to vector<16x32xbf16>
    %cst_24 = arith.constant dense<0.000000e+00> : vector<8x32xf32>
    %74 = tpu.matmul %72, %73, %cst_24 {dimension_numbers = #tpu.dot_dimension_numbers<[1], [0], [0], [1], [0, 0, 1, 1], [], []>} : vector<8x16xbf16>, vector<16x32xbf16>, vector<8x32xf32> -> vector<8x32xf32>
    %75 = vector.extract_strided_slice %7 {offsets = [8, 16], sizes = [8, 16], strides = [1, 1]} : vector<16x32xf32> to vector<8x16xf32>
    %76 = vector.extract_strided_slice %8 {offsets = [8, 16], sizes = [8, 16], strides = [1, 1]} : vector<16x32xf32> to vector<8x16xf32>
    %77 = vector.extract_strided_slice %9 {offsets = [8, 16], sizes = [8, 16], strides = [1, 1]} : vector<16x32xf32> to vector<8x16xf32>
    %78 = tpu.transpose %76, [1, 0] : vector<8x16xf32> -> vector<16x8xf32>
    %cst_25 = arith.constant dense<0.000000e+00> : vector<8x8xf32>
    %79 = tpu.matmul %75, %78, %cst_25 {dimension_numbers = #tpu.dot_dimension_numbers<[1], [0], [0], [1], [0, 0, 1, 1], [], []>} : vector<8x16xf32>, vector<16x8xf32>, vector<8x8xf32> -> vector<8x8xf32>
    %cst_26 = arith.constant 2.500000e-01 : f32
    %80 = vector.broadcast %cst_26 : f32 to vector<8x8xf32>
    %81 = arith.mulf %79, %80 : vector<8x8xf32>
    %cst_27 = arith.constant dense<0xFF800000> : vector<8xf32>
    %82 = vector.multi_reduction <maximumf>, %81, %cst_27 [1] : vector<8x8xf32> to vector<8xf32>
    %83 = vector.shape_cast %82 : vector<8xf32> to vector<8x1xf32>
    %84 = vector.broadcast %83 : vector<8x1xf32> to vector<8x8xf32>
    %85 = arith.subf %81, %84 : vector<8x8xf32>
    %86 = math.exp %85 : vector<8x8xf32>
    %cst_28 = arith.constant dense<0.000000e+00> : vector<8xf32>
    %87 = vector.multi_reduction <add>, %86, %cst_28 [1] : vector<8x8xf32> to vector<8xf32>
    %88 = vector.shape_cast %87 : vector<8xf32> to vector<8x1xf32>
    %89 = tpu.reciprocal %88 {approx = true} : vector<8x1xf32> -> vector<8x1xf32>
    %90 = vector.broadcast %89 : vector<8x1xf32> to vector<8x8xf32>
    %91 = arith.mulf %86, %90 : vector<8x8xf32>
    %cst_29 = arith.constant dense<0.000000e+00> : vector<8x16xf32>
    %92 = tpu.matmul %91, %77, %cst_29 {dimension_numbers = #tpu.dot_dimension_numbers<[1], [0], [0], [1], [0, 0, 1, 1], [], []>} : vector<8x8xf32>, vector<8x16xf32>, vector<8x16xf32> -> vector<8x16xf32>
    %93 = arith.truncf %92 : vector<8x16xf32> to vector<8x16xbf16>
    %94 = vector.extract_strided_slice %10 {offsets = [16, 0], sizes = [16, 32], strides = [1, 1]} : vector<32x32xbf16> to vector<16x32xbf16>
    %cst_30 = arith.constant dense<0.000000e+00> : vector<8x32xf32>
    %95 = tpu.matmul %93, %94, %cst_30 {dimension_numbers = #tpu.dot_dimension_numbers<[1], [0], [0], [1], [0, 0, 1, 1], [], []>} : vector<8x16xbf16>, vector<16x32xbf16>, vector<8x32xf32> -> vector<8x32xf32>
    %96 = arith.addf %74, %95 : vector<8x32xf32>
    %97 = tpu.concatenate %53, %96 in 0 : vector<8x32xf32>, vector<8x32xf32> -> vector<16x32xf32>
    %c0_31 = arith.constant 0 : index
    %c0_32 = arith.constant 0 : index
    %98 = vector.load %arg4[%c0_31, %c0_32] : memref<1x32xf32, #tpu.memory_space<vmem>>, vector<1x32xf32>
    %99 = vector.broadcast %98 : vector<1x32xf32> to vector<16x32xf32>
    %100 = arith.addf %97, %99 : vector<16x32xf32>
    %101 = arith.addf %0, %100 : vector<16x32xf32>
    %cst_33 = arith.constant dense<0.000000e+00> : vector<16xf32>
    %102 = vector.multi_reduction <add>, %101, %cst_33 [1] : vector<16x32xf32> to vector<16xf32>
    %103 = vector.shape_cast %102 : vector<16xf32> to vector<16x1xf32>
    %cst_34 = arith.constant 3.200000e+01 : f32
    %104 = vector.broadcast %cst_34 : f32 to vector<16x1xf32>
    %105 = arith.divf %103, %104 : vector<16x1xf32>
    %106 = vector.broadcast %105 : vector<16x1xf32> to vector<16x32xf32>
    %107 = arith.subf %101, %106 : vector<16x32xf32>
    %108 = arith.mulf %107, %107 : vector<16x32xf32>
    %cst_35 = arith.constant dense<0.000000e+00> : vector<16xf32>
    %109 = vector.multi_reduction <add>, %108, %cst_35 [1] : vector<16x32xf32> to vector<16xf32>
    %110 = vector.shape_cast %109 : vector<16xf32> to vector<16x1xf32>
    %cst_36 = arith.constant 3.200000e+01 : f32
    %111 = vector.broadcast %cst_36 : f32 to vector<16x1xf32>
    %112 = arith.divf %110, %111 : vector<16x1xf32>
    %113 = vector.broadcast %105 : vector<16x1xf32> to vector<16x32xf32>
    %114 = arith.subf %101, %113 : vector<16x32xf32>
    %cst_37 = arith.constant 9.99999974E-6 : f32
    %115 = vector.broadcast %cst_37 : f32 to vector<16x1xf32>
    %116 = arith.addf %112, %115 : vector<16x1xf32>
    %117 = math.rsqrt %116 : vector<16x1xf32>
    %118 = vector.broadcast %117 : vector<16x1xf32> to vector<16x32xf32>
    %119 = arith.mulf %114, %118 : vector<16x32xf32>
    %c0_38 = arith.constant 0 : index
    %c0_39 = arith.constant 0 : index
    %120 = vector.load %arg5[%c0_38, %c0_39] : memref<1x32xf32, #tpu.memory_space<vmem>>, vector<1x32xf32>
    %121 = vector.broadcast %120 : vector<1x32xf32> to vector<16x32xf32>
    %122 = arith.mulf %119, %121 : vector<16x32xf32>
    %c0_40 = arith.constant 0 : index
    %c0_41 = arith.constant 0 : index
    %123 = vector.load %arg6[%c0_40, %c0_41] : memref<1x32xf32, #tpu.memory_space<vmem>>, vector<1x32xf32>
    %124 = vector.broadcast %123 : vector<1x32xf32> to vector<16x32xf32>
    %125 = arith.addf %122, %124 : vector<16x32xf32>
    %126 = arith.truncf %125 : vector<16x32xf32> to vector<16x32xbf16>
    %c0_42 = arith.constant 0 : index
    %c0_43 = arith.constant 0 : index
    %127 = vector.load %arg7[%c0_42, %c0_43] : memref<32x2048xbf16, #tpu.memory_space<vmem>>, vector<32x2048xbf16>
    %cst_44 = arith.constant dense<0.000000e+00> : vector<16x2048xf32>
    %128 = tpu.matmul %126, %127, %cst_44 {dimension_numbers = #tpu.dot_dimension_numbers<[1], [0], [0], [1], [0, 0, 1, 1], [], []>} : vector<16x32xbf16>, vector<32x2048xbf16>, vector<16x2048xf32> -> vector<16x2048xf32>
    %c0_45 = arith.constant 0 : index
    %c0_46 = arith.constant 0 : index
    %129 = vector.load %arg8[%c0_45, %c0_46] : memref<1x2048xf32, #tpu.memory_space<vmem>>, vector<1x2048xf32>
    %130 = vector.broadcast %129 : vector<1x2048xf32> to vector<16x2048xf32>
    %131 = arith.addf %128, %130 : vector<16x2048xf32>
    %cst_47 = arith.constant 0.000000e+00 : f32
    %132 = vector.broadcast %cst_47 : f32 to vector<16x2048xf32>
    %133 = arith.maximumf %131, %132 : vector<16x2048xf32>
    %134 = arith.truncf %133 : vector<16x2048xf32> to vector<16x2048xbf16>
    %c0_48 = arith.constant 0 : index
    %c0_49 = arith.constant 0 : index
    %135 = vector.load %arg9[%c0_48, %c0_49] : memref<2048x32xbf16, #tpu.memory_space<vmem>>, vector<2048x32xbf16>
    %cst_50 = arith.constant dense<0.000000e+00> : vector<16x32xf32>
    %136 = tpu.matmul %134, %135, %cst_50 {dimension_numbers = #tpu.dot_dimension_numbers<[1], [0], [0], [1], [0, 0, 1, 1], [], []>} : vector<16x2048xbf16>, vector<2048x32xbf16>, vector<16x32xf32> -> vector<16x32xf32>
    %c0_51 = arith.constant 0 : index
    %c0_52 = arith.constant 0 : index
    %137 = vector.load %arg10[%c0_51, %c0_52] : memref<1x32xf32, #tpu.memory_space<vmem>>, vector<1x32xf32>
    %138 = vector.broadcast %137 : vector<1x32xf32> to vector<16x32xf32>
    %139 = arith.addf %136, %138 : vector<16x32xf32>
    %140 = arith.addf %125, %139 : vector<16x32xf32>
    %cst_53 = arith.constant dense<0.000000e+00> : vector<16xf32>
    %141 = vector.multi_reduction <add>, %140, %cst_53 [1] : vector<16x32xf32> to vector<16xf32>
    %142 = vector.shape_cast %141 : vector<16xf32> to vector<16x1xf32>
    %cst_54 = arith.constant 3.200000e+01 : f32
    %143 = vector.broadcast %cst_54 : f32 to vector<16x1xf32>
    %144 = arith.divf %142, %143 : vector<16x1xf32>
    %145 = vector.broadcast %144 : vector<16x1xf32> to vector<16x32xf32>
    %146 = arith.subf %140, %145 : vector<16x32xf32>
    %147 = arith.mulf %146, %146 : vector<16x32xf32>
    %cst_55 = arith.constant dense<0.000000e+00> : vector<16xf32>
    %148 = vector.multi_reduction <add>, %147, %cst_55 [1] : vector<16x32xf32> to vector<16xf32>
    %149 = vector.shape_cast %148 : vector<16xf32> to vector<16x1xf32>
    %cst_56 = arith.constant 3.200000e+01 : f32
    %150 = vector.broadcast %cst_56 : f32 to vector<16x1xf32>
    %151 = arith.divf %149, %150 : vector<16x1xf32>
    %152 = vector.broadcast %144 : vector<16x1xf32> to vector<16x32xf32>
    %153 = arith.subf %140, %152 : vector<16x32xf32>
    %cst_57 = arith.constant 9.99999974E-6 : f32
    %154 = vector.broadcast %cst_57 : f32 to vector<16x1xf32>
    %155 = arith.addf %151, %154 : vector<16x1xf32>
    %156 = math.rsqrt %155 : vector<16x1xf32>
    %157 = vector.broadcast %156 : vector<16x1xf32> to vector<16x32xf32>
    %158 = arith.mulf %153, %157 : vector<16x32xf32>
    %c0_58 = arith.constant 0 : index
    %c0_59 = arith.constant 0 : index
    %159 = vector.load %arg11[%c0_58, %c0_59] : memref<1x32xf32, #tpu.memory_space<vmem>>, vector<1x32xf32>
    %160 = vector.broadcast %159 : vector<1x32xf32> to vector<16x32xf32>
    %161 = arith.mulf %158, %160 : vector<16x32xf32>
    %c0_60 = arith.constant 0 : index
    %c0_61 = arith.constant 0 : index
    %162 = vector.load %arg12[%c0_60, %c0_61] : memref<1x32xf32, #tpu.memory_space<vmem>>, vector<1x32xf32>
    %163 = vector.broadcast %162 : vector<1x32xf32> to vector<16x32xf32>
    %164 = arith.addf %161, %163 : vector<16x32xf32>
    %c0_62 = arith.constant 0 : index
    %c0_63 = arith.constant 0 : index
    %165 = vector.load %arg13[%c0_62, %c0_63] : memref<16x32xf32, #tpu.memory_space<vmem>>, vector<16x32xf32>
    tpu.vector_store %arg13[%c0_62, %c0_63], %164 {strides = array<i32>} : memref<16x32xf32, #tpu.memory_space<vmem>>, vector<16x32xf32>,
    return
  }
}

module attributes {stable_mosaic.version = 11 : i64} {
  func.func @_bilstm_kernel(%arg0: memref<2x8x32xf32, #tpu.memory_space<vmem>>, %arg1: memref<32x128xbf16, #tpu.memory_space<vmem>>, %arg2: memref<32x128xbf16, #tpu.memory_space<vmem>>, %arg3: memref<32x128xbf16, #tpu.memory_space<vmem>>, %arg4: memref<32x128xbf16, #tpu.memory_space<vmem>>, %arg5: memref<1x128xf32, #tpu.memory_space<vmem>>, %arg6: memref<1x128xf32, #tpu.memory_space<vmem>>, %arg7: memref<2x8x32xf32, #tpu.memory_space<vmem>>, %arg8: memref<2x8x32xf32, #tpu.memory_space<vmem>>, %arg9: memref<8x32xf32, #tpu.memory_space<vmem>>, %arg10: memref<8x32xf32, #tpu.memory_space<vmem>>, %arg11: memref<8x32xf32, #tpu.memory_space<vmem>>, %arg12: memref<8x32xf32, #tpu.memory_space<vmem>>, %arg13: memref<2x8x128xf32, #tpu.memory_space<vmem>>, %arg14: memref<2x8x128xf32, #tpu.memory_space<vmem>>) attributes {dimension_semantics = [], scalar_prefetch = 0 : i64, scratch_operands = 2 : i64, tpu.core_type = #tpu.core_type<tc>} {
    %c0 = arith.constant 0 : index
    %c0_0 = arith.constant 0 : index
    %c0_1 = arith.constant 0 : index
    %0 = vector.load %arg0[%c0, %c0_0, %c0_1] : memref<2x8x32xf32, #tpu.memory_space<vmem>>, vector<2x8x32xf32>
    %1 = vector.shape_cast %0 : vector<2x8x32xf32> to vector<16x32xf32>
    %2 = arith.truncf %1 : vector<16x32xf32> to vector<16x32xbf16>
    %c0_2 = arith.constant 0 : index
    %c0_3 = arith.constant 0 : index
    %3 = vector.load %arg1[%c0_2, %c0_3] : memref<32x128xbf16, #tpu.memory_space<vmem>>, vector<32x128xbf16>
    %cst = arith.constant dense<0.000000e+00> : vector<16x128xf32>
    %4 = tpu.matmul %2, %3, %cst {dimension_numbers = #tpu.dot_dimension_numbers<[1], [0], [0], [1], [0, 0, 1, 1], [], []>} : vector<16x32xbf16>, vector<32x128xbf16>, vector<16x128xf32> -> vector<16x128xf32>
    %c0_4 = arith.constant 0 : index
    %c0_5 = arith.constant 0 : index
    %5 = vector.load %arg5[%c0_4, %c0_5] : memref<1x128xf32, #tpu.memory_space<vmem>>, vector<1x128xf32>
    %6 = vector.broadcast %5 : vector<1x128xf32> to vector<16x128xf32>
    %7 = arith.addf %4, %6 : vector<16x128xf32>
    %8 = vector.shape_cast %7 : vector<16x128xf32> to vector<2x8x128xf32>
    %c0_6 = arith.constant 0 : index
    %c0_7 = arith.constant 0 : index
    %c0_8 = arith.constant 0 : index
    %9 = vector.load %arg13[%c0_6, %c0_7, %c0_8] : memref<2x8x128xf32, #tpu.memory_space<vmem>>, vector<2x8x128xf32>
    tpu.vector_store %arg13[%c0_6, %c0_7, %c0_8], %8 {strides = array<i32>} : memref<2x8x128xf32, #tpu.memory_space<vmem>>, vector<2x8x128xf32>,
    %c0_9 = arith.constant 0 : index
    %c0_10 = arith.constant 0 : index
    %10 = vector.load %arg2[%c0_9, %c0_10] : memref<32x128xbf16, #tpu.memory_space<vmem>>, vector<32x128xbf16>
    %cst_11 = arith.constant dense<0.000000e+00> : vector<16x128xf32>
    %11 = tpu.matmul %2, %10, %cst_11 {dimension_numbers = #tpu.dot_dimension_numbers<[1], [0], [0], [1], [0, 0, 1, 1], [], []>} : vector<16x32xbf16>, vector<32x128xbf16>, vector<16x128xf32> -> vector<16x128xf32>
    %c0_12 = arith.constant 0 : index
    %c0_13 = arith.constant 0 : index
    %12 = vector.load %arg6[%c0_12, %c0_13] : memref<1x128xf32, #tpu.memory_space<vmem>>, vector<1x128xf32>
    %13 = vector.broadcast %12 : vector<1x128xf32> to vector<16x128xf32>
    %14 = arith.addf %11, %13 : vector<16x128xf32>
    %15 = vector.shape_cast %14 : vector<16x128xf32> to vector<2x8x128xf32>
    %c0_14 = arith.constant 0 : index
    %c0_15 = arith.constant 0 : index
    %c0_16 = arith.constant 0 : index
    %16 = vector.load %arg14[%c0_14, %c0_15, %c0_16] : memref<2x8x128xf32, #tpu.memory_space<vmem>>, vector<2x8x128xf32>
    tpu.vector_store %arg14[%c0_14, %c0_15, %c0_16], %15 {strides = array<i32>} : memref<2x8x128xf32, #tpu.memory_space<vmem>>, vector<2x8x128xf32>,
    %cst_17 = arith.constant 0.000000e+00 : f32
    %17 = vector.broadcast %cst_17 : f32 to vector<8x32xf32>
    %c0_18 = arith.constant 0 : index
    %c0_19 = arith.constant 0 : index
    %18 = vector.load %arg9[%c0_18, %c0_19] : memref<8x32xf32, #tpu.memory_space<vmem>>, vector<8x32xf32>
    tpu.vector_store %arg9[%c0_18, %c0_19], %17 {strides = array<i32>} : memref<8x32xf32, #tpu.memory_space<vmem>>, vector<8x32xf32>,
    %cst_20 = arith.constant 0.000000e+00 : f32
    %19 = vector.broadcast %cst_20 : f32 to vector<8x32xf32>
    %c0_21 = arith.constant 0 : index
    %c0_22 = arith.constant 0 : index
    %20 = vector.load %arg10[%c0_21, %c0_22] : memref<8x32xf32, #tpu.memory_space<vmem>>, vector<8x32xf32>
    tpu.vector_store %arg10[%c0_21, %c0_22], %19 {strides = array<i32>} : memref<8x32xf32, #tpu.memory_space<vmem>>, vector<8x32xf32>,
    %cst_23 = arith.constant 0.000000e+00 : f32
    %21 = vector.broadcast %cst_23 : f32 to vector<8x32xf32>
    %c0_24 = arith.constant 0 : index
    %c0_25 = arith.constant 0 : index
    %22 = vector.load %arg11[%c0_24, %c0_25] : memref<8x32xf32, #tpu.memory_space<vmem>>, vector<8x32xf32>
    tpu.vector_store %arg11[%c0_24, %c0_25], %21 {strides = array<i32>} : memref<8x32xf32, #tpu.memory_space<vmem>>, vector<8x32xf32>,
    %cst_26 = arith.constant 0.000000e+00 : f32
    %23 = vector.broadcast %cst_26 : f32 to vector<8x32xf32>
    %c0_27 = arith.constant 0 : index
    %c0_28 = arith.constant 0 : index
    %24 = vector.load %arg12[%c0_27, %c0_28] : memref<8x32xf32, #tpu.memory_space<vmem>>, vector<8x32xf32>
    tpu.vector_store %arg12[%c0_27, %c0_28], %23 {strides = array<i32>} : memref<8x32xf32, #tpu.memory_space<vmem>>, vector<8x32xf32>,
    %c0_i32 = arith.constant 0 : i32
    %c1_i32 = arith.constant 1 : i32
    %25 = arith.subi %c1_i32, %c0_i32 : i32
    %26 = arith.index_cast %c0_i32 : i32 to index
    %c0_29 = arith.constant 0 : index
    %c0_30 = arith.constant 0 : index
    %27 = vector.load %arg13[%26, %c0_29, %c0_30] : memref<2x8x128xf32, #tpu.memory_space<vmem>>, vector<1x8x128xf32>
    %28 = vector.shape_cast %27 : vector<1x8x128xf32> to vector<8x128xf32>
    %c0_31 = arith.constant 0 : index
    %c0_32 = arith.constant 0 : index
    %29 = vector.load %arg9[%c0_31, %c0_32] : memref<8x32xf32, #tpu.memory_space<vmem>>, vector<8x32xf32>
    %30 = arith.truncf %29 : vector<8x32xf32> to vector<8x32xbf16>
    %c0_33 = arith.constant 0 : index
    %c0_34 = arith.constant 0 : index
    %31 = vector.load %arg3[%c0_33, %c0_34] : memref<32x128xbf16, #tpu.memory_space<vmem>>, vector<32x128xbf16>
    %cst_35 = arith.constant dense<0.000000e+00> : vector<8x128xf32>
    %32 = tpu.matmul %30, %31, %cst_35 {dimension_numbers = #tpu.dot_dimension_numbers<[1], [0], [0], [1], [0, 0, 1, 1], [], []>} : vector<8x32xbf16>, vector<32x128xbf16>, vector<8x128xf32> -> vector<8x128xf32>
    %33 = arith.addf %28, %32 : vector<8x128xf32>
    %34 = arith.index_cast %25 : i32 to index
    %c0_36 = arith.constant 0 : index
    %c0_37 = arith.constant 0 : index
    %35 = vector.load %arg14[%34, %c0_36, %c0_37] : memref<2x8x128xf32, #tpu.memory_space<vmem>>, vector<1x8x128xf32>
    %36 = vector.shape_cast %35 : vector<1x8x128xf32> to vector<8x128xf32>
    %c0_38 = arith.constant 0 : index
    %c0_39 = arith.constant 0 : index
    %37 = vector.load %arg11[%c0_38, %c0_39] : memref<8x32xf32, #tpu.memory_space<vmem>>, vector<8x32xf32>
    %38 = arith.truncf %37 : vector<8x32xf32> to vector<8x32xbf16>
    %c0_40 = arith.constant 0 : index
    %c0_41 = arith.constant 0 : index
    %39 = vector.load %arg4[%c0_40, %c0_41] : memref<32x128xbf16, #tpu.memory_space<vmem>>, vector<32x128xbf16>
    %cst_42 = arith.constant dense<0.000000e+00> : vector<8x128xf32>
    %40 = tpu.matmul %38, %39, %cst_42 {dimension_numbers = #tpu.dot_dimension_numbers<[1], [0], [0], [1], [0, 0, 1, 1], [], []>} : vector<8x32xbf16>, vector<32x128xbf16>, vector<8x128xf32> -> vector<8x128xf32>
    %41 = arith.addf %36, %40 : vector<8x128xf32>
    %c0_43 = arith.constant 0 : index
    %c0_44 = arith.constant 0 : index
    %42 = vector.load %arg10[%c0_43, %c0_44] : memref<8x32xf32, #tpu.memory_space<vmem>>, vector<8x32xf32>
    %43 = vector.extract_strided_slice %33 {offsets = [0, 0], sizes = [8, 32], strides = [1, 1]} : vector<8x128xf32> to vector<8x32xf32>
    %44 = arith.negf %43 : vector<8x32xf32>
    %45 = math.exp %44 : vector<8x32xf32>
    %cst_45 = arith.constant 1.000000e+00 : f32
    %46 = vector.broadcast %cst_45 : f32 to vector<8x32xf32>
    %47 = arith.addf %46, %45 : vector<8x32xf32>
    %48 = arith.divf %46, %47 : vector<8x32xf32>
    %49 = vector.extract_strided_slice %33 {offsets = [0, 32], sizes = [8, 32], strides = [1, 1]} : vector<8x128xf32> to vector<8x32xf32>
    %50 = arith.negf %49 : vector<8x32xf32>
    %51 = math.exp %50 : vector<8x32xf32>
    %cst_46 = arith.constant 1.000000e+00 : f32
    %52 = vector.broadcast %cst_46 : f32 to vector<8x32xf32>
    %53 = arith.addf %52, %51 : vector<8x32xf32>
    %54 = arith.divf %52, %53 : vector<8x32xf32>
    %55 = vector.extract_strided_slice %33 {offsets = [0, 64], sizes = [8, 32], strides = [1, 1]} : vector<8x128xf32> to vector<8x32xf32>
    %56 = math.tanh %55 : vector<8x32xf32>
    %57 = vector.extract_strided_slice %33 {offsets = [0, 96], sizes = [8, 32], strides = [1, 1]} : vector<8x128xf32> to vector<8x32xf32>
    %58 = arith.negf %57 : vector<8x32xf32>
    %59 = math.exp %58 : vector<8x32xf32>
    %cst_47 = arith.constant 1.000000e+00 : f32
    %60 = vector.broadcast %cst_47 : f32 to vector<8x32xf32>
    %61 = arith.addf %60, %59 : vector<8x32xf32>
    %62 = arith.divf %60, %61 : vector<8x32xf32>
    %63 = arith.mulf %54, %42 : vector<8x32xf32>
    %64 = arith.mulf %48, %56 : vector<8x32xf32>
    %65 = arith.addf %63, %64 : vector<8x32xf32>
    %66 = math.tanh %65 : vector<8x32xf32>
    %67 = arith.mulf %62, %66 : vector<8x32xf32>
    %c0_48 = arith.constant 0 : index
    %c0_49 = arith.constant 0 : index
    %68 = vector.load %arg12[%c0_48, %c0_49] : memref<8x32xf32, #tpu.memory_space<vmem>>, vector<8x32xf32>
    %69 = vector.extract_strided_slice %41 {offsets = [0, 0], sizes = [8, 32], strides = [1, 1]} : vector<8x128xf32> to vector<8x32xf32>
    %70 = arith.negf %69 : vector<8x32xf32>
    %71 = math.exp %70 : vector<8x32xf32>
    %cst_50 = arith.constant 1.000000e+00 : f32
    %72 = vector.broadcast %cst_50 : f32 to vector<8x32xf32>
    %73 = arith.addf %72, %71 : vector<8x32xf32>
    %74 = arith.divf %72, %73 : vector<8x32xf32>
    %75 = vector.extract_strided_slice %41 {offsets = [0, 32], sizes = [8, 32], strides = [1, 1]} : vector<8x128xf32> to vector<8x32xf32>
    %76 = arith.negf %75 : vector<8x32xf32>
    %77 = math.exp %76 : vector<8x32xf32>
    %cst_51 = arith.constant 1.000000e+00 : f32
    %78 = vector.broadcast %cst_51 : f32 to vector<8x32xf32>
    %79 = arith.addf %78, %77 : vector<8x32xf32>
    %80 = arith.divf %78, %79 : vector<8x32xf32>
    %81 = vector.extract_strided_slice %41 {offsets = [0, 64], sizes = [8, 32], strides = [1, 1]} : vector<8x128xf32> to vector<8x32xf32>
    %82 = math.tanh %81 : vector<8x32xf32>
    %83 = vector.extract_strided_slice %41 {offsets = [0, 96], sizes = [8, 32], strides = [1, 1]} : vector<8x128xf32> to vector<8x32xf32>
    %84 = arith.negf %83 : vector<8x32xf32>
    %85 = math.exp %84 : vector<8x32xf32>
    %cst_52 = arith.constant 1.000000e+00 : f32
    %86 = vector.broadcast %cst_52 : f32 to vector<8x32xf32>
    %87 = arith.addf %86, %85 : vector<8x32xf32>
    %88 = arith.divf %86, %87 : vector<8x32xf32>
    %89 = arith.mulf %80, %68 : vector<8x32xf32>
    %90 = arith.mulf %74, %82 : vector<8x32xf32>
    %91 = arith.addf %89, %90 : vector<8x32xf32>
    %92 = math.tanh %91 : vector<8x32xf32>
    %93 = arith.mulf %88, %92 : vector<8x32xf32>
    %c0_53 = arith.constant 0 : index
    %c0_54 = arith.constant 0 : index
    %94 = vector.load %arg9[%c0_53, %c0_54] : memref<8x32xf32, #tpu.memory_space<vmem>>, vector<8x32xf32>
    tpu.vector_store %arg9[%c0_53, %c0_54], %67 {strides = array<i32>} : memref<8x32xf32, #tpu.memory_space<vmem>>, vector<8x32xf32>,
    %c0_55 = arith.constant 0 : index
    %c0_56 = arith.constant 0 : index
    %95 = vector.load %arg10[%c0_55, %c0_56] : memref<8x32xf32, #tpu.memory_space<vmem>>, vector<8x32xf32>
    tpu.vector_store %arg10[%c0_55, %c0_56], %65 {strides = array<i32>} : memref<8x32xf32, #tpu.memory_space<vmem>>, vector<8x32xf32>,
    %c0_57 = arith.constant 0 : index
    %c0_58 = arith.constant 0 : index
    %96 = vector.load %arg11[%c0_57, %c0_58] : memref<8x32xf32, #tpu.memory_space<vmem>>, vector<8x32xf32>
    tpu.vector_store %arg11[%c0_57, %c0_58], %93 {strides = array<i32>} : memref<8x32xf32, #tpu.memory_space<vmem>>, vector<8x32xf32>,
    %c0_59 = arith.constant 0 : index
    %c0_60 = arith.constant 0 : index
    %97 = vector.load %arg12[%c0_59, %c0_60] : memref<8x32xf32, #tpu.memory_space<vmem>>, vector<8x32xf32>
    tpu.vector_store %arg12[%c0_59, %c0_60], %91 {strides = array<i32>} : memref<8x32xf32, #tpu.memory_space<vmem>>, vector<8x32xf32>,
    %98 = arith.index_cast %c0_i32 : i32 to index
    %c0_61 = arith.constant 0 : index
    %c0_62 = arith.constant 0 : index
    %99 = vector.load %arg7[%98, %c0_61, %c0_62] : memref<2x8x32xf32, #tpu.memory_space<vmem>>, vector<1x8x32xf32>
    %100 = vector.shape_cast %99 : vector<1x8x32xf32> to vector<8x32xf32>
    %101 = vector.shape_cast %67 : vector<8x32xf32> to vector<1x8x32xf32>
    tpu.vector_store %arg7[%98, %c0_61, %c0_62], %101 {strides = array<i32>} : memref<2x8x32xf32, #tpu.memory_space<vmem>>, vector<1x8x32xf32>,
    %102 = arith.index_cast %25 : i32 to index
    %c0_63 = arith.constant 0 : index
    %c0_64 = arith.constant 0 : index
    %103 = vector.load %arg8[%102, %c0_63, %c0_64] : memref<2x8x32xf32, #tpu.memory_space<vmem>>, vector<1x8x32xf32>
    %104 = vector.shape_cast %103 : vector<1x8x32xf32> to vector<8x32xf32>
    %105 = vector.shape_cast %93 : vector<8x32xf32> to vector<1x8x32xf32>
    tpu.vector_store %arg8[%102, %c0_63, %c0_64], %105 {strides = array<i32>} : memref<2x8x32xf32, #tpu.memory_space<vmem>>, vector<1x8x32xf32>,
    %c1_i32_65 = arith.constant 1 : i32
    %c1_i32_66 = arith.constant 1 : i32
    %106 = arith.subi %c1_i32_66, %c1_i32_65 : i32
    %107 = arith.index_cast %c1_i32_65 : i32 to index
    %c0_67 = arith.constant 0 : index
    %c0_68 = arith.constant 0 : index
    %108 = vector.load %arg13[%107, %c0_67, %c0_68] : memref<2x8x128xf32, #tpu.memory_space<vmem>>, vector<1x8x128xf32>
    %109 = vector.shape_cast %108 : vector<1x8x128xf32> to vector<8x128xf32>
    %c0_69 = arith.constant 0 : index
    %c0_70 = arith.constant 0 : index
    %110 = vector.load %arg9[%c0_69, %c0_70] : memref<8x32xf32, #tpu.memory_space<vmem>>, vector<8x32xf32>
    %111 = arith.truncf %110 : vector<8x32xf32> to vector<8x32xbf16>
    %c0_71 = arith.constant 0 : index
    %c0_72 = arith.constant 0 : index
    %112 = vector.load %arg3[%c0_71, %c0_72] : memref<32x128xbf16, #tpu.memory_space<vmem>>, vector<32x128xbf16>
    %cst_73 = arith.constant dense<0.000000e+00> : vector<8x128xf32>
    %113 = tpu.matmul %111, %112, %cst_73 {dimension_numbers = #tpu.dot_dimension_numbers<[1], [0], [0], [1], [0, 0, 1, 1], [], []>} : vector<8x32xbf16>, vector<32x128xbf16>, vector<8x128xf32> -> vector<8x128xf32>
    %114 = arith.addf %109, %113 : vector<8x128xf32>
    %115 = arith.index_cast %106 : i32 to index
    %c0_74 = arith.constant 0 : index
    %c0_75 = arith.constant 0 : index
    %116 = vector.load %arg14[%115, %c0_74, %c0_75] : memref<2x8x128xf32, #tpu.memory_space<vmem>>, vector<1x8x128xf32>
    %117 = vector.shape_cast %116 : vector<1x8x128xf32> to vector<8x128xf32>
    %c0_76 = arith.constant 0 : index
    %c0_77 = arith.constant 0 : index
    %118 = vector.load %arg11[%c0_76, %c0_77] : memref<8x32xf32, #tpu.memory_space<vmem>>, vector<8x32xf32>
    %119 = arith.truncf %118 : vector<8x32xf32> to vector<8x32xbf16>
    %c0_78 = arith.constant 0 : index
    %c0_79 = arith.constant 0 : index
    %120 = vector.load %arg4[%c0_78, %c0_79] : memref<32x128xbf16, #tpu.memory_space<vmem>>, vector<32x128xbf16>
    %cst_80 = arith.constant dense<0.000000e+00> : vector<8x128xf32>
    %121 = tpu.matmul %119, %120, %cst_80 {dimension_numbers = #tpu.dot_dimension_numbers<[1], [0], [0], [1], [0, 0, 1, 1], [], []>} : vector<8x32xbf16>, vector<32x128xbf16>, vector<8x128xf32> -> vector<8x128xf32>
    %122 = arith.addf %117, %121 : vector<8x128xf32>
    %c0_81 = arith.constant 0 : index
    %c0_82 = arith.constant 0 : index
    %123 = vector.load %arg10[%c0_81, %c0_82] : memref<8x32xf32, #tpu.memory_space<vmem>>, vector<8x32xf32>
    %124 = vector.extract_strided_slice %114 {offsets = [0, 0], sizes = [8, 32], strides = [1, 1]} : vector<8x128xf32> to vector<8x32xf32>
    %125 = arith.negf %124 : vector<8x32xf32>
    %126 = math.exp %125 : vector<8x32xf32>
    %cst_83 = arith.constant 1.000000e+00 : f32
    %127 = vector.broadcast %cst_83 : f32 to vector<8x32xf32>
    %128 = arith.addf %127, %126 : vector<8x32xf32>
    %129 = arith.divf %127, %128 : vector<8x32xf32>
    %130 = vector.extract_strided_slice %114 {offsets = [0, 32], sizes = [8, 32], strides = [1, 1]} : vector<8x128xf32> to vector<8x32xf32>
    %131 = arith.negf %130 : vector<8x32xf32>
    %132 = math.exp %131 : vector<8x32xf32>
    %cst_84 = arith.constant 1.000000e+00 : f32
    %133 = vector.broadcast %cst_84 : f32 to vector<8x32xf32>
    %134 = arith.addf %133, %132 : vector<8x32xf32>
    %135 = arith.divf %133, %134 : vector<8x32xf32>
    %136 = vector.extract_strided_slice %114 {offsets = [0, 64], sizes = [8, 32], strides = [1, 1]} : vector<8x128xf32> to vector<8x32xf32>
    %137 = math.tanh %136 : vector<8x32xf32>
    %138 = vector.extract_strided_slice %114 {offsets = [0, 96], sizes = [8, 32], strides = [1, 1]} : vector<8x128xf32> to vector<8x32xf32>
    %139 = arith.negf %138 : vector<8x32xf32>
    %140 = math.exp %139 : vector<8x32xf32>
    %cst_85 = arith.constant 1.000000e+00 : f32
    %141 = vector.broadcast %cst_85 : f32 to vector<8x32xf32>
    %142 = arith.addf %141, %140 : vector<8x32xf32>
    %143 = arith.divf %141, %142 : vector<8x32xf32>
    %144 = arith.mulf %135, %123 : vector<8x32xf32>
    %145 = arith.mulf %129, %137 : vector<8x32xf32>
    %146 = arith.addf %144, %145 : vector<8x32xf32>
    %147 = math.tanh %146 : vector<8x32xf32>
    %148 = arith.mulf %143, %147 : vector<8x32xf32>
    %c0_86 = arith.constant 0 : index
    %c0_87 = arith.constant 0 : index
    %149 = vector.load %arg12[%c0_86, %c0_87] : memref<8x32xf32, #tpu.memory_space<vmem>>, vector<8x32xf32>
    %150 = vector.extract_strided_slice %122 {offsets = [0, 0], sizes = [8, 32], strides = [1, 1]} : vector<8x128xf32> to vector<8x32xf32>
    %151 = arith.negf %150 : vector<8x32xf32>
    %152 = math.exp %151 : vector<8x32xf32>
    %cst_88 = arith.constant 1.000000e+00 : f32
    %153 = vector.broadcast %cst_88 : f32 to vector<8x32xf32>
    %154 = arith.addf %153, %152 : vector<8x32xf32>
    %155 = arith.divf %153, %154 : vector<8x32xf32>
    %156 = vector.extract_strided_slice %122 {offsets = [0, 32], sizes = [8, 32], strides = [1, 1]} : vector<8x128xf32> to vector<8x32xf32>
    %157 = arith.negf %156 : vector<8x32xf32>
    %158 = math.exp %157 : vector<8x32xf32>
    %cst_89 = arith.constant 1.000000e+00 : f32
    %159 = vector.broadcast %cst_89 : f32 to vector<8x32xf32>
    %160 = arith.addf %159, %158 : vector<8x32xf32>
    %161 = arith.divf %159, %160 : vector<8x32xf32>
    %162 = vector.extract_strided_slice %122 {offsets = [0, 64], sizes = [8, 32], strides = [1, 1]} : vector<8x128xf32> to vector<8x32xf32>
    %163 = math.tanh %162 : vector<8x32xf32>
    %164 = vector.extract_strided_slice %122 {offsets = [0, 96], sizes = [8, 32], strides = [1, 1]} : vector<8x128xf32> to vector<8x32xf32>
    %165 = arith.negf %164 : vector<8x32xf32>
    %166 = math.exp %165 : vector<8x32xf32>
    %cst_90 = arith.constant 1.000000e+00 : f32
    %167 = vector.broadcast %cst_90 : f32 to vector<8x32xf32>
    %168 = arith.addf %167, %166 : vector<8x32xf32>
    %169 = arith.divf %167, %168 : vector<8x32xf32>
    %170 = arith.mulf %161, %149 : vector<8x32xf32>
    %171 = arith.mulf %155, %163 : vector<8x32xf32>
    %172 = arith.addf %170, %171 : vector<8x32xf32>
    %173 = math.tanh %172 : vector<8x32xf32>
    %174 = arith.mulf %169, %173 : vector<8x32xf32>
    %c0_91 = arith.constant 0 : index
    %c0_92 = arith.constant 0 : index
    %175 = vector.load %arg9[%c0_91, %c0_92] : memref<8x32xf32, #tpu.memory_space<vmem>>, vector<8x32xf32>
    tpu.vector_store %arg9[%c0_91, %c0_92], %148 {strides = array<i32>} : memref<8x32xf32, #tpu.memory_space<vmem>>, vector<8x32xf32>,
    %c0_93 = arith.constant 0 : index
    %c0_94 = arith.constant 0 : index
    %176 = vector.load %arg10[%c0_93, %c0_94] : memref<8x32xf32, #tpu.memory_space<vmem>>, vector<8x32xf32>
    tpu.vector_store %arg10[%c0_93, %c0_94], %146 {strides = array<i32>} : memref<8x32xf32, #tpu.memory_space<vmem>>, vector<8x32xf32>,
    %c0_95 = arith.constant 0 : index
    %c0_96 = arith.constant 0 : index
    %177 = vector.load %arg11[%c0_95, %c0_96] : memref<8x32xf32, #tpu.memory_space<vmem>>, vector<8x32xf32>
    tpu.vector_store %arg11[%c0_95, %c0_96], %174 {strides = array<i32>} : memref<8x32xf32, #tpu.memory_space<vmem>>, vector<8x32xf32>,
    %c0_97 = arith.constant 0 : index
    %c0_98 = arith.constant 0 : index
    %178 = vector.load %arg12[%c0_97, %c0_98] : memref<8x32xf32, #tpu.memory_space<vmem>>, vector<8x32xf32>
    tpu.vector_store %arg12[%c0_97, %c0_98], %172 {strides = array<i32>} : memref<8x32xf32, #tpu.memory_space<vmem>>, vector<8x32xf32>,
    %179 = arith.index_cast %c1_i32_65 : i32 to index
    %c0_99 = arith.constant 0 : index
    %c0_100 = arith.constant 0 : index
    %180 = vector.load %arg7[%179, %c0_99, %c0_100] : memref<2x8x32xf32, #tpu.memory_space<vmem>>, vector<1x8x32xf32>
    %181 = vector.shape_cast %180 : vector<1x8x32xf32> to vector<8x32xf32>
    %182 = vector.shape_cast %148 : vector<8x32xf32> to vector<1x8x32xf32>
    tpu.vector_store %arg7[%179, %c0_99, %c0_100], %182 {strides = array<i32>} : memref<2x8x32xf32, #tpu.memory_space<vmem>>, vector<1x8x32xf32>,
    %183 = arith.index_cast %106 : i32 to index
    %c0_101 = arith.constant 0 : index
    %c0_102 = arith.constant 0 : index
    %184 = vector.load %arg8[%183, %c0_101, %c0_102] : memref<2x8x32xf32, #tpu.memory_space<vmem>>, vector<1x8x32xf32>
    %185 = vector.shape_cast %184 : vector<1x8x32xf32> to vector<8x32xf32>
    %186 = vector.shape_cast %174 : vector<8x32xf32> to vector<1x8x32xf32>
    tpu.vector_store %arg8[%183, %c0_101, %c0_102], %186 {strides = array<i32>} : memref<2x8x32xf32, #tpu.memory_space<vmem>>, vector<1x8x32xf32>,
    %c2_i32 = arith.constant 2 : i32
    return
  }
}

module attributes {stable_mosaic.version = 11 : i64} {
  func.func @_bilstm_kernel(%arg0: memref<2x8x64xf32, #tpu.memory_space<vmem>>, %arg1: memref<64x128xbf16, #tpu.memory_space<vmem>>, %arg2: memref<64x128xbf16, #tpu.memory_space<vmem>>, %arg3: memref<32x128xbf16, #tpu.memory_space<vmem>>, %arg4: memref<32x128xbf16, #tpu.memory_space<vmem>>, %arg5: memref<1x128xf32, #tpu.memory_space<vmem>>, %arg6: memref<1x128xf32, #tpu.memory_space<vmem>>, %arg7: memref<2x8x32xf32, #tpu.memory_space<vmem>>, %arg8: memref<2x8x32xf32, #tpu.memory_space<vmem>>, %arg9: memref<8x32xf32, #tpu.memory_space<vmem>>, %arg10: memref<8x32xf32, #tpu.memory_space<vmem>>, %arg11: memref<8x32xf32, #tpu.memory_space<vmem>>, %arg12: memref<8x32xf32, #tpu.memory_space<vmem>>, %arg13: memref<2x8x128xf32, #tpu.memory_space<vmem>>, %arg14: memref<2x8x128xf32, #tpu.memory_space<vmem>>) attributes {dimension_semantics = [], scalar_prefetch = 0 : i64, scratch_operands = 2 : i64, tpu.core_type = #tpu.core_type<tc>} {
    %c0 = arith.constant 0 : index
    %c0_0 = arith.constant 0 : index
    %c0_1 = arith.constant 0 : index
    %0 = vector.load %arg0[%c0, %c0_0, %c0_1] : memref<2x8x64xf32, #tpu.memory_space<vmem>>, vector<2x8x64xf32>
    %1 = vector.shape_cast %0 : vector<2x8x64xf32> to vector<16x64xf32>
    %2 = arith.truncf %1 : vector<16x64xf32> to vector<16x64xbf16>
    %c0_2 = arith.constant 0 : index
    %c0_3 = arith.constant 0 : index
    %3 = vector.load %arg1[%c0_2, %c0_3] : memref<64x128xbf16, #tpu.memory_space<vmem>>, vector<64x128xbf16>
    %cst = arith.constant dense<0.000000e+00> : vector<16x128xf32>
    %4 = tpu.matmul %2, %3, %cst {dimension_numbers = #tpu.dot_dimension_numbers<[1], [0], [0], [1], [0, 0, 1, 1], [], []>} : vector<16x64xbf16>, vector<64x128xbf16>, vector<16x128xf32> -> vector<16x128xf32>
    %c0_4 = arith.constant 0 : index
    %c0_5 = arith.constant 0 : index
    %5 = vector.load %arg5[%c0_4, %c0_5] : memref<1x128xf32, #tpu.memory_space<vmem>>, vector<1x128xf32>
    %6 = vector.broadcast %5 : vector<1x128xf32> to vector<16x128xf32>
    %7 = arith.addf %4, %6 : vector<16x128xf32>
    %8 = vector.shape_cast %7 : vector<16x128xf32> to vector<2x8x128xf32>
    %c0_6 = arith.constant 0 : index
    %c0_7 = arith.constant 0 : index
    %c0_8 = arith.constant 0 : index
    %9 = vector.load %arg13[%c0_6, %c0_7, %c0_8] : memref<2x8x128xf32, #tpu.memory_space<vmem>>, vector<2x8x128xf32>
    tpu.vector_store %arg13[%c0_6, %c0_7, %c0_8], %8 {strides = array<i32>} : memref<2x8x128xf32, #tpu.memory_space<vmem>>, vector<2x8x128xf32>,
    %c0_9 = arith.constant 0 : index
    %c0_10 = arith.constant 0 : index
    %10 = vector.load %arg2[%c0_9, %c0_10] : memref<64x128xbf16, #tpu.memory_space<vmem>>, vector<64x128xbf16>
    %cst_11 = arith.constant dense<0.000000e+00> : vector<16x128xf32>
    %11 = tpu.matmul %2, %10, %cst_11 {dimension_numbers = #tpu.dot_dimension_numbers<[1], [0], [0], [1], [0, 0, 1, 1], [], []>} : vector<16x64xbf16>, vector<64x128xbf16>, vector<16x128xf32> -> vector<16x128xf32>
    %c0_12 = arith.constant 0 : index
    %c0_13 = arith.constant 0 : index
    %12 = vector.load %arg6[%c0_12, %c0_13] : memref<1x128xf32, #tpu.memory_space<vmem>>, vector<1x128xf32>
    %13 = vector.broadcast %12 : vector<1x128xf32> to vector<16x128xf32>
    %14 = arith.addf %11, %13 : vector<16x128xf32>
    %15 = vector.shape_cast %14 : vector<16x128xf32> to vector<2x8x128xf32>
    %c0_14 = arith.constant 0 : index
    %c0_15 = arith.constant 0 : index
    %c0_16 = arith.constant 0 : index
    %16 = vector.load %arg14[%c0_14, %c0_15, %c0_16] : memref<2x8x128xf32, #tpu.memory_space<vmem>>, vector<2x8x128xf32>
    tpu.vector_store %arg14[%c0_14, %c0_15, %c0_16], %15 {strides = array<i32>} : memref<2x8x128xf32, #tpu.memory_space<vmem>>, vector<2x8x128xf32>,
    %cst_17 = arith.constant 0.000000e+00 : f32
    %17 = vector.broadcast %cst_17 : f32 to vector<8x32xf32>
    %c0_18 = arith.constant 0 : index
    %c0_19 = arith.constant 0 : index
    %18 = vector.load %arg9[%c0_18, %c0_19] : memref<8x32xf32, #tpu.memory_space<vmem>>, vector<8x32xf32>
    tpu.vector_store %arg9[%c0_18, %c0_19], %17 {strides = array<i32>} : memref<8x32xf32, #tpu.memory_space<vmem>>, vector<8x32xf32>,
    %cst_20 = arith.constant 0.000000e+00 : f32
    %19 = vector.broadcast %cst_20 : f32 to vector<8x32xf32>
    %c0_21 = arith.constant 0 : index
    %c0_22 = arith.constant 0 : index
    %20 = vector.load %arg10[%c0_21, %c0_22] : memref<8x32xf32, #tpu.memory_space<vmem>>, vector<8x32xf32>
    tpu.vector_store %arg10[%c0_21, %c0_22], %19 {strides = array<i32>} : memref<8x32xf32, #tpu.memory_space<vmem>>, vector<8x32xf32>,
    %cst_23 = arith.constant 0.000000e+00 : f32
    %21 = vector.broadcast %cst_23 : f32 to vector<8x32xf32>
    %c0_24 = arith.constant 0 : index
    %c0_25 = arith.constant 0 : index
    %22 = vector.load %arg11[%c0_24, %c0_25] : memref<8x32xf32, #tpu.memory_space<vmem>>, vector<8x32xf32>
    tpu.vector_store %arg11[%c0_24, %c0_25], %21 {strides = array<i32>} : memref<8x32xf32, #tpu.memory_space<vmem>>, vector<8x32xf32>,
    %cst_26 = arith.constant 0.000000e+00 : f32
    %23 = vector.broadcast %cst_26 : f32 to vector<8x32xf32>
    %c0_27 = arith.constant 0 : index
    %c0_28 = arith.constant 0 : index
    %24 = vector.load %arg12[%c0_27, %c0_28] : memref<8x32xf32, #tpu.memory_space<vmem>>, vector<8x32xf32>
    tpu.vector_store %arg12[%c0_27, %c0_28], %23 {strides = array<i32>} : memref<8x32xf32, #tpu.memory_space<vmem>>, vector<8x32xf32>,
    %c0_i32 = arith.constant 0 : i32
    %c1_i32 = arith.constant 1 : i32
    %25 = arith.subi %c1_i32, %c0_i32 : i32
    %26 = arith.index_cast %c0_i32 : i32 to index
    %c0_29 = arith.constant 0 : index
    %c0_30 = arith.constant 0 : index
    %27 = vector.load %arg13[%26, %c0_29, %c0_30] : memref<2x8x128xf32, #tpu.memory_space<vmem>>, vector<1x8x128xf32>
    %28 = vector.shape_cast %27 : vector<1x8x128xf32> to vector<8x128xf32>
    %c0_31 = arith.constant 0 : index
    %c0_32 = arith.constant 0 : index
    %29 = vector.load %arg9[%c0_31, %c0_32] : memref<8x32xf32, #tpu.memory_space<vmem>>, vector<8x32xf32>
    %30 = arith.truncf %29 : vector<8x32xf32> to vector<8x32xbf16>
    %c0_33 = arith.constant 0 : index
    %c0_34 = arith.constant 0 : index
    %31 = vector.load %arg3[%c0_33, %c0_34] : memref<32x128xbf16, #tpu.memory_space<vmem>>, vector<32x128xbf16>
    %cst_35 = arith.constant dense<0.000000e+00> : vector<8x128xf32>
    %32 = tpu.matmul %30, %31, %cst_35 {dimension_numbers = #tpu.dot_dimension_numbers<[1], [0], [0], [1], [0, 0, 1, 1], [], []>} : vector<8x32xbf16>, vector<32x128xbf16>, vector<8x128xf32> -> vector<8x128xf32>
    %33 = arith.addf %28, %32 : vector<8x128xf32>
    %34 = arith.index_cast %25 : i32 to index
    %c0_36 = arith.constant 0 : index
    %c0_37 = arith.constant 0 : index
    %35 = vector.load %arg14[%34, %c0_36, %c0_37] : memref<2x8x128xf32, #tpu.memory_space<vmem>>, vector<1x8x128xf32>
    %36 = vector.shape_cast %35 : vector<1x8x128xf32> to vector<8x128xf32>
    %c0_38 = arith.constant 0 : index
    %c0_39 = arith.constant 0 : index
    %37 = vector.load %arg11[%c0_38, %c0_39] : memref<8x32xf32, #tpu.memory_space<vmem>>, vector<8x32xf32>
    %38 = arith.truncf %37 : vector<8x32xf32> to vector<8x32xbf16>
    %c0_40 = arith.constant 0 : index
    %c0_41 = arith.constant 0 : index
    %39 = vector.load %arg4[%c0_40, %c0_41] : memref<32x128xbf16, #tpu.memory_space<vmem>>, vector<32x128xbf16>
    %cst_42 = arith.constant dense<0.000000e+00> : vector<8x128xf32>
    %40 = tpu.matmul %38, %39, %cst_42 {dimension_numbers = #tpu.dot_dimension_numbers<[1], [0], [0], [1], [0, 0, 1, 1], [], []>} : vector<8x32xbf16>, vector<32x128xbf16>, vector<8x128xf32> -> vector<8x128xf32>
    %41 = arith.addf %36, %40 : vector<8x128xf32>
    %c0_43 = arith.constant 0 : index
    %c0_44 = arith.constant 0 : index
    %42 = vector.load %arg10[%c0_43, %c0_44] : memref<8x32xf32, #tpu.memory_space<vmem>>, vector<8x32xf32>
    %43 = vector.extract_strided_slice %33 {offsets = [0, 0], sizes = [8, 32], strides = [1, 1]} : vector<8x128xf32> to vector<8x32xf32>
    %44 = arith.negf %43 : vector<8x32xf32>
    %45 = math.exp %44 : vector<8x32xf32>
    %cst_45 = arith.constant 1.000000e+00 : f32
    %46 = vector.broadcast %cst_45 : f32 to vector<8x32xf32>
    %47 = arith.addf %46, %45 : vector<8x32xf32>
    %48 = arith.divf %46, %47 : vector<8x32xf32>
    %49 = vector.extract_strided_slice %33 {offsets = [0, 32], sizes = [8, 32], strides = [1, 1]} : vector<8x128xf32> to vector<8x32xf32>
    %50 = arith.negf %49 : vector<8x32xf32>
    %51 = math.exp %50 : vector<8x32xf32>
    %cst_46 = arith.constant 1.000000e+00 : f32
    %52 = vector.broadcast %cst_46 : f32 to vector<8x32xf32>
    %53 = arith.addf %52, %51 : vector<8x32xf32>
    %54 = arith.divf %52, %53 : vector<8x32xf32>
    %55 = vector.extract_strided_slice %33 {offsets = [0, 64], sizes = [8, 32], strides = [1, 1]} : vector<8x128xf32> to vector<8x32xf32>
    %56 = math.tanh %55 : vector<8x32xf32>
    %57 = vector.extract_strided_slice %33 {offsets = [0, 96], sizes = [8, 32], strides = [1, 1]} : vector<8x128xf32> to vector<8x32xf32>
    %58 = arith.negf %57 : vector<8x32xf32>
    %59 = math.exp %58 : vector<8x32xf32>
    %cst_47 = arith.constant 1.000000e+00 : f32
    %60 = vector.broadcast %cst_47 : f32 to vector<8x32xf32>
    %61 = arith.addf %60, %59 : vector<8x32xf32>
    %62 = arith.divf %60, %61 : vector<8x32xf32>
    %63 = arith.mulf %54, %42 : vector<8x32xf32>
    %64 = arith.mulf %48, %56 : vector<8x32xf32>
    %65 = arith.addf %63, %64 : vector<8x32xf32>
    %66 = math.tanh %65 : vector<8x32xf32>
    %67 = arith.mulf %62, %66 : vector<8x32xf32>
    %c0_48 = arith.constant 0 : index
    %c0_49 = arith.constant 0 : index
    %68 = vector.load %arg12[%c0_48, %c0_49] : memref<8x32xf32, #tpu.memory_space<vmem>>, vector<8x32xf32>
    %69 = vector.extract_strided_slice %41 {offsets = [0, 0], sizes = [8, 32], strides = [1, 1]} : vector<8x128xf32> to vector<8x32xf32>
    %70 = arith.negf %69 : vector<8x32xf32>
    %71 = math.exp %70 : vector<8x32xf32>
    %cst_50 = arith.constant 1.000000e+00 : f32
    %72 = vector.broadcast %cst_50 : f32 to vector<8x32xf32>
    %73 = arith.addf %72, %71 : vector<8x32xf32>
    %74 = arith.divf %72, %73 : vector<8x32xf32>
    %75 = vector.extract_strided_slice %41 {offsets = [0, 32], sizes = [8, 32], strides = [1, 1]} : vector<8x128xf32> to vector<8x32xf32>
    %76 = arith.negf %75 : vector<8x32xf32>
    %77 = math.exp %76 : vector<8x32xf32>
    %cst_51 = arith.constant 1.000000e+00 : f32
    %78 = vector.broadcast %cst_51 : f32 to vector<8x32xf32>
    %79 = arith.addf %78, %77 : vector<8x32xf32>
    %80 = arith.divf %78, %79 : vector<8x32xf32>
    %81 = vector.extract_strided_slice %41 {offsets = [0, 64], sizes = [8, 32], strides = [1, 1]} : vector<8x128xf32> to vector<8x32xf32>
    %82 = math.tanh %81 : vector<8x32xf32>
    %83 = vector.extract_strided_slice %41 {offsets = [0, 96], sizes = [8, 32], strides = [1, 1]} : vector<8x128xf32> to vector<8x32xf32>
    %84 = arith.negf %83 : vector<8x32xf32>
    %85 = math.exp %84 : vector<8x32xf32>
    %cst_52 = arith.constant 1.000000e+00 : f32
    %86 = vector.broadcast %cst_52 : f32 to vector<8x32xf32>
    %87 = arith.addf %86, %85 : vector<8x32xf32>
    %88 = arith.divf %86, %87 : vector<8x32xf32>
    %89 = arith.mulf %80, %68 : vector<8x32xf32>
    %90 = arith.mulf %74, %82 : vector<8x32xf32>
    %91 = arith.addf %89, %90 : vector<8x32xf32>
    %92 = math.tanh %91 : vector<8x32xf32>
    %93 = arith.mulf %88, %92 : vector<8x32xf32>
    %c0_53 = arith.constant 0 : index
    %c0_54 = arith.constant 0 : index
    %94 = vector.load %arg9[%c0_53, %c0_54] : memref<8x32xf32, #tpu.memory_space<vmem>>, vector<8x32xf32>
    tpu.vector_store %arg9[%c0_53, %c0_54], %67 {strides = array<i32>} : memref<8x32xf32, #tpu.memory_space<vmem>>, vector<8x32xf32>,
    %c0_55 = arith.constant 0 : index
    %c0_56 = arith.constant 0 : index
    %95 = vector.load %arg10[%c0_55, %c0_56] : memref<8x32xf32, #tpu.memory_space<vmem>>, vector<8x32xf32>
    tpu.vector_store %arg10[%c0_55, %c0_56], %65 {strides = array<i32>} : memref<8x32xf32, #tpu.memory_space<vmem>>, vector<8x32xf32>,
    %c0_57 = arith.constant 0 : index
    %c0_58 = arith.constant 0 : index
    %96 = vector.load %arg11[%c0_57, %c0_58] : memref<8x32xf32, #tpu.memory_space<vmem>>, vector<8x32xf32>
    tpu.vector_store %arg11[%c0_57, %c0_58], %93 {strides = array<i32>} : memref<8x32xf32, #tpu.memory_space<vmem>>, vector<8x32xf32>,
    %c0_59 = arith.constant 0 : index
    %c0_60 = arith.constant 0 : index
    %97 = vector.load %arg12[%c0_59, %c0_60] : memref<8x32xf32, #tpu.memory_space<vmem>>, vector<8x32xf32>
    tpu.vector_store %arg12[%c0_59, %c0_60], %91 {strides = array<i32>} : memref<8x32xf32, #tpu.memory_space<vmem>>, vector<8x32xf32>,
    %98 = arith.index_cast %c0_i32 : i32 to index
    %c0_61 = arith.constant 0 : index
    %c0_62 = arith.constant 0 : index
    %99 = vector.load %arg7[%98, %c0_61, %c0_62] : memref<2x8x32xf32, #tpu.memory_space<vmem>>, vector<1x8x32xf32>
    %100 = vector.shape_cast %99 : vector<1x8x32xf32> to vector<8x32xf32>
    %101 = vector.shape_cast %67 : vector<8x32xf32> to vector<1x8x32xf32>
    tpu.vector_store %arg7[%98, %c0_61, %c0_62], %101 {strides = array<i32>} : memref<2x8x32xf32, #tpu.memory_space<vmem>>, vector<1x8x32xf32>,
    %102 = arith.index_cast %25 : i32 to index
    %c0_63 = arith.constant 0 : index
    %c0_64 = arith.constant 0 : index
    %103 = vector.load %arg8[%102, %c0_63, %c0_64] : memref<2x8x32xf32, #tpu.memory_space<vmem>>, vector<1x8x32xf32>
    %104 = vector.shape_cast %103 : vector<1x8x32xf32> to vector<8x32xf32>
    %105 = vector.shape_cast %93 : vector<8x32xf32> to vector<1x8x32xf32>
    tpu.vector_store %arg8[%102, %c0_63, %c0_64], %105 {strides = array<i32>} : memref<2x8x32xf32, #tpu.memory_space<vmem>>, vector<1x8x32xf32>,
    %c1_i32_65 = arith.constant 1 : i32
    %c1_i32_66 = arith.constant 1 : i32
    %106 = arith.subi %c1_i32_66, %c1_i32_65 : i32
    %107 = arith.index_cast %c1_i32_65 : i32 to index
    %c0_67 = arith.constant 0 : index
    %c0_68 = arith.constant 0 : index
    %108 = vector.load %arg13[%107, %c0_67, %c0_68] : memref<2x8x128xf32, #tpu.memory_space<vmem>>, vector<1x8x128xf32>
    %109 = vector.shape_cast %108 : vector<1x8x128xf32> to vector<8x128xf32>
    %c0_69 = arith.constant 0 : index
    %c0_70 = arith.constant 0 : index
    %110 = vector.load %arg9[%c0_69, %c0_70] : memref<8x32xf32, #tpu.memory_space<vmem>>, vector<8x32xf32>
    %111 = arith.truncf %110 : vector<8x32xf32> to vector<8x32xbf16>
    %c0_71 = arith.constant 0 : index
    %c0_72 = arith.constant 0 : index
    %112 = vector.load %arg3[%c0_71, %c0_72] : memref<32x128xbf16, #tpu.memory_space<vmem>>, vector<32x128xbf16>
    %cst_73 = arith.constant dense<0.000000e+00> : vector<8x128xf32>
    %113 = tpu.matmul %111, %112, %cst_73 {dimension_numbers = #tpu.dot_dimension_numbers<[1], [0], [0], [1], [0, 0, 1, 1], [], []>} : vector<8x32xbf16>, vector<32x128xbf16>, vector<8x128xf32> -> vector<8x128xf32>
    %114 = arith.addf %109, %113 : vector<8x128xf32>
    %115 = arith.index_cast %106 : i32 to index
    %c0_74 = arith.constant 0 : index
    %c0_75 = arith.constant 0 : index
    %116 = vector.load %arg14[%115, %c0_74, %c0_75] : memref<2x8x128xf32, #tpu.memory_space<vmem>>, vector<1x8x128xf32>
    %117 = vector.shape_cast %116 : vector<1x8x128xf32> to vector<8x128xf32>
    %c0_76 = arith.constant 0 : index
    %c0_77 = arith.constant 0 : index
    %118 = vector.load %arg11[%c0_76, %c0_77] : memref<8x32xf32, #tpu.memory_space<vmem>>, vector<8x32xf32>
    %119 = arith.truncf %118 : vector<8x32xf32> to vector<8x32xbf16>
    %c0_78 = arith.constant 0 : index
    %c0_79 = arith.constant 0 : index
    %120 = vector.load %arg4[%c0_78, %c0_79] : memref<32x128xbf16, #tpu.memory_space<vmem>>, vector<32x128xbf16>
    %cst_80 = arith.constant dense<0.000000e+00> : vector<8x128xf32>
    %121 = tpu.matmul %119, %120, %cst_80 {dimension_numbers = #tpu.dot_dimension_numbers<[1], [0], [0], [1], [0, 0, 1, 1], [], []>} : vector<8x32xbf16>, vector<32x128xbf16>, vector<8x128xf32> -> vector<8x128xf32>
    %122 = arith.addf %117, %121 : vector<8x128xf32>
    %c0_81 = arith.constant 0 : index
    %c0_82 = arith.constant 0 : index
    %123 = vector.load %arg10[%c0_81, %c0_82] : memref<8x32xf32, #tpu.memory_space<vmem>>, vector<8x32xf32>
    %124 = vector.extract_strided_slice %114 {offsets = [0, 0], sizes = [8, 32], strides = [1, 1]} : vector<8x128xf32> to vector<8x32xf32>
    %125 = arith.negf %124 : vector<8x32xf32>
    %126 = math.exp %125 : vector<8x32xf32>
    %cst_83 = arith.constant 1.000000e+00 : f32
    %127 = vector.broadcast %cst_83 : f32 to vector<8x32xf32>
    %128 = arith.addf %127, %126 : vector<8x32xf32>
    %129 = arith.divf %127, %128 : vector<8x32xf32>
    %130 = vector.extract_strided_slice %114 {offsets = [0, 32], sizes = [8, 32], strides = [1, 1]} : vector<8x128xf32> to vector<8x32xf32>
    %131 = arith.negf %130 : vector<8x32xf32>
    %132 = math.exp %131 : vector<8x32xf32>
    %cst_84 = arith.constant 1.000000e+00 : f32
    %133 = vector.broadcast %cst_84 : f32 to vector<8x32xf32>
    %134 = arith.addf %133, %132 : vector<8x32xf32>
    %135 = arith.divf %133, %134 : vector<8x32xf32>
    %136 = vector.extract_strided_slice %114 {offsets = [0, 64], sizes = [8, 32], strides = [1, 1]} : vector<8x128xf32> to vector<8x32xf32>
    %137 = math.tanh %136 : vector<8x32xf32>
    %138 = vector.extract_strided_slice %114 {offsets = [0, 96], sizes = [8, 32], strides = [1, 1]} : vector<8x128xf32> to vector<8x32xf32>
    %139 = arith.negf %138 : vector<8x32xf32>
    %140 = math.exp %139 : vector<8x32xf32>
    %cst_85 = arith.constant 1.000000e+00 : f32
    %141 = vector.broadcast %cst_85 : f32 to vector<8x32xf32>
    %142 = arith.addf %141, %140 : vector<8x32xf32>
    %143 = arith.divf %141, %142 : vector<8x32xf32>
    %144 = arith.mulf %135, %123 : vector<8x32xf32>
    %145 = arith.mulf %129, %137 : vector<8x32xf32>
    %146 = arith.addf %144, %145 : vector<8x32xf32>
    %147 = math.tanh %146 : vector<8x32xf32>
    %148 = arith.mulf %143, %147 : vector<8x32xf32>
    %c0_86 = arith.constant 0 : index
    %c0_87 = arith.constant 0 : index
    %149 = vector.load %arg12[%c0_86, %c0_87] : memref<8x32xf32, #tpu.memory_space<vmem>>, vector<8x32xf32>
    %150 = vector.extract_strided_slice %122 {offsets = [0, 0], sizes = [8, 32], strides = [1, 1]} : vector<8x128xf32> to vector<8x32xf32>
    %151 = arith.negf %150 : vector<8x32xf32>
    %152 = math.exp %151 : vector<8x32xf32>
    %cst_88 = arith.constant 1.000000e+00 : f32
    %153 = vector.broadcast %cst_88 : f32 to vector<8x32xf32>
    %154 = arith.addf %153, %152 : vector<8x32xf32>
    %155 = arith.divf %153, %154 : vector<8x32xf32>
    %156 = vector.extract_strided_slice %122 {offsets = [0, 32], sizes = [8, 32], strides = [1, 1]} : vector<8x128xf32> to vector<8x32xf32>
    %157 = arith.negf %156 : vector<8x32xf32>
    %158 = math.exp %157 : vector<8x32xf32>
    %cst_89 = arith.constant 1.000000e+00 : f32
    %159 = vector.broadcast %cst_89 : f32 to vector<8x32xf32>
    %160 = arith.addf %159, %158 : vector<8x32xf32>
    %161 = arith.divf %159, %160 : vector<8x32xf32>
    %162 = vector.extract_strided_slice %122 {offsets = [0, 64], sizes = [8, 32], strides = [1, 1]} : vector<8x128xf32> to vector<8x32xf32>
    %163 = math.tanh %162 : vector<8x32xf32>
    %164 = vector.extract_strided_slice %122 {offsets = [0, 96], sizes = [8, 32], strides = [1, 1]} : vector<8x128xf32> to vector<8x32xf32>
    %165 = arith.negf %164 : vector<8x32xf32>
    %166 = math.exp %165 : vector<8x32xf32>
    %cst_90 = arith.constant 1.000000e+00 : f32
    %167 = vector.broadcast %cst_90 : f32 to vector<8x32xf32>
    %168 = arith.addf %167, %166 : vector<8x32xf32>
    %169 = arith.divf %167, %168 : vector<8x32xf32>
    %170 = arith.mulf %161, %149 : vector<8x32xf32>
    %171 = arith.mulf %155, %163 : vector<8x32xf32>
    %172 = arith.addf %170, %171 : vector<8x32xf32>
    %173 = math.tanh %172 : vector<8x32xf32>
    %174 = arith.mulf %169, %173 : vector<8x32xf32>
    %c0_91 = arith.constant 0 : index
    %c0_92 = arith.constant 0 : index
    %175 = vector.load %arg9[%c0_91, %c0_92] : memref<8x32xf32, #tpu.memory_space<vmem>>, vector<8x32xf32>
    tpu.vector_store %arg9[%c0_91, %c0_92], %148 {strides = array<i32>} : memref<8x32xf32, #tpu.memory_space<vmem>>, vector<8x32xf32>,
    %c0_93 = arith.constant 0 : index
    %c0_94 = arith.constant 0 : index
    %176 = vector.load %arg10[%c0_93, %c0_94] : memref<8x32xf32, #tpu.memory_space<vmem>>, vector<8x32xf32>
    tpu.vector_store %arg10[%c0_93, %c0_94], %146 {strides = array<i32>} : memref<8x32xf32, #tpu.memory_space<vmem>>, vector<8x32xf32>,
    %c0_95 = arith.constant 0 : index
    %c0_96 = arith.constant 0 : index
    %177 = vector.load %arg11[%c0_95, %c0_96] : memref<8x32xf32, #tpu.memory_space<vmem>>, vector<8x32xf32>
    tpu.vector_store %arg11[%c0_95, %c0_96], %174 {strides = array<i32>} : memref<8x32xf32, #tpu.memory_space<vmem>>, vector<8x32xf32>,
    %c0_97 = arith.constant 0 : index
    %c0_98 = arith.constant 0 : index
    %178 = vector.load %arg12[%c0_97, %c0_98] : memref<8x32xf32, #tpu.memory_space<vmem>>, vector<8x32xf32>
    tpu.vector_store %arg12[%c0_97, %c0_98], %172 {strides = array<i32>} : memref<8x32xf32, #tpu.memory_space<vmem>>, vector<8x32xf32>,
    %179 = arith.index_cast %c1_i32_65 : i32 to index
    %c0_99 = arith.constant 0 : index
    %c0_100 = arith.constant 0 : index
    %180 = vector.load %arg7[%179, %c0_99, %c0_100] : memref<2x8x32xf32, #tpu.memory_space<vmem>>, vector<1x8x32xf32>
    %181 = vector.shape_cast %180 : vector<1x8x32xf32> to vector<8x32xf32>
    %182 = vector.shape_cast %148 : vector<8x32xf32> to vector<1x8x32xf32>
    tpu.vector_store %arg7[%179, %c0_99, %c0_100], %182 {strides = array<i32>} : memref<2x8x32xf32, #tpu.memory_space<vmem>>, vector<1x8x32xf32>,
    %183 = arith.index_cast %106 : i32 to index
    %c0_101 = arith.constant 0 : index
    %c0_102 = arith.constant 0 : index
    %184 = vector.load %arg8[%183, %c0_101, %c0_102] : memref<2x8x32xf32, #tpu.memory_space<vmem>>, vector<1x8x32xf32>
    %185 = vector.shape_cast %184 : vector<1x8x32xf32> to vector<8x32xf32>
    %186 = vector.shape_cast %174 : vector<8x32xf32> to vector<1x8x32xf32>
    tpu.vector_store %arg8[%183, %c0_101, %c0_102], %186 {strides = array<i32>} : memref<2x8x32xf32, #tpu.memory_space<vmem>>, vector<1x8x32xf32>,
    %c2_i32 = arith.constant 2 : i32
    return
  }
}

module attributes {stable_mosaic.version = 11 : i64} {
  func.func @_final_linear_kernel(%arg0: memref<16x32xf32, #tpu.memory_space<vmem>>, %arg1: memref<16x32xf32, #tpu.memory_space<vmem>>, %arg2: memref<32x32xbf16, #tpu.memory_space<vmem>>, %arg3: memref<32x32xbf16, #tpu.memory_space<vmem>>, %arg4: memref<1x32xf32, #tpu.memory_space<vmem>>, %arg5: memref<16x32xf32, #tpu.memory_space<vmem>>) attributes {dimension_semantics = [], scalar_prefetch = 0 : i64, scratch_operands = 0 : i64, tpu.core_type = #tpu.core_type<tc>} {
    %c0 = arith.constant 0 : index
    %c0_0 = arith.constant 0 : index
    %0 = vector.load %arg0[%c0, %c0_0] : memref<16x32xf32, #tpu.memory_space<vmem>>, vector<16x32xf32>
    %1 = arith.truncf %0 : vector<16x32xf32> to vector<16x32xbf16>
    %c0_1 = arith.constant 0 : index
    %c0_2 = arith.constant 0 : index
    %2 = vector.load %arg2[%c0_1, %c0_2] : memref<32x32xbf16, #tpu.memory_space<vmem>>, vector<32x32xbf16>
    %cst = arith.constant dense<0.000000e+00> : vector<16x32xf32>
    %3 = tpu.matmul %1, %2, %cst {dimension_numbers = #tpu.dot_dimension_numbers<[1], [0], [0], [1], [0, 0, 1, 1], [], []>} : vector<16x32xbf16>, vector<32x32xbf16>, vector<16x32xf32> -> vector<16x32xf32>
    %c0_3 = arith.constant 0 : index
    %c0_4 = arith.constant 0 : index
    %4 = vector.load %arg1[%c0_3, %c0_4] : memref<16x32xf32, #tpu.memory_space<vmem>>, vector<16x32xf32>
    %5 = arith.truncf %4 : vector<16x32xf32> to vector<16x32xbf16>
    %c0_5 = arith.constant 0 : index
    %c0_6 = arith.constant 0 : index
    %6 = vector.load %arg3[%c0_5, %c0_6] : memref<32x32xbf16, #tpu.memory_space<vmem>>, vector<32x32xbf16>
    %cst_7 = arith.constant dense<0.000000e+00> : vector<16x32xf32>
    %7 = tpu.matmul %5, %6, %cst_7 {dimension_numbers = #tpu.dot_dimension_numbers<[1], [0], [0], [1], [0, 0, 1, 1], [], []>} : vector<16x32xbf16>, vector<32x32xbf16>, vector<16x32xf32> -> vector<16x32xf32>
    %8 = arith.addf %3, %7 : vector<16x32xf32>
    %c0_8 = arith.constant 0 : index
    %c0_9 = arith.constant 0 : index
    %9 = vector.load %arg4[%c0_8, %c0_9] : memref<1x32xf32, #tpu.memory_space<vmem>>, vector<1x32xf32>
    %10 = vector.broadcast %9 : vector<1x32xf32> to vector<16x32xf32>
    %11 = arith.addf %8, %10 : vector<16x32xf32>
    %c0_10 = arith.constant 0 : index
    %c0_11 = arith.constant 0 : index
    %12 = vector.load %arg5[%c0_10, %c0_11] : memref<16x32xf32, #tpu.memory_space<vmem>>, vector<16x32xf32>
    tpu.vector_store %arg5[%c0_10, %c0_11], %11 {strides = array<i32>} : memref<16x32xf32, #tpu.memory_space<vmem>>, vector<16x32xf32>,
    return
  }
}

</mosaic_0001>

<bundles_post_ra>
// kernel: transformer_blstm_forward.7
= control target key start
LH: loop header
LB: loop body
LE: loop exit
PB: predicated region body
PF: predicated region fallthrough
CT: control target
= control target key end

     0   :  { %vm59_vm0 = vcmask 261120   ;;  %v757_v0 = vmov 0.0   ;;  %vm758_vm1 = vmmov 0   ;;  %s759_s16 = smov 32   ;;  %s1027_s1 = inlined_call_operand.vmem [shape: bf16[32,128], index: 1, kind: input, shape index: {}]   ;;  %s1028_s2 = inlined_call_operand.vmem [shape: bf16[32,128], index: 2, kind: input, shape index: {}]   ;;  %s1029_s9 = inlined_call_operand.vmem [shape: f32[8,32], index: 9, kind: output, shape index: {2}]   ;;  %s1030_s11 = inlined_call_operand.vmem [shape: f32[8,32], index: 11, kind: output, shape index: {4}]   ;;  %s1031_s10 = inlined_call_operand.vmem [shape: f32[8,32], index: 10, kind: output, shape index: {3}]   ;;  %s1032_s12 = inlined_call_operand.vmem [shape: f32[8,32], index: 12, kind: output, shape index: {5}]   ;;  %s1033_s0 = inlined_call_operand.vmem [shape: f32[2,8,32], index: 0, kind: input, shape index: {}]   ;;  %s1034_s3 = inlined_call_operand.vmem [shape: bf16[32,128], index: 3, kind: input, shape index: {}]   ;;  %s1035_s4 = inlined_call_operand.vmem [shape: bf16[32,128], index: 4, kind: input, shape index: {}]   ;;  %s1036_s6 = inlined_call_operand.vmem [shape: f32[1,128], index: 6, kind: input, shape index: {}]   ;;  %s1037_s5 = inlined_call_operand.vmem [shape: f32[1,128], index: 5, kind: input, shape index: {}]   ;;  %s1038_s7 = inlined_call_operand.vmem [shape: f32[2,8,32], index: 7, kind: output, shape index: {0}]   ;;  %s1039_s8 = inlined_call_operand.vmem [shape: f32[2,8,32], index: 8, kind: output, shape index: {1}]  }
   0x1   :  { %660 = vmatprep.subr.bf16.mxu0 %v757_v0  ;;  %668 = vmatprep.subr.bf16.mxu1 %v757_v0  ;;  %v713_v1 = vld [vmem:[%s1027_s1] sm:$0xff]   ;;  %172 = vst.msk [vmem:[%s1029_s9] sm:$0xff] %vm59_vm0, %v757_v0  ;;  %174 = vst.msk [vmem:[%s1030_s11] sm:$0xff] %vm59_vm0, %v757_v0  ;;  %v715_v3 = vld [vmem:[%s1027_s1 + $0x8] sm:$0xff]  }
   0x2   :  { %173 = vst.msk [vmem:[%s1031_s10] sm:$0xff] %vm59_vm0, %v757_v0  ;;  %175 = vst.msk [vmem:[%s1032_s12] sm:$0xff] %vm59_vm0, %v757_v0  ;;  %v714_v2 = vld [vmem:[%s1028_s2] sm:$0xff]   ;;  %664 = vmatprep.mubr.msk.bf16.mxu0 %vm758_vm1, %v757_v0  ;;  %672 = vmatprep.mubr.msk.bf16.mxu1 %vm758_vm1, %v757_v0  ;;  %v716_v4 = vld [vmem:[%s1028_s2 + $0x8] sm:$0xff]  }
   0x3   :  { %661 = vmatpush3.bf16.msra.mxu0 %v713_v1  ;;  %669 = vmatpush3.bf16.msra.mxu1 %v714_v2  ;;  %v33_v5 = vld [vmem:[%s1033_s0] sm:$0xff]  ;;  %v34_v6 = vld [vmem:[%s1033_s0 + $0x8] sm:$0xff] }
   0x4   :  { %662 = vmatprep.subr.bf16.mxu0 %v757_v0  ;;  %670 = vmatprep.subr.bf16.mxu1 %v757_v0  ;;  %v35_v7 = vpack.c.bf16 %v34_v6, %v33_v5  ;;  %v717_v8 = vld [vmem:[%s1034_s3] sm:$0xff]   ;;  %v719_v10 = vld [vmem:[%s1034_s3 + $0x8] sm:$0xff]  }
   0x5   :  { %v718_v9 = vld [vmem:[%s1035_s4] sm:$0xff]   ;;  %v720_v11 = vld [vmem:[%s1035_s4 + $0x8] sm:$0xff]  }
   0x6   :  { %v620_v18 = vld [vmem:[%s1036_s6] ss:$0 sm:$0xff] }
   0x7   :  { %663 = vmatpush3.bf16.msra.mxu0 %v715_v3  ;;  %671 = vmatpush3.bf16.msra.mxu1 %v716_v4  ;;  %v616_v22 = vld [vmem:[%s1037_s5] ss:$0 sm:$0xff]  ;;  %s760_s5 = smov 64   ;;  %v722_v4 = vld [vmem:[%s1034_s3 + $0x8] sm:$0xff]  }
   0x8   :  { %676 = vmatprep.subr.bf16.mxu0 %v757_v0  ;;  %684 = vmatprep.subr.bf16.mxu1 %v757_v0  ;;  %v177_v12 = vld [vmem:[%s1029_s9] sm:$0xff] }
   0x9   :  { %v241_v13 = vld [vmem:[%s1030_s11] sm:$0xff]  ;;  %v178_v15 = vpack.c.bf16 %v177_v12, %v177_v12 }
   0xa   :  { %665 = vmatmul.mubr.msk.bf16.vlgmr.msra.gmra.mrb[0].mxu0 %vm59_vm0, %v35_v7  ;;  %673 = vmatmul.mubr.msk.bf16.vlgmr.msra.gmra.mrb[0].mxu1 %vm59_vm0, %v35_v7  ;;  %v303_v14 = vld [vmem:[%s1031_s10] sm:$0xff]  ;;  %v242_v16 = vpack.c.bf16 %v241_v13, %v241_v13  ;;  %v724_v7 = vld [vmem:[%s1035_s4 + $0x8] sm:$0xff]  }
   0xb   :  { %677 = vmatpush3.bf16.msra.mxu0 %v717_v8  ;;  %685 = vmatpush3.bf16.msra.mxu1 %v718_v9  ;;  %v332_v17 = vld [vmem:[%s1032_s12] sm:$0xff] }
   0xc   :  { %678 = vmatprep.subr.bf16.mxu0 %v757_v0  ;;  %686 = vmatprep.subr.bf16.mxu1 %v757_v0  ;;  %v721_v3 = vld [vmem:[%s1034_s3] sm:$0xff]   ;;  %s761_s3 = smov 96  }
   0xd   :  { %680 = vmatprep.mubr.msk.bf16.mxu0 %vm758_vm1, %v757_v0  ;;  %688 = vmatprep.mubr.msk.bf16.mxu1 %vm758_vm1, %v757_v0  ;;  %v723_v5 = vld [vmem:[%s1035_s4] sm:$0xff]  }
   0xe   :  { %312 = vrot.lane.b32.xlu1 %v303_v14, %s759_s16 }
   0xf   :  { %679 = vmatpush3.bf16.msra.mxu0 %v719_v10  ;;  %687 = vmatpush3.bf16.msra.mxu1 %v720_v11 }
  0x10   :  { %692 = vmatprep.subr.bf16.mxu0 %v757_v0  ;;  %700 = vmatprep.subr.bf16.mxu1 %v757_v0 }
  0x12   :  { %681 = vmatmul.mubr.msk.bf16.vlgmr.msra.gmra.mrb[4].mxu0 %vm59_vm0, %v178_v15  ;;  %341 = vrot.lane.b32.xlu1 %v332_v17, %s759_s16 }
  0x13   :  { %689 = vmatmul.mubr.msk.bf16.vlgmr.msra.gmra.mrb[4].mxu1 %vm59_vm0, %v242_v16  ;;  %696 = vmatprep.mubr.msk.bf16.mxu0 %vm758_vm1, %v757_v0 }
  0x14   :  { %704 = vmatprep.mubr.msk.bf16.mxu1 %vm758_vm1, %v757_v0  ;;  %693 = vmatpush3.bf16.msra.mxu0 %v721_v3 }
  0x15   :  { %694 = vmatprep.subr.bf16.mxu0 %v757_v0  ;;  %701 = vmatpush3.bf16.msra.mxu1 %v723_v5 }
  0x16   :  { %702 = vmatprep.subr.bf16.mxu1 %v757_v0 }
  0x18   :  { %695 = vmatpush3.bf16.msra.mxu0 %v722_v4 }
  0x19   :  { %703 = vmatpush3.bf16.msra.mxu1 %v724_v7 }
  0x80   :  { %v313_v56 = vpop.permute.xlu1 %312 }
  0x84   :  { %v342_v58 = vpop.permute.xlu1 %341 }
  0xdd   :  { %v97_v19 = vpop.f32.mrb[0].mxu0  ;;  %v163_v21 = vpop.f32.mrb[0].mxu1 }
  0xde   :  { %v666_v20 = vpop.f32.mrb[1].mxu0  ;;  %v923_v24 = vadd.f32 %v620_v18, %v163_v21  ;;  %v674_v25 = vpop.f32.mrb[1].mxu1  ;;  %v98_v30 = vadd.f32 %v616_v22, %v97_v19 }
  0xdf   :  { %v100_v23 = vpop.f32.mrb[2].mxu0  ;;  %v166_v28 = vpop.f32.mrb[2].mxu1 }
  0xe0   :  { %v925_v26 = vadd.f32 %v616_v22, %v100_v23  ;;  %v667_v27 = vpop.f32.mrb[3].mxu0  ;;  %v675_v29 = vpop.f32.mrb[3].mxu1  ;;  %v167_v31 = vadd.f32 %v620_v18, %v166_v28 }
  0xe5   :  { %v232_v32 = vpop.f32.mrb[4].mxu0 }
  0xe6   :  { %v238_v33 = vadd.f32 %v232_v32, %v98_v30  ;;  %v296_v34 = vpop.f32.mrb[4].mxu1  ;;  %v682_v35 = vpop.f32.mrb[5].mxu0 }
  0xe7   :  { %v302_v36 = vadd.f32 %v296_v34, %v167_v31  ;;  %v235_v37 = vpop.f32.mrb[6].mxu0  ;;  %v690_v38 = vpop.f32.mrb[5].mxu1 }
  0xe8   :  { %725 = vtanh.f32 %v238_v33  ;;  %v683_v39 = vpop.f32.mrb[7].mxu0  ;;  %v299_v40 = vpop.f32.mrb[6].mxu1  ;;  %v630_v44 = vmul.f32 -1.442695, %v238_v33 }
  0xe9   :  { %v691_v41 = vpop.f32.mrb[7].mxu1  ;;  %727 = vtanh.f32 %v302_v36  ;;  %v631_v45 = vmul.f32 -1.442695, %v302_v36 }
  0xea   :  { %729 = vpow2.f32 %v630_v44 }
  0xeb   :  { %731 = vpow2.f32 %v631_v45 }
  0xf2   :  { %v726_v42 = vpop.eup %725 }
  0xf3   :  { %317 = vrot.lane.b32.xlu0 %v726_v42, %s760_s5  ;;  %v728_v43 = vpop.eup %727 }
  0xf4   :  { %v730_v46 = vpop.eup %729 }
  0xf5   :  { %v307_v47 = vadd.f32 1.0, %v730_v46  ;;  %v732_v48 = vpop.eup %731 }
  0xf6   :  { %v336_v49 = vadd.f32 1.0, %v732_v48 }
  0xf7   :  { %346 = vrot.lane.b32.xlu0 %v728_v43, %s760_s5  ;;  %733 = vrcp.f32 %v307_v47 }
  0xf8   :  { %735 = vrcp.f32 %v336_v49 }
 0x101   :  { %v734_v50 = vpop.eup %733 }
 0x102   :  { %v736_v53 = vpop.eup %735  ;;  %v315_v57 = vmul.f32 %v734_v50, %v313_v56 }
 0x103   :  { %v344_v61 = vmul.f32 %v736_v53, %v342_v58 }
 0x165   :  { %v318_v51 = vpop.permute.xlu0 %317 }
 0x166   :  { %v320_v52 = vmul.f32 %v734_v50, %v318_v51 }
 0x168   :  { %322 = vrot.lane.b32.xlu0 %v320_v52, %s759_s16 }
 0x169   :  { %v347_v54 = vpop.permute.xlu0 %346 }
 0x16a   :  { %v349_v55 = vmul.f32 %v736_v53, %v347_v54 }
 0x16c   :  { %351 = vrot.lane.b32.xlu1 %v349_v55, %s759_s16 }
 0x1da   :  { %v323_v59 = vpop.permute.xlu0 %322 }
 0x1db   :  { %v325_v60 = vadd.f32 %v323_v59, %v315_v57 }
 0x1dd   :  { %737 = vtanh.f32 %v325_v60 }
 0x1de   :  { %v352_v62 = vpop.permute.xlu1 %351 }
 0x1df   :  { %v354_v63 = vadd.f32 %v352_v62, %v344_v61 }
 0x1e1   :  { %739 = vtanh.f32 %v354_v63 }
 0x1e7   :  { %v738_v1 = vpop.eup %737 }
 0x1e8   :  { %328 = vrot.lane.b32.xlu0 %v738_v1, %s760_s5 }
 0x1eb   :  { %v740_v2 = vpop.eup %739 }
 0x1ec   :  { %357 = vrot.lane.b32.xlu1 %v740_v2, %s760_s5 }
 0x25a   :  { %v329_v6 = vpop.permute.xlu0 %328 }
 0x25b   :  { %v331_v8 = vmul.f32 %v734_v50, %v329_v6 }
 0x25d   :  { %362 = vrot.lane.b32.xlu0 %v331_v8, %s759_s16 }
 0x25e   :  { %v358_v9 = vpop.permute.xlu1 %357 }
 0x25f   :  { %v360_v10 = vmul.f32 %v736_v53, %v358_v9 }
 0x261   :  { %372 = vrot.lane.b32.xlu1 %v360_v10, %s759_s16  ;;  %367 = vrot.lane.b32.xlu0 %v325_v60, %s761_s3 }
 0x265   :  { %377 = vrot.lane.b32.xlu1 %v354_v63, %s761_s3 }
 0x2cf   :  { %v363_v11 = vpop.permute.xlu0 %362 }
 0x2d0   :  { %365 = vst.msk [vmem:[%s1029_s9] sm:$0xff] %vm59_vm0, %v363_v11  ;;  %381 = vst.msk [vmem:[%s1038_s7] sm:$0xff] %vm59_vm0, %v363_v11 }
 0x2d3   :  { %v373_v0 = vpop.permute.xlu1 %372  ;;  %v368_v12 = vpop.permute.xlu0 %367 }
 0x2d4   :  { %375 = vst.msk [vmem:[%s1030_s11] sm:$0xff] %vm59_vm0, %v373_v0  ;;  %632 = vst.msk [vmem:[%s1039_s8 + $0x8] sm:$0xff] %vm59_vm0, %v373_v0 }
 0x2d5   :  { %370 = vst.msk [vmem:[%s1031_s10] sm:$0xff] %vm59_vm0, %v368_v12 }
 0x2d7   :  { %v378_v13 = vpop.permute.xlu1 %377  ;;  %v386_v14 = vld [vmem:[%s1029_s9] sm:$0xff] }
 0x2d8   :  { %380 = vst.msk [vmem:[%s1032_s12] sm:$0xff] %vm59_vm0, %v378_v13  ;;  %v387_v15 = vpack.c.bf16 %v386_v14, %v386_v14 }
 0x2da   :  { %697 = vmatmul.mubr.msk.bf16.vlgmr.msra.gmra.mrb[8].mxu0 %vm59_vm0, %v387_v15 }
 0x2db   :  { %v449_v16 = vld [vmem:[%s1030_s11] sm:$0xff] }
 0x2dc   :  { %v450_v17 = vpack.c.bf16 %v449_v16, %v449_v16  ;;  %v511_v32 = vld [vmem:[%s1031_s10] sm:$0xff] }
 0x2de   :  { %705 = vmatmul.mubr.msk.bf16.vlgmr.msra.gmra.mrb[8].mxu1 %vm59_vm0, %v450_v17 }
 0x3ad   :  { %v441_v18 = vpop.f32.mrb[8].mxu0 }
 0x3ae   :  { %v447_v19 = vadd.f32 %v441_v18, %v925_v26  ;;  %v698_v20 = vpop.f32.mrb[9].mxu0 }
 0x3af   :  { %v444_v21 = vpop.f32.mrb[10].mxu0 }
 0x3b0   :  { %741 = vtanh.f32 %v447_v19  ;;  %v699_v22 = vpop.f32.mrb[11].mxu0  ;;  %v639_v26 = vmul.f32 -1.442695, %v447_v19 }
 0x3b1   :  { %v504_v23 = vpop.f32.mrb[8].mxu1 }
 0x3b2   :  { %v510_v25 = vadd.f32 %v504_v23, %v923_v24  ;;  %v706_v27 = vpop.f32.mrb[9].mxu1  ;;  %v540_v24 = vld [vmem:[%s1032_s12] sm:$0xff] }
 0x3b3   :  { %v507_v28 = vpop.f32.mrb[10].mxu1 }
 0x3b4   :  { %743 = vtanh.f32 %v510_v25  ;;  %v707_v29 = vpop.f32.mrb[11].mxu1  ;;  %v640_v33 = vmul.f32 -1.442695, %v510_v25 }
 0x3b5   :  { %745 = vpow2.f32 %v639_v26 }
 0x3b6   :  { %747 = vpow2.f32 %v640_v33 }
 0x3ba   :  { %v742_v30 = vpop.eup %741 }
 0x3bb   :  { %525 = vrot.lane.b32.xlu0 %v742_v30, %s760_s5 }
 0x3be   :  { %v744_v31 = vpop.eup %743 }
 0x3bf   :  { %554 = vrot.lane.b32.xlu1 %v744_v31, %s760_s5  ;;  %520 = vrot.lane.b32.xlu0 %v511_v32, %s759_s16  ;;  %v746_v34 = vpop.eup %745 }
 0x3c0   :  { %v515_v35 = vadd.f32 1.0, %v746_v34  ;;  %v748_v36 = vpop.eup %747 }
 0x3c1   :  { %v544_v37 = vadd.f32 1.0, %v748_v36 }
 0x3c2   :  { %749 = vrcp.f32 %v515_v35 }
 0x3c3   :  { %549 = vrot.lane.b32.xlu1 %v540_v24, %s759_s16  ;;  %751 = vrcp.f32 %v544_v37 }
 0x3cc   :  { %v750_v38 = vpop.eup %749 }
 0x3cd   :  { %v752_v41 = vpop.eup %751 }
 0x42d   :  { %v526_v39 = vpop.permute.xlu0 %525 }
 0x42e   :  { %v528_v40 = vmul.f32 %v750_v38, %v526_v39 }
 0x430   :  { %530 = vrot.lane.b32.xlu0 %v528_v40, %s759_s16 }
 0x431   :  { %v555_v42 = vpop.permute.xlu1 %554  ;;  %v521_v44 = vpop.permute.xlu0 %520 }
 0x432   :  { %v557_v43 = vmul.f32 %v752_v41, %v555_v42  ;;  %v523_v45 = vmul.f32 %v750_v38, %v521_v44 }
 0x434   :  { %559 = vrot.lane.b32.xlu1 %v557_v43, %s759_s16 }
 0x435   :  { %v550_v46 = vpop.permute.xlu1 %549 }
 0x436   :  { %v552_v49 = vmul.f32 %v752_v41, %v550_v46 }
 0x4a2   :  { %v531_v47 = vpop.permute.xlu0 %530 }
 0x4a3   :  { %v533_v48 = vadd.f32 %v531_v47, %v523_v45 }
 0x4a5   :  { %753 = vtanh.f32 %v533_v48 }
 0x4a6   :  { %v560_v50 = vpop.permute.xlu1 %559 }
 0x4a7   :  { %v562_v51 = vadd.f32 %v560_v50, %v552_v49 }
 0x4a9   :  { %755 = vtanh.f32 %v562_v51 }
 0x4af   :  { %v754_v52 = vpop.eup %753 }
 0x4b0   :  { %536 = vrot.lane.b32.xlu0 %v754_v52, %s760_s5 }
 0x4b3   :  { %v756_v53 = vpop.eup %755 }
 0x4b4   :  { %565 = vrot.lane.b32.xlu1 %v756_v53, %s760_s5 }
 0x4b8   :  { %575 = vrot.lane.b32.xlu1 %v533_v48, %s761_s3 }
 0x4bc   :  { %585 = vrot.lane.b32.xlu1 %v562_v51, %s761_s3 }
 0x522   :  { %v537_v54 = vpop.permute.xlu0 %536 }
 0x523   :  { %v539_v55 = vmul.f32 %v750_v38, %v537_v54 }
 0x525   :  { %570 = vrot.lane.b32.xlu0 %v539_v55, %s759_s16 }
 0x526   :  { %v566_v56 = vpop.permute.xlu1 %565 }
 0x527   :  { %v568_v57 = vmul.f32 %v752_v41, %v566_v56 }
 0x529   :  { %580 = vrot.lane.b32.xlu0 %v568_v57, %s759_s16 }
 0x52a   :  { %v576_v58 = vpop.permute.xlu1 %575 }
 0x52b   :  { %578 = vst.msk [vmem:[%s1031_s10] sm:$0xff] %vm59_vm0, %v576_v58 }
 0x52e   :  { %v586_v59 = vpop.permute.xlu1 %585 }
 0x52f   :  { %588 = vst.msk [vmem:[%s1032_s12] sm:$0xff] %vm59_vm0, %v586_v59 }
 0x597   :  { %v571_v60 = vpop.permute.xlu0 %570 }
 0x598   :  { %573 = vst.msk [vmem:[%s1029_s9] sm:$0xff] %vm59_vm0, %v571_v60  ;;  %641 = vst.msk [vmem:[%s1038_s7 + $0x8] sm:$0xff] %vm59_vm0, %v571_v60 }
 0x59b   :  { %v581_v61 = vpop.permute.xlu0 %580 }
 0x59c   :  { %583 = vst.msk [vmem:[%s1030_s11] sm:$0xff] %vm59_vm0, %v581_v61  ;;  %591 = vst.msk [vmem:[%s1039_s8] sm:$0xff] %vm59_vm0, %v581_v61 }

// kernel: transformer_blstm_forward.8
= control target key start
LH: loop header
LB: loop body
LE: loop exit
PB: predicated region body
PF: predicated region fallthrough
CT: control target
= control target key end

     0   :  { %vm204_vm0 = vcmask 261120   ;;  %v810_v0 = vmov 0.0   ;;  %vm811_vm1 = vmmov 0   ;;  %vm75_vm2 = vcmask 523264   ;;  %s812_s17 = smov 32   ;;  %s1094_s1 = inlined_call_operand.vmem [shape: bf16[64,128], index: 1, kind: input, shape index: {}]   ;;  %s1095_s2 = inlined_call_operand.vmem [shape: bf16[64,128], index: 2, kind: input, shape index: {}]   ;;  %s1096_s9 = inlined_call_operand.vmem [shape: f32[8,32], index: 9, kind: output, shape index: {2}]   ;;  %s1097_s11 = inlined_call_operand.vmem [shape: f32[8,32], index: 11, kind: output, shape index: {4}]   ;;  %s1098_s10 = inlined_call_operand.vmem [shape: f32[8,32], index: 10, kind: output, shape index: {3}]   ;;  %s1099_s12 = inlined_call_operand.vmem [shape: f32[8,32], index: 12, kind: output, shape index: {5}]   ;;  %s1100_s0 = inlined_call_operand.vmem [shape: f32[2,8,64], index: 0, kind: input, shape index: {}]   ;;  %s1101_s3 = inlined_call_operand.vmem [shape: bf16[32,128], index: 3, kind: input, shape index: {}]   ;;  %s1102_s4 = inlined_call_operand.vmem [shape: bf16[32,128], index: 4, kind: input, shape index: {}]   ;;  %s1103_s6 = inlined_call_operand.vmem [shape: f32[1,128], index: 6, kind: input, shape index: {}]   ;;  %s1104_s5 = inlined_call_operand.vmem [shape: f32[1,128], index: 5, kind: input, shape index: {}]   ;;  %s1105_s7 = inlined_call_operand.vmem [shape: f32[2,8,32], index: 7, kind: output, shape index: {0}]   ;;  %s1106_s8 = inlined_call_operand.vmem [shape: f32[2,8,32], index: 8, kind: output, shape index: {1}]  }
   0x1   :  { %701 = vmatprep.subr.bf16.mxu0 %v810_v0  ;;  %713 = vmatprep.subr.bf16.mxu1 %v810_v0  ;;  %v762_v1 = vld [vmem:[%s1094_s1] sm:$0xff]   ;;  %205 = vst.msk [vmem:[%s1096_s9] sm:$0xff] %vm204_vm0, %v810_v0  ;;  %207 = vst.msk [vmem:[%s1097_s11] sm:$0xff] %vm204_vm0, %v810_v0  ;;  %v764_v3 = vld [vmem:[%s1094_s1 + $0x8] sm:$0xff]  }
   0x2   :  { %206 = vst.msk [vmem:[%s1098_s10] sm:$0xff] %vm204_vm0, %v810_v0  ;;  %208 = vst.msk [vmem:[%s1099_s12] sm:$0xff] %vm204_vm0, %v810_v0  ;;  %v763_v2 = vld [vmem:[%s1095_s2] sm:$0xff]   ;;  %709 = vmatprep.mubr.msk.bf16.mxu0 %vm811_vm1, %v810_v0  ;;  %721 = vmatprep.mubr.msk.bf16.mxu1 %vm811_vm1, %v810_v0  ;;  %v765_v4 = vld [vmem:[%s1095_s2 + $0x8] sm:$0xff]  }
   0x3   :  { %702 = vmatpush3.bf16.msra.mxu0 %v762_v1  ;;  %714 = vmatpush3.bf16.msra.mxu1 %v763_v2  ;;  %v766_v5 = vld [vmem:[%s1094_s1 + $0x10] sm:$0xff]   ;;  %v768_v7 = vld [vmem:[%s1094_s1 + $0x18] sm:$0xff]   ;;  %v33_v8 = vld [vmem:[%s1100_s0] sm:$0xff] }
   0x4   :  { %703 = vmatprep.subr.bf16.mxu0 %v810_v0  ;;  %715 = vmatprep.subr.bf16.mxu1 %v810_v0  ;;  %v767_v6 = vld [vmem:[%s1095_s2 + $0x10] sm:$0xff]   ;;  %v34_v9 = vld [vmem:[%s1100_s0 + $0x8] sm:$0xff]  ;;  %v769_v10 = vld [vmem:[%s1095_s2 + $0x18] sm:$0xff]  }
   0x5   :  { %v35_v11 = vpack.c.bf16 %v34_v9, %v33_v8  ;;  %v770_v12 = vld [vmem:[%s1101_s3] sm:$0xff]   ;;  %v772_v15 = vld [vmem:[%s1101_s3 + $0x8] sm:$0xff]  }
   0x6   :  { %v771_v14 = vld [vmem:[%s1102_s4] sm:$0xff]   ;;  %v773_v18 = vld [vmem:[%s1102_s4 + $0x8] sm:$0xff]  }
   0x7   :  { %704 = vmatpush3.bf16.msra.mxu0 %v764_v3  ;;  %716 = vmatpush3.bf16.msra.mxu1 %v765_v4  ;;  %v655_v22 = vld [vmem:[%s1103_s6] ss:$0 sm:$0xff]  ;;  %v775_v8 = vld [vmem:[%s1101_s3 + $0x8] sm:$0xff]  }
   0x8   :  { %705 = vmatprep.subr.bf16.mxu0 %v810_v0  ;;  %717 = vmatprep.subr.bf16.mxu1 %v810_v0  ;;  %v210_v16 = vld [vmem:[%s1096_s9] sm:$0xff] }
   0x9   :  { %v336_v13 = vld [vmem:[%s1098_s10] sm:$0xff]  ;;  %v211_v20 = vpack.c.bf16 %v210_v16, %v210_v16 }
   0xa   :  { %345 = vrot.lane.b32.xlu1 %v336_v13, %s812_s17  ;;  %v365_v17 = vld [vmem:[%s1099_s12] sm:$0xff] }
   0xb   :  { %706 = vmatpush3.bf16.msra.mxu0 %v766_v5  ;;  %718 = vmatpush3.bf16.msra.mxu1 %v767_v6  ;;  %v274_v19 = vld [vmem:[%s1097_s11] sm:$0xff] }
   0xc   :  { %707 = vmatprep.subr.bf16.mxu0 %v810_v0  ;;  %719 = vmatprep.subr.bf16.mxu1 %v810_v0  ;;  %v275_v21 = vpack.c.bf16 %v274_v19, %v274_v19  ;;  %v649_v26 = vld [vmem:[%s1104_s5] ss:$0 sm:$0xff]  ;;  %s813_s5 = smov 64  }
   0xd   :  { %v776_v9 = vld [vmem:[%s1102_s4] sm:$0xff]  }
   0xe   :  { %374 = vrot.lane.b32.xlu1 %v365_v17, %s812_s17 }
   0xf   :  { %708 = vmatpush3.bf16.msra.mxu0 %v768_v7  ;;  %720 = vmatpush3.bf16.msra.mxu1 %v769_v10  ;;  %v774_v7 = vld [vmem:[%s1101_s3] sm:$0xff]   ;;  %s814_s3 = smov 96  }
  0x10   :  { %725 = vmatprep.subr.bf16.mxu0 %v810_v0  ;;  %733 = vmatprep.subr.bf16.mxu1 %v810_v0 }
  0x12   :  { %710 = vmatmul.mubr.msk.bf16.vlgmr.msra.gmra.mrb[0].mxu0 %vm75_vm2, %v35_v11  ;;  %722 = vmatmul.mubr.msk.bf16.vlgmr.msra.gmra.mrb[0].mxu1 %vm75_vm2, %v35_v11  ;;  %v777_v11 = vld [vmem:[%s1102_s4 + $0x8] sm:$0xff]  }
  0x13   :  { %726 = vmatpush3.bf16.msra.mxu0 %v770_v12  ;;  %734 = vmatpush3.bf16.msra.mxu1 %v771_v14 }
  0x14   :  { %727 = vmatprep.subr.bf16.mxu0 %v810_v0  ;;  %735 = vmatprep.subr.bf16.mxu1 %v810_v0 }
  0x15   :  { %729 = vmatprep.mubr.msk.bf16.mxu0 %vm811_vm1, %v810_v0  ;;  %737 = vmatprep.mubr.msk.bf16.mxu1 %vm811_vm1, %v810_v0 }
  0x17   :  { %728 = vmatpush3.bf16.msra.mxu0 %v772_v15  ;;  %736 = vmatpush3.bf16.msra.mxu1 %v773_v18 }
  0x18   :  { %741 = vmatprep.subr.bf16.mxu0 %v810_v0  ;;  %749 = vmatprep.subr.bf16.mxu1 %v810_v0 }
  0x1a   :  { %730 = vmatmul.mubr.msk.bf16.vlgmr.msra.gmra.mrb[4].mxu0 %vm204_vm0, %v211_v20  ;;  %738 = vmatmul.mubr.msk.bf16.vlgmr.msra.gmra.mrb[4].mxu1 %vm204_vm0, %v275_v21 }
  0x1b   :  { %745 = vmatprep.mubr.msk.bf16.mxu0 %vm811_vm1, %v810_v0  ;;  %753 = vmatprep.mubr.msk.bf16.mxu1 %vm811_vm1, %v810_v0 }
  0x1c   :  { %742 = vmatpush3.bf16.msra.mxu0 %v774_v7  ;;  %750 = vmatpush3.bf16.msra.mxu1 %v776_v9 }
  0x1d   :  { %743 = vmatprep.subr.bf16.mxu0 %v810_v0  ;;  %751 = vmatprep.subr.bf16.mxu1 %v810_v0 }
  0x20   :  { %744 = vmatpush3.bf16.msra.mxu0 %v775_v8  ;;  %752 = vmatpush3.bf16.msra.mxu1 %v777_v11 }
  0x7c   :  { %v346_v60 = vpop.permute.xlu1 %345 }
  0x80   :  { %v375_v62 = vpop.permute.xlu1 %374 }
  0xe5   :  { %v113_v23 = vpop.f32.mrb[0].mxu0  ;;  %v195_v25 = vpop.f32.mrb[0].mxu1 }
  0xe6   :  { %v711_v24 = vpop.f32.mrb[1].mxu0  ;;  %v990_v28 = vadd.f32 %v655_v22, %v195_v25  ;;  %v723_v29 = vpop.f32.mrb[1].mxu1  ;;  %v114_v34 = vadd.f32 %v649_v26, %v113_v23 }
  0xe7   :  { %v116_v27 = vpop.f32.mrb[2].mxu0  ;;  %v198_v32 = vpop.f32.mrb[2].mxu1 }
  0xe8   :  { %v992_v30 = vadd.f32 %v649_v26, %v116_v27  ;;  %v712_v31 = vpop.f32.mrb[3].mxu0  ;;  %v724_v33 = vpop.f32.mrb[3].mxu1  ;;  %v199_v35 = vadd.f32 %v655_v22, %v198_v32 }
  0xed   :  { %v265_v36 = vpop.f32.mrb[4].mxu0  ;;  %v329_v38 = vpop.f32.mrb[4].mxu1 }
  0xee   :  { %v271_v37 = vadd.f32 %v265_v36, %v114_v34  ;;  %v731_v39 = vpop.f32.mrb[5].mxu0  ;;  %v335_v40 = vadd.f32 %v329_v38, %v199_v35  ;;  %v739_v42 = vpop.f32.mrb[5].mxu1 }
  0xef   :  { %v268_v41 = vpop.f32.mrb[6].mxu0  ;;  %v332_v44 = vpop.f32.mrb[6].mxu1 }
  0xf0   :  { %778 = vtanh.f32 %v271_v37  ;;  %v732_v43 = vpop.f32.mrb[7].mxu0  ;;  %v740_v45 = vpop.f32.mrb[7].mxu1  ;;  %v667_v48 = vmul.f32 -1.442695, %v271_v37  ;;  %v668_v49 = vmul.f32 -1.442695, %v335_v40 }
  0xf1   :  { %780 = vtanh.f32 %v335_v40 }
  0xf2   :  { %782 = vpow2.f32 %v667_v48 }
  0xf3   :  { %784 = vpow2.f32 %v668_v49 }
  0xfa   :  { %v779_v46 = vpop.eup %778 }
  0xfb   :  { %350 = vrot.lane.b32.xlu0 %v779_v46, %s813_s5  ;;  %v781_v47 = vpop.eup %780 }
  0xfc   :  { %v783_v50 = vpop.eup %782 }
  0xfd   :  { %v340_v51 = vadd.f32 1.0, %v783_v50  ;;  %v785_v52 = vpop.eup %784 }
  0xfe   :  { %v369_v53 = vadd.f32 1.0, %v785_v52 }
  0xff   :  { %379 = vrot.lane.b32.xlu0 %v781_v47, %s813_s5  ;;  %786 = vrcp.f32 %v340_v51 }
 0x100   :  { %788 = vrcp.f32 %v369_v53 }
 0x109   :  { %v787_v54 = vpop.eup %786 }
 0x10a   :  { %v789_v57 = vpop.eup %788  ;;  %v348_v61 = vmul.f32 %v787_v54, %v346_v60 }
 0x10b   :  { %v377_v2 = vmul.f32 %v789_v57, %v375_v62 }
 0x16d   :  { %v351_v55 = vpop.permute.xlu0 %350 }
 0x16e   :  { %v353_v56 = vmul.f32 %v787_v54, %v351_v55 }
 0x170   :  { %355 = vrot.lane.b32.xlu0 %v353_v56, %s812_s17 }
 0x171   :  { %v380_v58 = vpop.permute.xlu0 %379 }
 0x172   :  { %v382_v59 = vmul.f32 %v789_v57, %v380_v58 }
 0x174   :  { %384 = vrot.lane.b32.xlu1 %v382_v59, %s812_s17 }
 0x1e2   :  { %v356_v63 = vpop.permute.xlu0 %355 }
 0x1e3   :  { %v358_v1 = vadd.f32 %v356_v63, %v348_v61 }
 0x1e5   :  { %790 = vtanh.f32 %v358_v1 }
 0x1e6   :  { %v385_v3 = vpop.permute.xlu1 %384 }
 0x1e7   :  { %v387_v4 = vadd.f32 %v385_v3, %v377_v2 }
 0x1e9   :  { %792 = vtanh.f32 %v387_v4 }
 0x1ef   :  { %v791_v5 = vpop.eup %790 }
 0x1f0   :  { %361 = vrot.lane.b32.xlu0 %v791_v5, %s813_s5 }
 0x1f3   :  { %v793_v6 = vpop.eup %792 }
 0x1f4   :  { %390 = vrot.lane.b32.xlu1 %v793_v6, %s813_s5 }
 0x262   :  { %v362_v10 = vpop.permute.xlu0 %361 }
 0x263   :  { %v364_v12 = vmul.f32 %v787_v54, %v362_v10 }
 0x265   :  { %395 = vrot.lane.b32.xlu0 %v364_v12, %s812_s17 }
 0x266   :  { %v391_v13 = vpop.permute.xlu1 %390 }
 0x267   :  { %v393_v14 = vmul.f32 %v789_v57, %v391_v13 }
 0x269   :  { %405 = vrot.lane.b32.xlu1 %v393_v14, %s812_s17  ;;  %400 = vrot.lane.b32.xlu0 %v358_v1, %s814_s3 }
 0x26d   :  { %410 = vrot.lane.b32.xlu1 %v387_v4, %s814_s3 }
 0x2d7   :  { %v396_v15 = vpop.permute.xlu0 %395 }
 0x2d8   :  { %398 = vst.msk [vmem:[%s1096_s9] sm:$0xff] %vm204_vm0, %v396_v15  ;;  %414 = vst.msk [vmem:[%s1105_s7] sm:$0xff] %vm204_vm0, %v396_v15 }
 0x2db   :  { %v406_v0 = vpop.permute.xlu1 %405  ;;  %v401_v16 = vpop.permute.xlu0 %400 }
 0x2dc   :  { %408 = vst.msk [vmem:[%s1097_s11] sm:$0xff] %vm204_vm0, %v406_v0  ;;  %669 = vst.msk [vmem:[%s1106_s8 + $0x8] sm:$0xff] %vm204_vm0, %v406_v0 }
 0x2dd   :  { %403 = vst.msk [vmem:[%s1098_s10] sm:$0xff] %vm204_vm0, %v401_v16 }
 0x2df   :  { %v411_v17 = vpop.permute.xlu1 %410  ;;  %v419_v18 = vld [vmem:[%s1096_s9] sm:$0xff] }
 0x2e0   :  { %413 = vst.msk [vmem:[%s1099_s12] sm:$0xff] %vm204_vm0, %v411_v17  ;;  %v420_v19 = vpack.c.bf16 %v419_v18, %v419_v18 }
 0x2e2   :  { %746 = vmatmul.mubr.msk.bf16.vlgmr.msra.gmra.mrb[8].mxu0 %vm204_vm0, %v420_v19 }
 0x2e3   :  { %v482_v20 = vld [vmem:[%s1097_s11] sm:$0xff] }
 0x2e4   :  { %v483_v21 = vpack.c.bf16 %v482_v20, %v482_v20  ;;  %v544_v36 = vld [vmem:[%s1098_s10] sm:$0xff] }
 0x2e6   :  { %754 = vmatmul.mubr.msk.bf16.vlgmr.msra.gmra.mrb[8].mxu1 %vm204_vm0, %v483_v21 }
 0x3b5   :  { %v474_v22 = vpop.f32.mrb[8].mxu0 }
 0x3b6   :  { %v480_v23 = vadd.f32 %v474_v22, %v992_v30  ;;  %v747_v24 = vpop.f32.mrb[9].mxu0 }
 0x3b7   :  { %v477_v25 = vpop.f32.mrb[10].mxu0 }
 0x3b8   :  { %794 = vtanh.f32 %v480_v23  ;;  %v748_v26 = vpop.f32.mrb[11].mxu0  ;;  %v676_v30 = vmul.f32 -1.442695, %v480_v23 }
 0x3b9   :  { %v537_v27 = vpop.f32.mrb[8].mxu1 }
 0x3ba   :  { %v543_v29 = vadd.f32 %v537_v27, %v990_v28  ;;  %v755_v31 = vpop.f32.mrb[9].mxu1  ;;  %v573_v28 = vld [vmem:[%s1099_s12] sm:$0xff] }
 0x3bb   :  { %v540_v32 = vpop.f32.mrb[10].mxu1 }
 0x3bc   :  { %796 = vtanh.f32 %v543_v29  ;;  %v756_v33 = vpop.f32.mrb[11].mxu1  ;;  %v677_v37 = vmul.f32 -1.442695, %v543_v29 }
 0x3bd   :  { %798 = vpow2.f32 %v676_v30 }
 0x3be   :  { %800 = vpow2.f32 %v677_v37 }
 0x3c2   :  { %v795_v34 = vpop.eup %794 }
 0x3c3   :  { %558 = vrot.lane.b32.xlu0 %v795_v34, %s813_s5 }
 0x3c6   :  { %v797_v35 = vpop.eup %796 }
 0x3c7   :  { %587 = vrot.lane.b32.xlu1 %v797_v35, %s813_s5  ;;  %553 = vrot.lane.b32.xlu0 %v544_v36, %s812_s17  ;;  %v799_v38 = vpop.eup %798 }
 0x3c8   :  { %v548_v39 = vadd.f32 1.0, %v799_v38  ;;  %v801_v40 = vpop.eup %800 }
 0x3c9   :  { %v577_v41 = vadd.f32 1.0, %v801_v40 }
 0x3ca   :  { %802 = vrcp.f32 %v548_v39 }
 0x3cb   :  { %582 = vrot.lane.b32.xlu1 %v573_v28, %s812_s17  ;;  %804 = vrcp.f32 %v577_v41 }
 0x3d4   :  { %v803_v42 = vpop.eup %802 }
 0x3d5   :  { %v805_v45 = vpop.eup %804 }
 0x435   :  { %v559_v43 = vpop.permute.xlu0 %558 }
 0x436   :  { %v561_v44 = vmul.f32 %v803_v42, %v559_v43 }
 0x438   :  { %563 = vrot.lane.b32.xlu0 %v561_v44, %s812_s17 }
 0x439   :  { %v588_v46 = vpop.permute.xlu1 %587  ;;  %v554_v48 = vpop.permute.xlu0 %553 }
 0x43a   :  { %v590_v47 = vmul.f32 %v805_v45, %v588_v46  ;;  %v556_v49 = vmul.f32 %v803_v42, %v554_v48 }
 0x43c   :  { %592 = vrot.lane.b32.xlu1 %v590_v47, %s812_s17 }
 0x43d   :  { %v583_v50 = vpop.permute.xlu1 %582 }
 0x43e   :  { %v585_v53 = vmul.f32 %v805_v45, %v583_v50 }
 0x4aa   :  { %v564_v51 = vpop.permute.xlu0 %563 }
 0x4ab   :  { %v566_v52 = vadd.f32 %v564_v51, %v556_v49 }
 0x4ad   :  { %806 = vtanh.f32 %v566_v52 }
 0x4ae   :  { %v593_v54 = vpop.permute.xlu1 %592 }
 0x4af   :  { %v595_v55 = vadd.f32 %v593_v54, %v585_v53 }
 0x4b1   :  { %808 = vtanh.f32 %v595_v55 }
 0x4b7   :  { %v807_v56 = vpop.eup %806 }
 0x4b8   :  { %569 = vrot.lane.b32.xlu0 %v807_v56, %s813_s5 }
 0x4bb   :  { %v809_v57 = vpop.eup %808 }
 0x4bc   :  { %598 = vrot.lane.b32.xlu1 %v809_v57, %s813_s5 }
 0x4c0   :  { %608 = vrot.lane.b32.xlu1 %v566_v52, %s814_s3 }
 0x4c4   :  { %618 = vrot.lane.b32.xlu1 %v595_v55, %s814_s3 }
 0x52a   :  { %v570_v58 = vpop.permute.xlu0 %569 }
 0x52b   :  { %v572_v59 = vmul.f32 %v803_v42, %v570_v58 }
 0x52d   :  { %603 = vrot.lane.b32.xlu0 %v572_v59, %s812_s17 }
 0x52e   :  { %v599_v60 = vpop.permute.xlu1 %598 }
 0x52f   :  { %v601_v61 = vmul.f32 %v805_v45, %v599_v60 }
 0x531   :  { %613 = vrot.lane.b32.xlu0 %v601_v61, %s812_s17 }
 0x532   :  { %v609_v62 = vpop.permute.xlu1 %608 }
 0x533   :  { %611 = vst.msk [vmem:[%s1098_s10] sm:$0xff] %vm204_vm0, %v609_v62 }
 0x536   :  { %v619_v63 = vpop.permute.xlu1 %618 }
 0x537   :  { %621 = vst.msk [vmem:[%s1099_s12] sm:$0xff] %vm204_vm0, %v619_v63 }
 0x59f   :  { %v604_v1 = vpop.permute.xlu0 %603 }
 0x5a0   :  { %606 = vst.msk [vmem:[%s1096_s9] sm:$0xff] %vm204_vm0, %v604_v1  ;;  %678 = vst.msk [vmem:[%s1105_s7 + $0x8] sm:$0xff] %vm204_vm0, %v604_v1 }
 0x5a3   :  { %v614_v2 = vpop.permute.xlu0 %613 }
 0x5a4   :  { %616 = vst.msk [vmem:[%s1097_s11] sm:$0xff] %vm204_vm0, %v614_v2  ;;  %624 = vst.msk [vmem:[%s1106_s8] sm:$0xff] %vm204_vm0, %v614_v2 }

// kernel: transformer_blstm_forward.9
= control target key start
LH: loop header
LB: loop body
LE: loop exit
PB: predicated region body
PF: predicated region fallthrough
CT: control target
= control target key end

     0   :  { %v238_v1 = vmov 0.0   ;;  %vm239_vm0 = vmmov 0   ;;  %s316_s0 = inlined_call_operand.vmem [shape: f32[16,32], index: 0, kind: input, shape index: {}]   ;;  %s317_s1 = inlined_call_operand.vmem [shape: f32[16,32], index: 1, kind: input, shape index: {}]   ;;  %s318_s2 = inlined_call_operand.vmem [shape: bf16[32,32], index: 2, kind: input, shape index: {}]   ;;  %s319_s3 = inlined_call_operand.vmem [shape: bf16[32,32], index: 3, kind: input, shape index: {}]   ;;  %s320_s4 = inlined_call_operand.vmem [shape: f32[1,32], index: 4, kind: input, shape index: {}]   ;;  %s321_s5 = inlined_call_operand.hbm [shape: f32[16,32], index: 5, kind: output, shape index: {}]  }
   0x1   :  { %v210_v0 = vld [vmem:[%s319_s3] sm:$0xff]   ;;  %189 = vmatprep.subr.bf16.mxu0 %v238_v1  ;;  %197 = vmatprep.subr.bf16.mxu1 %v238_v1  ;;  %v212_v3 = vld [vmem:[%s319_s3 + $0x8] sm:$0xff]  }
   0x2   :  { %v211_v2 = vld [vmem:[%s318_s2] sm:$0xff]   ;;  %190 = vmatpush3.bf16.msra.mxu0 %v210_v0  ;;  %193 = vmatprep.mubr.msk.bf16.mxu0 %vm239_vm0, %v238_v1  ;;  %v213_v4 = vld [vmem:[%s318_s2 + $0x8] sm:$0xff]  }
   0x3   :  { %198 = vmatpush3.bf16.msra.mxu1 %v211_v2  ;;  %191 = vmatprep.subr.bf16.mxu0 %v238_v1  ;;  %v29_v5 = vld [vmem:[%s317_s1] sm:$0xff]  ;;  %v30_v6 = vld [vmem:[%s317_s1 + $0x8] sm:$0xff] }
   0x4   :  { %199 = vmatprep.subr.bf16.mxu1 %v238_v1  ;;  %201 = vmatprep.mubr.msk.bf16.mxu1 %vm239_vm0, %v238_v1  ;;  %v22_v7 = vld [vmem:[%s316_s0] sm:$0xff]  ;;  %v31_v8 = vpack.c.bf16 %v30_v6, %v29_v5  ;;  %v23_v9 = vld [vmem:[%s316_s0 + $0x8] sm:$0xff] }
   0x5   :  { %10 = vsyncpa [#allocation3], 0  ;;  %vm48_vm1 = vcmask 261120   ;;  %v24_v10 = vpack.c.bf16 %v23_v9, %v22_v7  ;;  %v182_v13 = vld [vmem:[%s320_s4] ss:$0 sm:$0xff]  ;;  %s240_s0 = smov [#allocation2]  }
   0x6   :  { %192 = vmatpush3.bf16.msra.mxu0 %v212_v3  ;;  %s165_s8 = sshll.u32 %s240_s0, 4  ;;  %s166_s8 = int_to_ptr.vmem [resolvable:$true] %s165_s8 }
   0x7   :  { %200 = vmatpush3.bf16.msra.mxu1 %v213_v4  ;;  %s214_s9 = scalar_lea.vmem %s166_s8, 256  ;;  %p219_p1 = scmp.lt.s32.totalorder %s166_s8, %s166_s8 }
   0x8   :  { %p215_p0 = scmp.ne.s32.totalorder %s166_s8, %s214_s9  ;;  %p220_p2 = scmp.lt.s32.totalorder %s214_s9, %s214_s9 }
   0x9   :  { %194 = vmatmul.mubr.msk.bf16.vlgmr.msra.gmra.mrb[0].mxu0 %vm48_vm1, %v31_v8 }
   0xa   :  { %202 = vmatmul.mubr.msk.bf16.vlgmr.msra.gmra.mrb[0].mxu1 %vm48_vm1, %v24_v10  ;;  %p221_p3 = por %p220_p2, %p219_p1 }
   0xc   :  { %p222_p4 = pnand %p221_p3, %p215_p0 }
  0xdc   :  { %v86_v11 = vpop.f32.mrb[0].mxu0 }
  0xdd   :  { %v142_v12 = vpop.f32.mrb[0].mxu1  ;;  %v195_v14 = vpop.f32.mrb[1].mxu0 }
  0xde   :  { %v143_v15 = vadd.f32 %v142_v12, %v86_v11  ;;  %v203_v16 = vpop.f32.mrb[1].mxu1  ;;  %v89_v17 = vpop.f32.mrb[2].mxu0 }
  0xdf   :  { %v145_v18 = vpop.f32.mrb[2].mxu1  ;;  %v196_v19 = vpop.f32.mrb[3].mxu0 }
  0xe0   :  { %v156_v20 = vadd.f32 %v182_v13, %v143_v15  ;;  %v146_v21 = vadd.f32 %v145_v18, %v89_v17  ;;  %v204_v22 = vpop.f32.mrb[3].mxu1 }
  0xe2   :  { %158 = vst.msk [vmem:[#allocation2] sm:$0xff] %vm48_vm1, %v156_v20  ;;  %v157_v23 = vadd.f32 %v182_v13, %v146_v21 }
  0xe4   :  { %159 = vst.msk [vmem:[#allocation2 + $0x8] sm:$0xff] %vm48_vm1, %v157_v23 }
  0xe5   :  { %225 = shalt.err (!%p222_p4)
}
  0xe6   :  { %s226_s11 = scalar_lea.hbm %s321_s5, 256 }
  0xe7   :  { %p227_p5 = scmp.ne.s32.totalorder %s321_s5, %s226_s11  ;;  %p230_p6 = scmp.lt.u32.totalorder %s226_s11, %s321_s5 }
  0xe9   :  { %p232_p7 = pnand %p230_p6, %p227_p5 }
  0xeb   :  { %235 = shalt.err (!%p232_p7)
}
  0xec   :  { %s241_s16 = smov 128   ;;  %s242_s17 = smov 8  }
  0xed   :  { %171 = dma.vmem_to_hbm [thread:$0]  %s166_s8, 256, %s321_s5, [#allocation3], %s241_s16, %s241_s16, %s242_s17  }
  0xee   :  { %236 = dma.done.wait [#allocation3], 256  }
  0xef   :  { %237 = vsyncadd [#allocation3], 4294967040 }
  0xf0   :  { %175 = vsyncpa [#allocation3], 1 }

// kernel: transformer_blstm_forward.5
= control target key start
LH: loop header
LB: loop body
LE: loop exit
PB: predicated region body
PF: predicated region fallthrough
CT: control target
= control target key end

     0   :  { %v3746_v0 = vmov 0.0   ;;  %vm3747_vm0 = vmmov 0   ;;  %vm71_vm1 = vcmask 261120   ;;  %s3749_s17 = smov 96   ;;  %s3750_s18 = smov 80   ;;  %vm123_vm2 = vcmask 130048   ;;  %s4571_s1 = inlined_call_operand.vmem [shape: bf16[32,96], index: 1, kind: input, shape index: {}]   ;;  %s4572_s0 = inlined_call_operand.vmem [shape: f32[16,32], index: 0, kind: input, shape index: {}]   ;;  %s4573_s2 = inlined_call_operand.vmem [shape: f32[1,96], index: 2, kind: input, shape index: {}]   ;;  %s4574_s3 = inlined_call_operand.vmem [shape: bf16[32,32], index: 3, kind: input, shape index: {}]   ;;  %s4575_s4 = inlined_call_operand.vmem [shape: f32[1,32], index: 4, kind: input, shape index: {}]   ;;  %s4576_s7 = inlined_call_operand.vmem [shape: bf16[32,2048], index: 7, kind: input, shape index: {}]   ;;  %s4577_s9 = inlined_call_operand.vmem [shape: bf16[2048,32], index: 9, kind: input, shape index: {}]   ;;  %s4578_s5 = inlined_call_operand.vmem [shape: f32[1,32], index: 5, kind: input, shape index: {}]   ;;  %s4579_s6 = inlined_call_operand.vmem [shape: f32[1,32], index: 6, kind: input, shape index: {}]   ;;  %s4580_s8 = inlined_call_operand.vmem [shape: f32[1,2048], index: 8, kind: input, shape index: {}]   ;;  %s4581_s10 = inlined_call_operand.vmem [shape: f32[1,32], index: 10, kind: input, shape index: {}]   ;;  %s4582_s11 = inlined_call_operand.vmem [shape: f32[1,32], index: 11, kind: input, shape index: {}]   ;;  %s4583_s12 = inlined_call_operand.vmem [shape: f32[1,32], index: 12, kind: input, shape index: {}]   ;;  %s4584_s13 = inlined_call_operand.vmem [shape: f32[16,32], index: 13, kind: output, shape index: {}]  }
   0x1   :  { %3510 = vmatprep.subr.bf16.mxu0 %v3746_v0  ;;  %v3590_v1 = vld [vmem:[%s4571_s1] sm:$0xff]   ;;  %3514 = vmatprep.mubr.msk.bf16.mxu0 %vm3747_vm0, %v3746_v0  ;;  %v3591_v2 = vld [vmem:[%s4571_s1 + $0x8] sm:$0xff]   ;;  %vm199_vm3 = vcmask 64512   ;;  %s3752_s19 = smov 48  }
   0x2   :  { %3518 = vmatprep.subr.mxu1 %v3746_v0  ;;  %3520 = vmatprep.mubr.msk.f32.mxu1 %vm3747_vm0, %v3746_v0  ;;  %v3839_v3 = vld [vmem:[%s4572_s0] sm:$0xff]  ;;  %v3844_v4 = vld [vmem:[%s4572_s0 + $0x8] sm:$0xff]  ;;  %s3748_s0 = smov 64  }
   0x3   :  { %3511 = vmatpush3.bf16.msra.mxu0 %v3590_v1  ;;  %v47_v5 = vpack.c.bf16 %v3844_v4, %v3839_v3  ;;  %v3111_v6 = vld [vmem:[%s4573_s2] ss:$0 sm:$0xff]  ;;  %s3751_s2 = smov 112   ;;  %v3593_v40 = vld [vmem:[%s4574_s3 + $0x8] sm:$0xff]  }
   0x4   :  { %3512 = vmatprep.subr.bf16.mxu0 %v3746_v0  ;;  %v3893_v44 = vld [vmem:[%s4574_s3] sm:$0xff]  }
   0x7   :  { %3513 = vmatpush3.bf16.msra.mxu0 %v3591_v2 }
   0x8   :  { %3533 = vmatprep.subr.mxu0 %v3746_v0 }
   0xa   :  { %3515 = vmatmul.mubr.msk.bf16.vlgmr.msra.gmra.mrb[0].mxu0 %vm71_vm1, %v47_v5 }
   0xb   :  { %3535 = vmatprep.mubr.msk.f32.mxu0 %vm3747_vm0, %v3746_v0 }
  0xdd   :  { %v109_v7 = vpop.f32.mrb[0].mxu0 }
  0xde   :  { %v110_v8 = vadd.f32 %v3111_v6, %v109_v7  ;;  %v3516_v9 = vpop.f32.mrb[1].mxu0 }
  0xdf   :  { %v112_v10 = vpop.f32.mrb[2].mxu0 }
  0xe0   :  { %v3856_v11 = vadd.f32 %v3111_v6, %v112_v10  ;;  %211 = vrot.lane.b32.xlu1 %v110_v8, %s3748_s0  ;;  %121 = vrot.lane.b32.xlu0 %v110_v8, %s3749_s17  ;;  %v3517_v12 = vpop.f32.mrb[3].mxu0 }
  0xe4   :  { %290 = vrot.lane.b32.xlu1 %v110_v8, %s3750_s18 }
 0x152   :  { %v122_v13 = vpop.permute.xlu0 %121  ;;  %v212_v14 = vpop.permute.xlu1 %211 }
 0x153   :  { %3519 = vmatpush3.xpose.msk.msra.mxu1 %vm123_vm2, %v122_v13 }
 0x154   :  { %3523 = vmatprep.subr.mxu1 %v3746_v0 }
 0x156   :  { %3521 = vmatmul.mubr.msk.f32.vlgmr.msra.gmra.mrb[0].mxu1 %vm123_vm2, %v110_v8  ;;  %v291_v24 = vpop.permute.xlu1 %290 }
 0x157   :  { %3524 = vmatpush3.msra.mxu1 %v212_v14  ;;  %3525 = vmatprep.mubr.msk.f32.mxu1 %vm3747_vm0, %v3746_v0 }
 0x158   :  { %3528 = vmatprep.subr.mxu1 %v3746_v0 }
 0x229   :  { %v194_v15 = vpop.f32.mrb[0].mxu1 }
 0x22a   :  { %v198_v16 = vmul.f32 0.25, %v194_v15  ;;  %v3522_v17 = vpop.f32.mrb[1].mxu1 }
 0x22c   :  { %v200_v18 = vsel %vm199_vm3, %v198_v16, -inf }
 0x22d   :  { %201 = vmax.xlane.f32.xlu0 %v200_v18 }
 0x2ba   :  { %v202_v19 = vpop.xlane.xlu0 %201 }
 0x2bb   :  { %v203_v20 = vsub.f32 %v198_v16, %v202_v19 }
 0x2bd   :  { %v204_v21 = vmul.f32 1.442695, %v203_v20  ;;  %v3133_v20 = vld [vmem:[%s4575_s4] ss:$0 sm:$0xff] }
 0x2bf   :  { %3722 = vpow2.f32 %v204_v21 }
 0x2c9   :  { %v3723_v22 = vpop.eup %3722 }
 0x2ca   :  { %v206_v23 = vsel %vm199_vm3, %v3723_v22, 0.0 }
 0x2cb   :  { %207 = vadd.xlane.f32.xlu1 %v206_v23 }
 0x2dc   :  { %288 = vrot.lane.b32.xlu1 %v110_v8, %s3751_s2 }
 0x358   :  { %v208_v25 = vpop.xlane.xlu1 %207 }
 0x359   :  { %3724 = vrcp.f32 %v208_v25 }
 0x35c   :  { %v289_v28 = vpop.permute.xlu1 %288 }
 0x363   :  { %v3725_v26 = vpop.eup %3724 }
 0x364   :  { %v210_v27 = vmul.f32 %v3725_v26, %v3723_v22 }
 0x366   :  { %3526 = vmatmul.mubr.msk.f32.vlgmr.msra.gmra.mrb[2].mxu1 %vm199_vm3, %v210_v27 }
 0x367   :  { %3529 = vmatpush3.xpose.msk.msra.mxu1 %vm123_vm2, %v291_v24  ;;  %3530 = vmatprep.mubr.msk.f32.mxu1 %vm3747_vm0, %v3746_v0 }
 0x368   :  { %3538 = vmatprep.subr.bf16.mxu1 %v3746_v0 }
 0x36a   :  { %3531 = vmatmul.mubr.msk.f32.vlgmr.msra.gmra.mrb[4].mxu1 %vm123_vm2, %v289_v28 }
 0x36b   :  { %3540 = vmatprep.mubr.msk.bf16.mxu1 %vm3747_vm0, %v3746_v0  ;;  %3539 = vmatpush3.bf16.msra.mxu1 %v3593_v40 }
 0x36c   :  { %3550 = vmatprep.subr.mxu1 %v3746_v0 }
 0x439   :  { %v283_v29 = vpop.f32.mrb[2].mxu1 }
 0x43a   :  { %v3527_v30 = vpop.f32.mrb[3].mxu1  ;;  %v287_v46 = vpack.c.bf16 %v283_v29, %v283_v29 }
 0x43d   :  { %v362_v31 = vpop.f32.mrb[4].mxu1 }
 0x43e   :  { %v366_v32 = vmul.f32 0.25, %v362_v31  ;;  %v3532_v33 = vpop.f32.mrb[5].mxu1 }
 0x440   :  { %v367_v34 = vsel %vm199_vm3, %v366_v32, -inf }
 0x441   :  { %368 = vmax.xlane.f32.xlu1 %v367_v34 }
 0x452   :  { %719 = vrot.lane.b32.xlu1 %v3856_v11, %s3751_s2 }
 0x4ce   :  { %v369_v35 = vpop.xlane.xlu1 %368 }
 0x4cf   :  { %v370_v36 = vsub.f32 %v366_v32, %v369_v35 }
 0x4d1   :  { %v371_v37 = vmul.f32 1.442695, %v370_v36 }
 0x4d2   :  { %v720_v56 = vpop.permute.xlu1 %719 }
 0x4d3   :  { %3726 = vpow2.f32 %v371_v37 }
 0x4dd   :  { %v3727_v38 = vpop.eup %3726 }
 0x4de   :  { %v373_v39 = vsel %vm199_vm3, %v3727_v38, 0.0 }
 0x4df   :  { %374 = vadd.xlane.f32.xlu0 %v373_v39 }
 0x4f5   :  { %378 = vrot.lane.b32.xlu0 %v110_v8, %s3752_s19 }
 0x4f9   :  { %554 = vrot.lane.b32.xlu0 %v3856_v11, %s3749_s17 }
 0x4fd   :  { %721 = vrot.lane.b32.xlu0 %v3856_v11, %s3750_s18 }
 0x56c   :  { %v375_v41 = vpop.xlane.xlu0 %374 }
 0x56d   :  { %3728 = vrcp.f32 %v375_v41 }
 0x570   :  { %v379_v42 = vpop.permute.xlu0 %378 }
 0x571   :  { %3534 = vmatpush3.msra.mxu0 %v379_v42 }
 0x572   :  { %3544 = vmatprep.subr.bf16.mxu0 %v3746_v0 }
 0x574   :  { %v555_v50 = vpop.permute.xlu0 %554 }
 0x577   :  { %v3729_v43 = vpop.eup %3728 }
 0x578   :  { %v377_v45 = vmul.f32 %v3729_v43, %v3727_v38  ;;  %v722_v55 = vpop.permute.xlu0 %721 }
 0x57a   :  { %3536 = vmatmul.mubr.msk.f32.vlgmr.msra.gmra.mrb[4].mxu0 %vm199_vm3, %v377_v45 }
 0x57b   :  { %3545 = vmatpush3.bf16.msra.mxu0 %v3893_v44  ;;  %3546 = vmatprep.mubr.msk.bf16.mxu0 %vm3747_vm0, %v3746_v0 }
 0x57c   :  { %3555 = vmatprep.subr.mxu0 %v3746_v0 }
 0x57e   :  { %3547 = vmatmul.mubr.msk.bf16.vlgmr.msra.gmra.mrb[8].mxu0 %vm123_vm2, %v287_v46 }
 0x57f   :  { %3557 = vmatprep.mubr.msk.f32.mxu0 %vm3747_vm0, %v3746_v0 }
 0x64d   :  { %v450_v47 = vpop.f32.mrb[4].mxu0 }
 0x64e   :  { %v454_v48 = vpack.c.bf16 %v450_v47, %v450_v47  ;;  %v3537_v49 = vpop.f32.mrb[5].mxu0 }
 0x650   :  { %3541 = vmatmul.mubr.msk.bf16.vlgmr.msra.gmra.mrb[8].mxu1 %vm123_vm2, %v454_v48 }
 0x651   :  { %3551 = vmatpush3.xpose.msk.msra.mxu1 %vm123_vm2, %v555_v50  ;;  %v547_v51 = vpop.f32.mrb[8].mxu0  ;;  %3552 = vmatprep.mubr.msk.f32.mxu1 %vm3747_vm0, %v3746_v0 }
 0x652   :  { %v3548_v52 = vpop.f32.mrb[9].mxu0  ;;  %3560 = vmatprep.subr.mxu1 %v3746_v0 }
 0x653   :  { %v550_v53 = vpop.f32.mrb[10].mxu0 }
 0x654   :  { %v3549_v54 = vpop.f32.mrb[11].mxu0 }
 0x658   :  { %3553 = vmatmul.mubr.msk.f32.vlgmr.msra.gmra.mrb[6].mxu1 %vm123_vm2, %v3856_v11 }
 0x659   :  { %3561 = vmatpush3.xpose.msk.msra.mxu1 %vm123_vm2, %v722_v55  ;;  %3562 = vmatprep.mubr.msk.f32.mxu1 %vm3747_vm0, %v3746_v0 }
 0x65a   :  { %3570 = vmatprep.subr.bf16.mxu1 %v3746_v0 }
 0x65c   :  { %3563 = vmatmul.mubr.msk.f32.vlgmr.msra.gmra.mrb[12].mxu1 %vm123_vm2, %v720_v56 }
 0x65d   :  { %3571 = vmatpush3.bf16.msra.mxu1 %v3593_v40  ;;  %3572 = vmatprep.mubr.msk.bf16.mxu1 %vm3747_vm0, %v3746_v0 }
 0x723   :  { %v498_v57 = vpop.f32.mrb[8].mxu1 }
 0x724   :  { %v548_v58 = vadd.f32 %v547_v51, %v498_v57  ;;  %v3542_v59 = vpop.f32.mrb[9].mxu1  ;;  %v1029_v57 = vld [vmem:[%s4576_s7] sm:$0xff] }
 0x725   :  { %v501_v60 = vpop.f32.mrb[10].mxu1 }
 0x726   :  { %v3543_v61 = vpop.f32.mrb[11].mxu1  ;;  %v979_v21 = vadd.f32 %v3133_v20, %v548_v58  ;;  %v1037_v58 = vld [vmem:[%s4576_s7 + $0x40] sm:$0xff]  ;;  %v1038_v60 = vld [vmem:[%s4576_s7 + $0x48] sm:$0xff] }
 0x727   :  { %v3137_v59 = vcombine.high %v1029_v57, %v1037_v58  ;;  %v3136_v61 = vcombine.low %v1029_v57, %v1037_v58  ;;  %v1035_v57 = vld [vmem:[%s4576_s7 + $0x30] sm:$0xff] }
 0x728   :  { %v981_v22 = vadd.f32 %v979_v21, %v3839_v3  ;;  %v1043_v58 = vld [vmem:[%s4576_s7 + $0x70] sm:$0xff] }
 0x729   :  { %1308 = vmatprep.subr.bf16.mxu1 %v3137_v59  ;;  %v1044_v59 = vld [vmem:[%s4576_s7 + $0x78] sm:$0xff] }
 0x72a   :  { %v983_v23 = vsel %vm71_vm1, %v981_v22, 0.0 }
 0x72b   :  { %v626_v62 = vpop.f32.mrb[6].mxu1 }
 0x72c   :  { %v630_v63 = vmul.f32 0.25, %v626_v62  ;;  %v3554_v1 = vpop.f32.mrb[7].mxu1 }
 0x72d   :  { %v1045_v1 = vld [vmem:[%s4576_s7 + $0x80] sm:$0xff] }
 0x72e   :  { %v631_v2 = vsel %vm199_vm3, %v630_v63, -inf }
 0x72f   :  { %632 = vmax.xlane.f32.xlu0 %v631_v2  ;;  %v793_v5 = vpop.f32.mrb[12].mxu1  ;;  %v1053_v2 = vld [vmem:[%s4576_s7 + $0xc0] sm:$0xff] }
 0x730   :  { %v797_v6 = vmul.f32 0.25, %v793_v5  ;;  %v3564_v7 = vpop.f32.mrb[13].mxu1  ;;  %v1046_v5 = vld [vmem:[%s4576_s7 + $0x88] sm:$0xff] }
 0x731   :  { %v1054_v7 = vld [vmem:[%s4576_s7 + $0xc8] sm:$0xff] }
 0x732   :  { %v798_v8 = vsel %vm199_vm3, %v797_v6, -inf }
 0x733   :  { %799 = vmax.xlane.f32.xlu1 %v798_v8  ;;  %v3152_v8 = vcombine.low %v1045_v1, %v1053_v2 }
 0x744   :  { %809 = vrot.lane.b32.xlu1 %v3856_v11, %s3752_s19 }
 0x7bc   :  { %v633_v9 = vpop.xlane.xlu0 %632 }
 0x7bd   :  { %v634_v10 = vsub.f32 %v630_v63, %v633_v9  ;;  %v3154_v9 = vcombine.low %v1046_v5, %v1054_v7 }
 0x7bf   :  { %v635_v12 = vmul.f32 1.442695, %v634_v10  ;;  %v3155_v10 = vcombine.high %v1046_v5, %v1054_v7  ;;  %v1052_v5 = vld [vmem:[%s4576_s7 + $0xb8] sm:$0xff]  ;;  %v3148_v7 = vcombine.low %v1035_v57, %v1043_v58 }
 0x7c0   :  { %v800_v13 = vpop.xlane.xlu1 %799 }
 0x7c1   :  { %3730 = vpow2.f32 %v635_v12  ;;  %v801_v14 = vsub.f32 %v797_v6, %v800_v13  ;;  %v3153_v6 = vcombine.high %v1045_v1, %v1053_v2  ;;  %v1031_v12 = vld [vmem:[%s4576_s7 + $0x10] sm:$0xff] }
 0x7c2   :  { %v1039_v13 = vld [vmem:[%s4576_s7 + $0x50] sm:$0xff] }
 0x7c3   :  { %v802_v15 = vmul.f32 1.442695, %v801_v14  ;;  %v1032_v14 = vld [vmem:[%s4576_s7 + $0x18] sm:$0xff]  ;;  %v1051_v1 = vld [vmem:[%s4576_s7 + $0xb0] sm:$0xff] }
 0x7c4   :  { %v810_v28 = vpop.permute.xlu1 %809  ;;  %v1059_v2 = vld [vmem:[%s4576_s7 + $0xf0] sm:$0xff] }
 0x7c5   :  { %3732 = vpow2.f32 %v802_v15  ;;  %v3753_v15 = vmov 0  }
 0x7cb   :  { %v3731_v16 = vpop.eup %3730 }
 0x7cc   :  { %v637_v17 = vsel %vm199_vm3, %v3731_v16, 0.0 }
 0x7cd   :  { %638 = vadd.xlane.f32.xlu0 %v637_v17  ;;  %v1040_v17 = vld [vmem:[%s4576_s7 + $0x58] sm:$0xff] }
 0x7cf   :  { %v3733_v18 = vpop.eup %3732 }
 0x7d0   :  { %v804_v19 = vsel %vm199_vm3, %v3733_v18, 0.0 }
 0x7d1   :  { %805 = vadd.xlane.f32.xlu0 %v804_v19  ;;  %v3142_v19 = vcombine.low %v1032_v14, %v1040_v17 }
 0x7e7   :  { %642 = vrot.lane.b32.xlu0 %v3856_v11, %s3748_s0 }
 0x806   :  { %984 = vadd.xlane.f32.xlu0 %v983_v23 }
 0x85a   :  { %v639_v24 = vpop.xlane.xlu0 %638 }
 0x85b   :  { %3734 = vrcp.f32 %v639_v24 }
 0x85e   :  { %v806_v25 = vpop.xlane.xlu0 %805 }
 0x85f   :  { %3736 = vrcp.f32 %v806_v25 }
 0x862   :  { %v643_v26 = vpop.permute.xlu0 %642 }
 0x863   :  { %3556 = vmatpush3.msra.mxu0 %v643_v26 }
 0x864   :  { %3565 = vmatprep.subr.mxu0 %v3746_v0 }
 0x865   :  { %v3735_v27 = vpop.eup %3734 }
 0x866   :  { %v641_v11 = vmul.f32 %v3735_v27, %v3731_v16  ;;  %v3141_v16 = vcombine.high %v1031_v12, %v1039_v13 }
 0x868   :  { %3558 = vmatmul.mubr.msk.f32.vlgmr.msra.gmra.mrb[6].mxu0 %vm199_vm3, %v641_v11  ;;  %v3134_v11 = vld [vmem:[%s4578_s5] ss:$0 sm:$0xff] }
 0x869   :  { %v3737_v29 = vpop.eup %3736  ;;  %3566 = vmatpush3.msra.mxu0 %v810_v28  ;;  %3567 = vmatprep.mubr.msk.f32.mxu0 %vm3747_vm0, %v3746_v0 }
 0x86a   :  { %v808_v3 = vmul.f32 %v3737_v29, %v3733_v18  ;;  %3576 = vmatprep.subr.bf16.mxu0 %v3746_v0  ;;  %v3140_v18 = vcombine.low %v1031_v12, %v1039_v13  ;;  %v3164_v12 = vcombine.low %v1051_v1, %v1059_v2 }
 0x86c   :  { %3568 = vmatmul.mubr.msk.f32.vlgmr.msra.gmra.mrb[12].mxu0 %vm199_vm3, %v808_v3 }
 0x86d   :  { %3577 = vmatpush3.bf16.msra.mxu0 %v3893_v44  ;;  %3578 = vmatprep.mubr.msk.bf16.mxu0 %vm3747_vm0, %v3746_v0 }
 0x893   :  { %v985_v30 = vpop.xlane.xlu0 %984 }
 0x894   :  { %v990_v31 = vmul.f32 0.03125, %v985_v30 }
 0x896   :  { %v3939_v32 = vsub.f32 %v981_v22, %v990_v31  ;;  %v3135_v31 = vld [vmem:[%s4579_s6] ss:$0 sm:$0xff] }
 0x898   :  { %v994_v33 = vmul.f32 %v3939_v32, %v3939_v32 }
 0x89a   :  { %v996_v34 = vsel %vm71_vm1, %v994_v33, 0.0 }
 0x89b   :  { %997 = vadd.xlane.f32.xlu0 %v996_v34  ;;  %v1047_v34 = vld [vmem:[%s4576_s7 + $0x90] sm:$0xff] }
 0x928   :  { %v998_v21 = vpop.xlane.xlu0 %997 }
 0x929   :  { %v1002_v22 = vmul.f32 0.03125, %v998_v21  ;;  %v3601_v21 = vld [vmem:[%s4577_s9 + $0x88] sm:$0xff]  }
 0x92b   :  { %v1004_v23 = vadd.f32 1e-05, %v1002_v22  ;;  %v3602_v22 = vld [vmem:[%s4577_s9 + $0x50] sm:$0xff]  }
 0x92d   :  { %3738 = vrsqrt.f32 %v1004_v23  ;;  %v3603_v23 = vld [vmem:[%s4577_s9 + $0xd0] sm:$0xff]  }
 0x937   :  { %v3739_v27 = vpop.eup %3738 }
 0x938   :  { %v1008_v28 = vmul.f32 %v3739_v27, %v3939_v32  ;;  %v1048_v32 = vld [vmem:[%s4576_s7 + $0x98] sm:$0xff] }
 0x939   :  { %v3607_v27 = vld [vmem:[%s4577_s9 + $0xd8] sm:$0xff]  }
 0x93a   :  { %v1017_v3 = vmul.f32 %v3134_v11, %v1008_v28  ;;  %v3609_v28 = vld [vmem:[%s4577_s9 + $0x98] sm:$0xff]  }
 0x93b   :  { %v714_v35 = vpop.f32.mrb[6].mxu0 }
 0x93c   :  { %v718_v36 = vpack.c.bf16 %v714_v35, %v714_v35  ;;  %v3559_v37 = vpop.f32.mrb[7].mxu0  ;;  %v1055_v35 = vld [vmem:[%s4576_s7 + $0xd0] sm:$0xff] }
 0x93d   :  { %v4006_v37 = vadd.f32 %v3135_v31, %v1017_v3  ;;  %v3611_v3 = vld [vmem:[%s4577_s9 + $0xe0] sm:$0xff]  }
 0x93e   :  { %3579 = vmatmul.mubr.msk.bf16.vlgmr.msra.gmra.mrb[16].mxu0 %vm123_vm2, %v718_v36  ;;  %v1056_v36 = vld [vmem:[%s4576_s7 + $0xd8] sm:$0xff] }
 0x93f   :  { %v881_v38 = vpop.f32.mrb[12].mxu0  ;;  %1383 = vmatprep.mubr.bf16.mxu0 %v3753_v15 }
 0x940   :  { %v885_v39 = vpack.c.bf16 %v881_v38, %v881_v38  ;;  %v3569_v40 = vpop.f32.mrb[13].mxu0 }
 0x941   :  { %v3157_v40 = vcombine.high %v1047_v34, %v1055_v35 }
 0x942   :  { %3573 = vmatmul.mubr.msk.bf16.vlgmr.msra.gmra.mrb[16].mxu1 %vm123_vm2, %v885_v39 }
 0x943   :  { %1309 = vmatpush1.bf16.msra.mxu1 %v3136_v61  ;;  %1340 = vmatprep.mubr.bf16.mxu1 %v3753_v15 }
 0x944   :  { %1310 = vmatprep.subr.bf16.mxu1 %v3153_v6  ;;  %v1060_v6 = vld [vmem:[%s4576_s7 + $0xf8] sm:$0xff] }
 0x945   :  { %v3166_v13 = vcombine.low %v1052_v5, %v1060_v6 }
 0x947   :  { %1311 = vmatpush1.bf16.msra.mxu1 %v3152_v8 }
 0x948   :  { %1394 = vmatprep.subr.bf16.mxu1 %v3141_v16  ;;  %v3595_v16 = vld [vmem:[%s4577_s9 + $0xc0] sm:$0xff]  }
 0xa11   :  { %v966_v0 = vpop.f32.mrb[16].mxu0 }
 0xa12   :  { %v3580_v41 = vpop.f32.mrb[17].mxu0 }
 0xa13   :  { %v969_v42 = vpop.f32.mrb[18].mxu0  ;;  %v1033_v41 = vld [vmem:[%s4576_s7 + $0x20] sm:$0xff] }
 0xa14   :  { %v3581_v43 = vpop.f32.mrb[19].mxu0  ;;  %v1041_v42 = vld [vmem:[%s4576_s7 + $0x60] sm:$0xff] }
 0xa15   :  { %v923_v44 = vpop.f32.mrb[16].mxu1  ;;  %v1034_v43 = vld [vmem:[%s4576_s7 + $0x28] sm:$0xff] }
 0xa16   :  { %v967_v45 = vadd.f32 %v966_v0, %v923_v44  ;;  %v3574_v46 = vpop.f32.mrb[17].mxu1  ;;  %v3159_v0 = vcombine.high %v1048_v32, %v1056_v36  ;;  %v1042_v44 = vld [vmem:[%s4576_s7 + $0x68] sm:$0xff] }
 0xa17   :  { %v926_v47 = vpop.f32.mrb[18].mxu1  ;;  %v3158_v46 = vcombine.low %v1048_v32, %v1056_v36  ;;  %v3617_v32 = vld [vmem:[%s4577_s9 + $0xa8] sm:$0xff]   ;;  %v3618_v36 = vld [vmem:[%s4577_s9 + $0x70] sm:$0xff]  }
 0xa18   :  { %v980_v48 = vadd.f32 %v3133_v20, %v967_v45  ;;  %v3575_v49 = vpop.f32.mrb[19].mxu1  ;;  %v3143_v20 = vcombine.high %v1032_v14, %v1040_v17  ;;  %v3156_v45 = vcombine.low %v1047_v34, %v1055_v35  ;;  %v3145_v47 = vcombine.high %v1033_v41, %v1041_v42  ;;  %v3594_v14 = vld [vmem:[%s4577_s9 + $0x40] sm:$0xff]   ;;  %v3615_v34 = vld [vmem:[%s4577_s9 + $0xe8] sm:$0xff]  }
 0xa19   :  { %v1049_v49 = vld [vmem:[%s4576_s7 + $0xa0] sm:$0xff]  ;;  %v3616_v35 = vld [vmem:[%s4577_s9 + $0x28] sm:$0xff]  }
 0xa1a   :  { %v982_v50 = vadd.f32 %v980_v48, %v3844_v4  ;;  %v1030_v4 = vld [vmem:[%s4576_s7 + $0x8] sm:$0xff]  ;;  %v3147_v48 = vcombine.high %v1034_v43, %v1042_v44  ;;  %v3596_v17 = vld [vmem:[%s4577_s9] sm:$0xff]  }
 0xa1b   :  { %v3138_v62 = vcombine.low %v1030_v4, %v1038_v60  ;;  %v3139_v63 = vcombine.high %v1030_v4, %v1038_v60  ;;  %v1036_v4 = vld [vmem:[%s4576_s7 + $0x38] sm:$0xff] }
 0xa1c   :  { %v986_v51 = vsel %vm71_vm1, %v982_v50, 0.0  ;;  %v3150_v8 = vcombine.low %v1036_v4, %v1044_v59 }
 0xa1d   :  { %987 = vadd.xlane.f32.xlu1 %v986_v51  ;;  %1351 = vmatprep.subr.bf16.mxu0 %v3139_v63  ;;  %v1050_v51 = vld [vmem:[%s4576_s7 + $0xa8] sm:$0xff]  ;;  %v3151_v63 = vcombine.high %v1036_v4, %v1044_v59 }
 0xa1e   :  { %1352 = vmatpush1.bf16.msra.mxu0 %v3138_v62  ;;  %v3149_v62 = vcombine.high %v1035_v57, %v1043_v58 }
 0xa1f   :  { %1353 = vmatprep.subr.bf16.mxu0 %v3155_v10  ;;  %v3167_v10 = vcombine.high %v1052_v5, %v1060_v6 }
 0xa22   :  { %1354 = vmatpush1.bf16.msra.mxu0 %v3154_v9  ;;  %v3165_v9 = vcombine.high %v1051_v1, %v1059_v2 }
 0xa23   :  { %1437 = vmatprep.subr.bf16.mxu0 %v3143_v20  ;;  %v3600_v20 = vld [vmem:[%s4577_s9 + $0x8] sm:$0xff]  }
 0xaaa   :  { %v988_v52 = vpop.xlane.xlu1 %987 }
 0xaab   :  { %v991_v53 = vmul.f32 0.03125, %v988_v52  ;;  %v1058_v52 = vld [vmem:[%s4576_s7 + $0xe8] sm:$0xff] }
 0xaac   :  { %v3162_v61 = vcombine.low %v1050_v51, %v1058_v52 }
 0xaad   :  { %v993_v54 = vsub.f32 %v982_v50, %v991_v53  ;;  %v1057_v50 = vld [vmem:[%s4576_s7 + $0xe0] sm:$0xff]  ;;  %v3144_v53 = vcombine.low %v1033_v41, %v1041_v42  ;;  %v3622_v41 = vld [vmem:[%s4577_s9 + $0x78] sm:$0xff]  }
 0xaae   :  { %v3160_v60 = vcombine.low %v1049_v49, %v1057_v50  ;;  %v3623_v42 = vld [vmem:[%s4577_s9 + $0xf8] sm:$0xff]  }
 0xaaf   :  { %v995_v55 = vmul.f32 %v993_v54, %v993_v54 }
 0xab1   :  { %v999_v56 = vsel %vm71_vm1, %v995_v55, 0.0  ;;  %v3161_v55 = vcombine.high %v1049_v49, %v1057_v50  ;;  %v4192_v50 = vld [vmem:[%s4580_s8 + $0x8] sm:$0xff] }
 0xab2   :  { %1000 = vadd.xlane.f32.xlu0 %v999_v56  ;;  %v3163_v56 = vcombine.high %v1050_v51, %v1058_v52 }
 0xb3f   :  { %v1001_v24 = vpop.xlane.xlu0 %1000 }
 0xb40   :  { %v1003_v25 = vmul.f32 0.03125, %v1001_v24  ;;  %v3604_v24 = vld [vmem:[%s4577_s9 + $0x10] sm:$0xff]  }
 0xb42   :  { %v1005_v26 = vadd.f32 1e-05, %v1003_v25  ;;  %v3605_v25 = vld [vmem:[%s4577_s9 + $0x90] sm:$0xff]  }
 0xb44   :  { %3740 = vrsqrt.f32 %v1005_v26  ;;  %v3606_v26 = vld [vmem:[%s4577_s9 + $0x58] sm:$0xff]  }
 0xb4e   :  { %v3741_v29 = vpop.eup %3740 }
 0xb4f   :  { %v1009_v30 = vmul.f32 %v3741_v29, %v993_v54  ;;  %v3146_v54 = vcombine.low %v1034_v43, %v1042_v44  ;;  %v3610_v29 = vld [vmem:[%s4577_s9 + $0x60] sm:$0xff]   ;;  %v3624_v43 = vld [vmem:[%s4577_s9 + $0x38] sm:$0xff]  }
 0xb50   :  { %v3625_v44 = vld [vmem:[%s4577_s9 + $0xb8] sm:$0xff]  }
 0xb51   :  { %v1018_v33 = vmul.f32 %v3134_v11, %v1009_v30  ;;  %v3608_v11 = vld [vmem:[%s4577_s9 + $0x18] sm:$0xff]   ;;  %v3612_v30 = vld [vmem:[%s4577_s9 + $0x20] sm:$0xff]  }
 0xb53   :  { %v4008_v38 = vadd.f32 %v3135_v31, %v1018_v33  ;;  %v3613_v31 = vld [vmem:[%s4577_s9 + $0xa0] sm:$0xff]   ;;  %v3614_v33 = vld [vmem:[%s4577_s9 + $0x68] sm:$0xff]  }
 0xb55   :  { %v4012_v39 = vpack.c.bf16 %v4008_v38, %v4006_v37 }
 0xb57   :  { %3168 = vmatmul.mubr.msk.bf16.vlgmr.msra.gmra.mrb[20].mxu1 %vm71_vm1, %v4012_v39  ;;  %3169 = vmatmul.mubr.msk.bf16.vlgmr.msra.gmra.mrb[20].mxu0 %vm71_vm1, %v4012_v39 }
 0xb58   :  { %1395 = vmatpush1.bf16.msra.mxu1 %v3140_v18  ;;  %1438 = vmatpush1.bf16.msra.mxu0 %v3142_v19  ;;  %v3597_v18 = vld [vmem:[%s4577_s9 + $0x80] sm:$0xff]   ;;  %v3598_v19 = vld [vmem:[%s4577_s9 + $0x48] sm:$0xff]  }
 0xb59   :  { %1396 = vmatprep.subr.bf16.mxu1 %v3157_v40  ;;  %1439 = vmatprep.subr.bf16.mxu0 %v3159_v0  ;;  %v3620_v40 = vld [vmem:[%s4577_s9 + $0x30] sm:$0xff]  }
 0xb5a   :  { %1426 = vmatprep.mubr.bf16.mxu1 %v3753_v15  ;;  %1469 = vmatprep.mubr.bf16.mxu0 %v3753_v15  ;;  %v3621_v0 = vld [vmem:[%s4577_s9 + $0xb0] sm:$0xff]  }
 0xb5c   :  { %1397 = vmatpush1.bf16.msra.mxu1 %v3156_v45  ;;  %1440 = vmatpush1.bf16.msra.mxu0 %v3158_v46  ;;  %v3626_v45 = vld [vmem:[%s4577_s9 + $0x140] sm:$0xff]  }
 0xb5d   :  { %1480 = vmatprep.subr.bf16.mxu1 %v3145_v47  ;;  %1523 = vmatprep.subr.bf16.mxu0 %v3147_v48  ;;  %v3627_v46 = vld [vmem:[%s4577_s9 + $0x1c0] sm:$0xff]   ;;  %v1065_v47 = vlaneseq }
 0xb5f   :  { %3170 = vmatmul.mubr.msk.bf16.vlgmr.msra.gmra.mrb[24].mxu1 %vm71_vm1, %v4012_v39  ;;  %3171 = vmatmul.mubr.msk.bf16.vlgmr.msra.gmra.mrb[24].mxu0 %vm71_vm1, %v4012_v39  ;;  %v4186_v48 = vshrl.u32 %v1065_v47, 7 }
 0xb60   :  { %1481 = vmatpush1.bf16.msra.mxu1 %v3144_v53  ;;  %1524 = vmatpush1.bf16.msra.mxu0 %v3146_v54  ;;  %v1061_v54 = vld [vmem:[%s4580_s8] sm:$0xff] }
 0xb61   :  { %1482 = vmatprep.subr.bf16.mxu1 %v3161_v55  ;;  %1525 = vmatprep.subr.bf16.mxu0 %v3163_v56  ;;  %v1091_v49 = vsub.s32 6, %v4186_v48  ;;  %v1067_v52 = vsub.s32 0, %v4186_v48  ;;  %v1075_v53 = vsub.s32 2, %v4186_v48  ;;  %v1071_v55 = vsub.s32 1, %v4186_v48 }
 0xb62   :  { %1512 = vmatprep.mubr.bf16.mxu1 %v3753_v15  ;;  %1555 = vmatprep.mubr.bf16.mxu0 %v3753_v15  ;;  %v1079_v56 = vsub.s32 3, %v4186_v48  ;;  %v1095_v1 = vsub.s32 7, %v4186_v48 }
 0xb63   :  { %v4195_v51 = vrot.slane %v4192_v50, %v1091_v49  ;;  %v1068_v57 = vrot.slane %v1061_v54, %v1067_v52  ;;  %v1076_v58 = vrot.slane %v1061_v54, %v1075_v53  ;;  %v1072_v4 = vrot.slane %v1061_v54, %v1071_v55 }
 0xb64   :  { %1483 = vmatpush1.bf16.msra.mxu1 %v3160_v60  ;;  %1526 = vmatpush1.bf16.msra.mxu0 %v3162_v61  ;;  %v1080_v59 = vrot.slane %v1061_v54, %v1079_v56  ;;  %v1083_v60 = vsub.s32 4, %v4186_v48 }
 0xb65   :  { %1566 = vmatprep.subr.bf16.mxu1 %v3149_v62  ;;  %1609 = vmatprep.subr.bf16.mxu0 %v3151_v63  ;;  %v1087_v63 = vsub.s32 5, %v4186_v48 }
 0xb67   :  { %3172 = vmatmul.mubr.msk.bf16.vlgmr.msra.gmra.mrb[28].mxu1 %vm71_vm1, %v4012_v39  ;;  %3173 = vmatmul.mubr.msk.bf16.vlgmr.msra.gmra.mrb[28].mxu0 %vm71_vm1, %v4012_v39 }
 0xb68   :  { %1567 = vmatpush1.bf16.msra.mxu1 %v3148_v7  ;;  %1610 = vmatpush1.bf16.msra.mxu0 %v3150_v8 }
 0xb69   :  { %1568 = vmatprep.subr.bf16.mxu1 %v3165_v9  ;;  %1611 = vmatprep.subr.bf16.mxu0 %v3167_v10 }
 0xb6a   :  { %1598 = vmatprep.mubr.bf16.mxu1 %v3753_v15  ;;  %1641 = vmatprep.mubr.bf16.mxu0 %v3753_v15  ;;  %v3599_v15 = vld [vmem:[%s4577_s9 + $0xc8] sm:$0xff]  }
 0xb6c   :  { %1569 = vmatpush1.bf16.msra.mxu1 %v3164_v12  ;;  %1612 = vmatpush1.bf16.msra.mxu0 %v3166_v13 }
 0xb6d   :  { %3334 = vmatprep.subr.bf16.mxu1 %v3594_v14  ;;  %3356 = vmatprep.subr.bf16.mxu0 %v3595_v16 }
 0xb6f   :  { %3174 = vmatmul.mubr.msk.bf16.vlgmr.msra.gmra.mrb[32].mxu1 %vm71_vm1, %v4012_v39  ;;  %3175 = vmatmul.mubr.msk.bf16.vlgmr.msra.gmra.mrb[32].mxu0 %vm71_vm1, %v4012_v39  ;;  %v3619_v39 = vld [vmem:[%s4577_s9 + $0xf0] sm:$0xff]  }
 0xb70   :  { %3335 = vmatpush3.bf16.msra.mxu1 %v3596_v17  ;;  %3357 = vmatpush3.bf16.msra.mxu0 %v3597_v18  ;;  %v1084_v18 = vrot.slane %v1061_v54, %v1083_v60 }
 0xb71   :  { %3336 = vmatprep.subr.bf16.mxu1 %v3598_v19  ;;  %3358 = vmatprep.subr.bf16.mxu0 %v3599_v15  ;;  %v1092_v19 = vrot.slane %v1061_v54, %v1091_v49 }
 0xb74   :  { %3337 = vmatpush3.bf16.msra.mxu1 %v3600_v20  ;;  %3359 = vmatpush3.bf16.msra.mxu0 %v3601_v21  ;;  %v1088_v21 = vrot.slane %v1061_v54, %v1087_v63 }
 0xb75   :  { %3338 = vmatprep.subr.bf16.mxu1 %v3602_v22  ;;  %3360 = vmatprep.subr.bf16.mxu0 %v3603_v23  ;;  %v1096_v22 = vrot.slane %v1061_v54, %v1095_v1  ;;  %v1108_v54 = vrot.slane %v4192_v50, %v1075_v53  ;;  %v3633_v53 = vld [vmem:[%s4577_s9 + $0x188] sm:$0xff]  }
 0xb78   :  { %3339 = vmatpush3.bf16.msra.mxu1 %v3604_v24  ;;  %3361 = vmatpush3.bf16.msra.mxu0 %v3605_v25 }
 0xb79   :  { %3340 = vmatprep.subr.bf16.mxu1 %v3606_v26  ;;  %3362 = vmatprep.subr.bf16.mxu0 %v3607_v27 }
 0xb7c   :  { %3341 = vmatpush3.bf16.msra.mxu1 %v3608_v11  ;;  %3363 = vmatpush3.bf16.msra.mxu0 %v3609_v28 }
 0xb7d   :  { %3342 = vmatprep.subr.bf16.mxu1 %v3610_v29  ;;  %3364 = vmatprep.subr.bf16.mxu0 %v3611_v3 }
 0xb80   :  { %3343 = vmatpush3.bf16.msra.mxu1 %v3612_v30  ;;  %3365 = vmatpush3.bf16.msra.mxu0 %v3613_v31 }
 0xb81   :  { %3344 = vmatprep.subr.bf16.mxu1 %v3614_v33  ;;  %3366 = vmatprep.subr.bf16.mxu0 %v3615_v34 }
 0xb84   :  { %3345 = vmatpush3.bf16.msra.mxu1 %v3616_v35  ;;  %3367 = vmatpush3.bf16.msra.mxu0 %v3617_v32  ;;  %v3628_v32 = vld [vmem:[%s4577_s9 + $0x100] sm:$0xff]  }
 0xb85   :  { %3346 = vmatprep.subr.bf16.mxu1 %v3618_v36  ;;  %3368 = vmatprep.subr.bf16.mxu0 %v3619_v39  ;;  %v3629_v36 = vld [vmem:[%s4577_s9 + $0x180] sm:$0xff]  }
 0xb88   :  { %3347 = vmatpush3.bf16.msra.mxu1 %v3620_v40  ;;  %3369 = vmatpush3.bf16.msra.mxu0 %v3621_v0 }
 0xb89   :  { %3348 = vmatprep.subr.bf16.mxu1 %v3622_v41  ;;  %3370 = vmatprep.subr.bf16.mxu0 %v3623_v42  ;;  %v3630_v42 = vld [vmem:[%s4577_s9 + $0x148] sm:$0xff]  }
 0xb8c   :  { %3349 = vmatpush3.bf16.msra.mxu1 %v3624_v43  ;;  %3371 = vmatpush3.bf16.msra.mxu0 %v3625_v44  ;;  %v3631_v43 = vld [vmem:[%s4577_s9 + $0x1c8] sm:$0xff]   ;;  %v1100_v44 = vrot.slane %v4192_v50, %v1067_v52 }
 0xb8d   :  { %3378 = vmatprep.subr.bf16.mxu1 %v3626_v45  ;;  %3400 = vmatprep.subr.bf16.mxu0 %v3627_v46 }
 0xc2a   :  { %v1342_v61 = vpop.f32.mrb[20].mxu1  ;;  %v1385_v62 = vpop.f32.mrb[20].mxu0 }
 0xc2b   :  { %v1343_v2 = vadd.f32 %v1342_v61, %v1068_v57  ;;  %v1386_v5 = vadd.f32 %v1385_v62, %v1076_v58  ;;  %v1344_v6 = vpop.f32.mrb[21].mxu1  ;;  %v1387_v7 = vpop.f32.mrb[21].mxu0  ;;  %v1104_v61 = vrot.slane %v4192_v50, %v1071_v55 }
 0xc2c   :  { %v1345_v8 = vadd.f32 %v1344_v6, %v1072_v4  ;;  %v1388_v9 = vadd.f32 %v1387_v7, %v1080_v59  ;;  %v1346_v10 = vpop.f32.mrb[22].mxu1  ;;  %v1389_v12 = vpop.f32.mrb[22].mxu0 }
 0xc2d   :  { %v1347_v13 = vadd.f32 %v1346_v10, %v1068_v57  ;;  %v1390_v14 = vadd.f32 %v1389_v12, %v1076_v58  ;;  %v1348_v16 = vpop.f32.mrb[23].mxu1  ;;  %v1391_v17 = vpop.f32.mrb[23].mxu0  ;;  %v1652_v23 = vmax.f32 %v1343_v2, 0.0  ;;  %v1654_v24 = vmax.f32 %v1386_v5, 0.0  ;;  %v3632_v2 = vld [vmem:[%s4577_s9 + $0x108] sm:$0xff]   ;;  %v3635_v10 = vld [vmem:[%s4577_s9 + $0x1d0] sm:$0xff]  }
 0xc2e   :  { %v1349_v15 = vadd.f32 %v1348_v16, %v1072_v4  ;;  %v1392_v20 = vadd.f32 %v1391_v17, %v1080_v59  ;;  %v1653_v27 = vmax.f32 %v1345_v8, 0.0  ;;  %v1655_v11 = vmax.f32 %v1388_v9, 0.0  ;;  %v3634_v9 = vld [vmem:[%s4577_s9 + $0x150] sm:$0xff]  }
 0xc2f   :  { %v1668_v25 = vmax.f32 %v1347_v13, 0.0  ;;  %v1670_v26 = vmax.f32 %v1390_v14, 0.0  ;;  %v1112_v5 = vrot.slane %v4192_v50, %v1079_v56 }
 0xc30   :  { %v1669_v28 = vmax.f32 %v1349_v15, 0.0  ;;  %v1671_v29 = vmax.f32 %v1392_v20, 0.0 }
 0xc31   :  { %v1684_v3 = vpack.c.bf16 %v1668_v25, %v1652_v23  ;;  %v1686_v30 = vpack.c.bf16 %v1670_v26, %v1654_v24 }
 0xc32   :  { %v1685_v31 = vpack.c.bf16 %v1669_v28, %v1653_v27  ;;  %v1687_v33 = vpack.c.bf16 %v1671_v29, %v1655_v11  ;;  %v1428_v34 = vpop.f32.mrb[24].mxu1  ;;  %v1471_v35 = vpop.f32.mrb[24].mxu0  ;;  %v3638_v27 = vld [vmem:[%s4577_s9 + $0x158] sm:$0xff]  }
 0xc33   :  { %v1429_v39 = vadd.f32 %v1428_v34, %v1084_v18  ;;  %v1472_v40 = vadd.f32 %v1471_v35, %v1092_v19  ;;  %v1430_v0 = vpop.f32.mrb[25].mxu1  ;;  %v1473_v41 = vpop.f32.mrb[25].mxu0  ;;  %v3639_v11 = vld [vmem:[%s4577_s9 + $0x1d8] sm:$0xff]  }
 0xc34   :  { %v1431_v45 = vadd.f32 %v1430_v0, %v1088_v21  ;;  %v1474_v46 = vadd.f32 %v1473_v41, %v1096_v22  ;;  %v1432_v47 = vpop.f32.mrb[26].mxu1  ;;  %v1475_v49 = vpop.f32.mrb[26].mxu0  ;;  %2763 = vmatprep.mubr.bf16.mxu1 %v1685_v31  ;;  %2804 = vmatprep.mubr.bf16.mxu0 %v1687_v33  ;;  %v3640_v0 = vld [vmem:[%s4577_s9 + $0x118] sm:$0xff]  }
 0xc35   :  { %v1433_v57 = vadd.f32 %v1432_v47, %v1084_v18  ;;  %v1476_v58 = vadd.f32 %v1475_v49, %v1092_v19  ;;  %v1434_v4 = vpop.f32.mrb[27].mxu1  ;;  %v1477_v59 = vpop.f32.mrb[27].mxu0  ;;  %2764 = vmatmul.mubr.bf16.vlgmr.msra.gmra.mrb[36].mxu1 %v1684_v3  ;;  %2805 = vmatmul.mubr.bf16.vlgmr.msra.gmra.mrb[36].mxu0 %v1686_v30  ;;  %v1656_v6 = vmax.f32 %v1429_v39, 0.0  ;;  %v1658_v7 = vmax.f32 %v1472_v40, 0.0  ;;  %v3641_v41 = vld [vmem:[%s4577_s9 + $0x198] sm:$0xff]  }
 0xc36   :  { %v1435_v62 = vadd.f32 %v1434_v4, %v1088_v21  ;;  %v1478_v52 = vadd.f32 %v1477_v59, %v1096_v22  ;;  %3379 = vmatpush3.bf16.msra.mxu1 %v3628_v32  ;;  %3401 = vmatpush3.bf16.msra.mxu0 %v3629_v36  ;;  %v1657_v12 = vmax.f32 %v1431_v45, 0.0  ;;  %v1659_v13 = vmax.f32 %v1474_v46, 0.0  ;;  %v3636_v21 = vld [vmem:[%s4577_s9 + $0x110] sm:$0xff]   ;;  %v3642_v45 = vld [vmem:[%s4577_s9 + $0x160] sm:$0xff]  }
 0xc37   :  { %v1672_v8 = vmax.f32 %v1433_v57, 0.0  ;;  %v1674_v55 = vmax.f32 %v1476_v58, 0.0  ;;  %3380 = vmatprep.subr.bf16.mxu1 %v3630_v42  ;;  %3402 = vmatprep.subr.bf16.mxu0 %v3631_v43  ;;  %v3637_v22 = vld [vmem:[%s4577_s9 + $0x190] sm:$0xff]   ;;  %v1116_v32 = vrot.slane %v4192_v50, %v1083_v60  ;;  %v1120_v36 = vrot.slane %v4192_v50, %v1087_v63  ;;  %v3643_v46 = vld [vmem:[%s4577_s9 + $0x1e0] sm:$0xff]  }
 0xc38   :  { %v1673_v14 = vmax.f32 %v1435_v62, 0.0  ;;  %v1675_v16 = vmax.f32 %v1478_v52, 0.0  ;;  %v1128_v60 = vrot.slane %v4192_v50, %v1095_v1  ;;  %v3645_v62 = vld [vmem:[%s4577_s9 + $0x1a0] sm:$0xff]  }
 0xc39   :  { %v4249_v17 = vpack.c.bf16 %v1672_v8, %v1656_v6  ;;  %v4251_v56 = vpack.c.bf16 %v1674_v55, %v1658_v7  ;;  %v3646_v6 = vld [vmem:[%s4577_s9 + $0x168] sm:$0xff]  }
 0xc3a   :  { %v1689_v18 = vpack.c.bf16 %v1673_v14, %v1657_v12  ;;  %v1691_v19 = vpack.c.bf16 %v1675_v16, %v1659_v13  ;;  %3381 = vmatpush3.bf16.msra.mxu1 %v3632_v2  ;;  %3403 = vmatpush3.bf16.msra.mxu0 %v3633_v53  ;;  %v1514_v15 = vpop.f32.mrb[28].mxu1  ;;  %v1557_v20 = vpop.f32.mrb[28].mxu0  ;;  %v3647_v7 = vld [vmem:[%s4577_s9 + $0x1e8] sm:$0xff]  }
 0xc3b   :  { %v1515_v23 = vadd.f32 %v1514_v15, %v1100_v44  ;;  %v1558_v24 = vadd.f32 %v1557_v20, %v1108_v54  ;;  %v1516_v25 = vpop.f32.mrb[29].mxu1  ;;  %v1559_v26 = vpop.f32.mrb[29].mxu0  ;;  %3382 = vmatprep.subr.bf16.mxu1 %v3634_v9  ;;  %3404 = vmatprep.subr.bf16.mxu0 %v3635_v10  ;;  %v3648_v15 = vld [vmem:[%s4577_s9 + $0x128] sm:$0xff]  }
 0xc3c   :  { %v1517_v28 = vadd.f32 %v1516_v25, %v1104_v61  ;;  %v1560_v29 = vadd.f32 %v1559_v26, %v1112_v5  ;;  %v1518_v3 = vpop.f32.mrb[30].mxu1  ;;  %v1561_v30 = vpop.f32.mrb[30].mxu0  ;;  %2845 = vmatprep.mubr.bf16.mxu1 %v1689_v18  ;;  %2886 = vmatprep.mubr.bf16.mxu0 %v1691_v19  ;;  %v3649_v20 = vld [vmem:[%s4577_s9 + $0x1a8] sm:$0xff]   ;;  %v3651_v25 = vld [vmem:[%s4577_s9 + $0x1f0] sm:$0xff]  }
 0xc3d   :  { %v1519_v31 = vadd.f32 %v1518_v3, %v1100_v44  ;;  %v1562_v33 = vadd.f32 %v1561_v30, %v1108_v54  ;;  %v1520_v34 = vpop.f32.mrb[31].mxu1  ;;  %v1563_v35 = vpop.f32.mrb[31].mxu0  ;;  %v1660_v42 = vmax.f32 %v1515_v23, 0.0  ;;  %v1662_v43 = vmax.f32 %v1558_v24, 0.0 }
 0xc3e   :  { %v1521_v39 = vadd.f32 %v1520_v34, %v1104_v61  ;;  %v1564_v40 = vadd.f32 %v1563_v35, %v1112_v5  ;;  %3383 = vmatpush3.bf16.msra.mxu1 %v3636_v21  ;;  %3405 = vmatpush3.bf16.msra.mxu0 %v3637_v22  ;;  %v1661_v47 = vmax.f32 %v1517_v28, 0.0  ;;  %v1663_v49 = vmax.f32 %v1560_v29, 0.0  ;;  %v3644_v61 = vld [vmem:[%s4577_s9 + $0x120] sm:$0xff]   ;;  %v3653_v34 = vld [vmem:[%s4577_s9 + $0x1b0] sm:$0xff]   ;;  %v3654_v35 = vld [vmem:[%s4577_s9 + $0x178] sm:$0xff]  }
 0xc3f   :  { %v1676_v44 = vmax.f32 %v1519_v31, 0.0  ;;  %v1678_v63 = vmax.f32 %v1562_v33, 0.0  ;;  %3384 = vmatprep.subr.bf16.mxu1 %v3638_v27  ;;  %3406 = vmatprep.subr.bf16.mxu0 %v3639_v11  ;;  %v3652_v33 = vld [vmem:[%s4577_s9 + $0x130] sm:$0xff]  }
 0xc40   :  { %v1677_v54 = vmax.f32 %v1521_v39, 0.0  ;;  %v1679_v48 = vmax.f32 %v1564_v40, 0.0  ;;  %v3657_v39 = vld [vmem:[%s4577_s9 + $0x1b8] sm:$0xff]   ;;  %v3658_v40 = vld [vmem:[%s4577_s9 + $0x240] sm:$0xff]  }
 0xc41   :  { %v4286_v57 = vpack.c.bf16 %v1676_v44, %v1660_v42  ;;  %v4288_v50 = vpack.c.bf16 %v1678_v63, %v1662_v43  ;;  %v3662_v42 = vld [vmem:[%s4577_s9 + $0x248] sm:$0xff]  }
 0xc42   :  { %v4290_v1 = vpack.c.bf16 %v1677_v54, %v1661_v47  ;;  %v4292_v58 = vpack.c.bf16 %v1679_v48, %v1663_v49  ;;  %3385 = vmatpush3.bf16.msra.mxu1 %v3640_v0  ;;  %3407 = vmatpush3.bf16.msra.mxu0 %v3641_v41  ;;  %v1600_v4 = vpop.f32.mrb[32].mxu1  ;;  %v1643_v59 = vpop.f32.mrb[32].mxu0  ;;  %v3659_v0 = vld [vmem:[%s4577_s9 + $0x2c0] sm:$0xff]   ;;  %v3663_v43 = vld [vmem:[%s4577_s9 + $0x2c8] sm:$0xff]   ;;  %v3670_v47 = vld [vmem:[%s4577_s9 + $0x258] sm:$0xff]  }
 0xc43   :  { %v1601_v52 = vadd.f32 %v1600_v4, %v1116_v32  ;;  %v1644_v2 = vadd.f32 %v1643_v59, %v4195_v51  ;;  %v1602_v53 = vpop.f32.mrb[33].mxu1  ;;  %v1645_v5 = vpop.f32.mrb[33].mxu0  ;;  %3386 = vmatprep.subr.bf16.mxu1 %v3642_v45  ;;  %3408 = vmatprep.subr.bf16.mxu0 %v3643_v46  ;;  %v3660_v41 = vld [vmem:[%s4577_s9 + $0x200] sm:$0xff]   ;;  %v3664_v44 = vld [vmem:[%s4577_s9 + $0x208] sm:$0xff]   ;;  %v3668_v45 = vld [vmem:[%s4577_s9 + $0x210] sm:$0xff]  }
 0xc44   :  { %v1603_v8 = vadd.f32 %v1602_v53, %v1120_v36  ;;  %v1646_v55 = vadd.f32 %v1645_v5, %v1128_v60  ;;  %v1604_v9 = vpop.f32.mrb[34].mxu1  ;;  %v1647_v10 = vpop.f32.mrb[34].mxu0  ;;  %v3665_v63 = vld [vmem:[%s4577_s9 + $0x288] sm:$0xff]   ;;  %v3669_v46 = vld [vmem:[%s4577_s9 + $0x290] sm:$0xff]   ;;  %v3671_v49 = vld [vmem:[%s4577_s9 + $0x2d8] sm:$0xff]  }
 0xc45   :  { %v1605_v12 = vadd.f32 %v1604_v9, %v1116_v32  ;;  %v1648_v13 = vadd.f32 %v1647_v10, %v4195_v51  ;;  %v1606_v14 = vpop.f32.mrb[35].mxu1  ;;  %v1649_v16 = vpop.f32.mrb[35].mxu0  ;;  %v1664_v21 = vmax.f32 %v1601_v52, 0.0  ;;  %v1666_v22 = vmax.f32 %v1644_v2, 0.0  ;;  %v3650_v51 = vld [vmem:[%s4577_s9 + $0x170] sm:$0xff]   ;;  %v3655_v32 = vld [vmem:[%s4577_s9 + $0x1f8] sm:$0xff]  }
 0xc46   :  { %v1607_v18 = vadd.f32 %v1606_v14, %v1120_v36  ;;  %v1650_v19 = vadd.f32 %v1649_v16, %v1128_v60  ;;  %3387 = vmatpush3.bf16.msra.mxu1 %v3644_v61  ;;  %3409 = vmatpush3.bf16.msra.mxu0 %v3645_v62  ;;  %v1665_v26 = vmax.f32 %v1603_v8, 0.0  ;;  %v1667_v27 = vmax.f32 %v1646_v55, 0.0  ;;  %v3656_v36 = vld [vmem:[%s4577_s9 + $0x138] sm:$0xff]   ;;  %v3661_v60 = vld [vmem:[%s4577_s9 + $0x280] sm:$0xff]   ;;  %v3678_v61 = vld [vmem:[%s4577_s9 + $0x268] sm:$0xff]  }
 0xc47   :  { %v1680_v23 = vmax.f32 %v1605_v12, 0.0  ;;  %v1682_v24 = vmax.f32 %v1648_v13, 0.0  ;;  %3388 = vmatprep.subr.bf16.mxu1 %v3646_v6  ;;  %3410 = vmatprep.subr.bf16.mxu0 %v3647_v7  ;;  %v3672_v54 = vld [vmem:[%s4577_s9 + $0x218] sm:$0xff]   ;;  %v3676_v4 = vld [vmem:[%s4577_s9 + $0x220] sm:$0xff]   ;;  %v3679_v62 = vld [vmem:[%s4577_s9 + $0x2e8] sm:$0xff]  }
 0xc48   :  { %v1681_v11 = vmax.f32 %v1607_v18, 0.0  ;;  %v1683_v28 = vmax.f32 %v1650_v19, 0.0  ;;  %v3673_v48 = vld [vmem:[%s4577_s9 + $0x298] sm:$0xff]   ;;  %v3677_v59 = vld [vmem:[%s4577_s9 + $0x2a0] sm:$0xff]   ;;  %v3680_v52 = vld [vmem:[%s4577_s9 + $0x228] sm:$0xff]  }
 0xc49   :  { %v4320_v29 = vpack.c.bf16 %v1680_v23, %v1664_v21  ;;  %v4322_v3 = vpack.c.bf16 %v1682_v24, %v1666_v22  ;;  %v3681_v2 = vld [vmem:[%s4577_s9 + $0x2a8] sm:$0xff]   ;;  %v3682_v53 = vld [vmem:[%s4577_s9 + $0x270] sm:$0xff]   ;;  %v3686_v8 = vld [vmem:[%s4577_s9 + $0x278] sm:$0xff]  }
 0xc4a   :  { %v4324_v30 = vpack.c.bf16 %v1681_v11, %v1665_v26  ;;  %v4326_v31 = vpack.c.bf16 %v1683_v28, %v1667_v27  ;;  %3389 = vmatpush3.bf16.msra.mxu1 %v3648_v15  ;;  %3411 = vmatpush3.bf16.msra.mxu0 %v3649_v20  ;;  %v3683_v5 = vld [vmem:[%s4577_s9 + $0x2f0] sm:$0xff]   ;;  %v3687_v55 = vld [vmem:[%s4577_s9 + $0x2f8] sm:$0xff]   ;;  %v3690_v12 = vld [vmem:[%s4577_s9 + $0x340] sm:$0xff]  }
 0xc4b   :  { %3390 = vmatprep.subr.bf16.mxu1 %v3650_v51  ;;  %3412 = vmatprep.subr.bf16.mxu0 %v3651_v25  ;;  %v3684_v6 = vld [vmem:[%s4577_s9 + $0x230] sm:$0xff]   ;;  %v3688_v9 = vld [vmem:[%s4577_s9 + $0x238] sm:$0xff]   ;;  %v3691_v13 = vld [vmem:[%s4577_s9 + $0x3c0] sm:$0xff]  }
 0xc4c   :  { %v3685_v7 = vld [vmem:[%s4577_s9 + $0x2b0] sm:$0xff]   ;;  %v3689_v10 = vld [vmem:[%s4577_s9 + $0x2b8] sm:$0xff]   ;;  %v3692_v14 = vld [vmem:[%s4577_s9 + $0x300] sm:$0xff]  }
 0xc4d   :  { %v3693_v16 = vld [vmem:[%s4577_s9 + $0x380] sm:$0xff]   ;;  %v3694_v18 = vld [vmem:[%s4577_s9 + $0x348] sm:$0xff]   ;;  %v3700_v21 = vld [vmem:[%s4577_s9 + $0x310] sm:$0xff]  }
 0xc4e   :  { %3391 = vmatpush3.bf16.msra.mxu1 %v3652_v33  ;;  %3413 = vmatpush3.bf16.msra.mxu0 %v3653_v34  ;;  %v3695_v19 = vld [vmem:[%s4577_s9 + $0x3c8] sm:$0xff]   ;;  %v3701_v22 = vld [vmem:[%s4577_s9 + $0x390] sm:$0xff]   ;;  %v3702_v23 = vld [vmem:[%s4577_s9 + $0x358] sm:$0xff]  }
 0xc4f   :  { %3392 = vmatprep.subr.bf16.mxu1 %v3654_v35  ;;  %3414 = vmatprep.subr.bf16.mxu0 %v3655_v32  ;;  %v3696_v15 = vld [vmem:[%s4577_s9 + $0x308] sm:$0xff]   ;;  %v3703_v24 = vld [vmem:[%s4577_s9 + $0x3d8] sm:$0xff]   ;;  %v3706_v26 = vld [vmem:[%s4577_s9 + $0x360] sm:$0xff]  }
 0xc50   :  { %v3697_v20 = vld [vmem:[%s4577_s9 + $0x388] sm:$0xff]   ;;  %v3704_v51 = vld [vmem:[%s4577_s9 + $0x318] sm:$0xff]   ;;  %v3707_v27 = vld [vmem:[%s4577_s9 + $0x3e0] sm:$0xff]  }
 0xc51   :  { %v3705_v25 = vld [vmem:[%s4577_s9 + $0x398] sm:$0xff]   ;;  %v3708_v11 = vld [vmem:[%s4577_s9 + $0x320] sm:$0xff]   ;;  %v3712_v33 = vld [vmem:[%s4577_s9 + $0x328] sm:$0xff]  }
 0xc52   :  { %3393 = vmatpush3.bf16.msra.mxu1 %v3656_v36  ;;  %3415 = vmatpush3.bf16.msra.mxu0 %v3657_v39  ;;  %v3709_v28 = vld [vmem:[%s4577_s9 + $0x3a0] sm:$0xff]   ;;  %v3713_v34 = vld [vmem:[%s4577_s9 + $0x3a8] sm:$0xff]   ;;  %v3714_v35 = vld [vmem:[%s4577_s9 + $0x370] sm:$0xff]  }
 0xc53   :  { %3422 = vmatprep.subr.bf16.mxu1 %v3658_v40  ;;  %3444 = vmatprep.subr.bf16.mxu0 %v3659_v0  ;;  %v3715_v32 = vld [vmem:[%s4577_s9 + $0x3f0] sm:$0xff]   ;;  %v3718_v40 = vld [vmem:[%s4577_s9 + $0x378] sm:$0xff]  }
 0xc54   :  { %v3716_v36 = vld [vmem:[%s4577_s9 + $0x330] sm:$0xff]   ;;  %v3719_v0 = vld [vmem:[%s4577_s9 + $0x3f8] sm:$0xff]  }
 0xc55   :  { %2846 = vmatmul.mubr.bf16.vlgmr.msra.gmra.mrb[40].mxu1 %v4249_v17  ;;  %2887 = vmatmul.mubr.bf16.vlgmr.msra.gmra.mrb[40].mxu0 %v4251_v56  ;;  %v3666_v17 = vld [vmem:[%s4577_s9 + $0x250] sm:$0xff]  }
 0xc56   :  { %3423 = vmatpush3.bf16.msra.mxu1 %v3660_v41  ;;  %2927 = vmatprep.mubr.bf16.mxu1 %v4290_v1  ;;  %v3667_v56 = vld [vmem:[%s4577_s9 + $0x2d0] sm:$0xff]   ;;  %v3674_v1 = vld [vmem:[%s4577_s9 + $0x260] sm:$0xff]   ;;  %v3720_v41 = vld [vmem:[%s4577_s9 + $0x338] sm:$0xff]  }
 0xc57   :  { %3445 = vmatpush3.bf16.msra.mxu0 %v3661_v60  ;;  %2968 = vmatprep.mubr.bf16.mxu0 %v4292_v58  ;;  %v3675_v58 = vld [vmem:[%s4577_s9 + $0x2e0] sm:$0xff]   ;;  %v3717_v39 = vld [vmem:[%s4577_s9 + $0x3b0] sm:$0xff]   ;;  %v3721_v60 = vld [vmem:[%s4577_s9 + $0x3b8] sm:$0xff]  }
 0xc58   :  { %3424 = vmatprep.subr.bf16.mxu1 %v3662_v42  ;;  %3446 = vmatprep.subr.bf16.mxu0 %v3663_v43 }
 0xc5a   :  { %3425 = vmatpush3.bf16.msra.mxu1 %v3664_v44  ;;  %v3176_v44 = vld [vmem:[%s4581_s10] ss:$0 sm:$0xff] }
 0xc5b   :  { %3447 = vmatpush3.bf16.msra.mxu0 %v3665_v63  ;;  %3426 = vmatprep.subr.bf16.mxu1 %v3666_v17 }
 0xc5c   :  { %3448 = vmatprep.subr.bf16.mxu0 %v3667_v56 }
 0xc5e   :  { %3427 = vmatpush3.bf16.msra.mxu1 %v3668_v45 }
 0xc5f   :  { %3449 = vmatpush3.bf16.msra.mxu0 %v3669_v46  ;;  %3428 = vmatprep.subr.bf16.mxu1 %v3670_v47 }
 0xc60   :  { %3450 = vmatprep.subr.bf16.mxu0 %v3671_v49 }
 0xc62   :  { %3429 = vmatpush3.bf16.msra.mxu1 %v3672_v54 }
 0xc63   :  { %3451 = vmatpush3.bf16.msra.mxu0 %v3673_v48  ;;  %3430 = vmatprep.subr.bf16.mxu1 %v3674_v1 }
 0xc64   :  { %3452 = vmatprep.subr.bf16.mxu0 %v3675_v58 }
 0xc66   :  { %3431 = vmatpush3.bf16.msra.mxu1 %v3676_v4 }
 0xc67   :  { %3453 = vmatpush3.bf16.msra.mxu0 %v3677_v59  ;;  %3432 = vmatprep.subr.bf16.mxu1 %v3678_v61 }
 0xc68   :  { %3454 = vmatprep.subr.bf16.mxu0 %v3679_v62 }
 0xc6a   :  { %3433 = vmatpush3.bf16.msra.mxu1 %v3680_v52 }
 0xc6b   :  { %3455 = vmatpush3.bf16.msra.mxu0 %v3681_v2  ;;  %3434 = vmatprep.subr.bf16.mxu1 %v3682_v53 }
 0xc6c   :  { %3456 = vmatprep.subr.bf16.mxu0 %v3683_v5 }
 0xc6e   :  { %3435 = vmatpush3.bf16.msra.mxu1 %v3684_v6 }
 0xc6f   :  { %3457 = vmatpush3.bf16.msra.mxu0 %v3685_v7  ;;  %3436 = vmatprep.subr.bf16.mxu1 %v3686_v8 }
 0xc70   :  { %3458 = vmatprep.subr.bf16.mxu0 %v3687_v55 }
 0xc72   :  { %3437 = vmatpush3.bf16.msra.mxu1 %v3688_v9 }
 0xc73   :  { %3459 = vmatpush3.bf16.msra.mxu0 %v3689_v10  ;;  %3466 = vmatprep.subr.bf16.mxu1 %v3690_v12 }
 0xc74   :  { %3488 = vmatprep.subr.bf16.mxu0 %v3691_v13 }
 0xc75   :  { %2928 = vmatmul.mubr.bf16.vlgmr.msra.gmra.mrb[44].mxu1 %v4286_v57  ;;  %v3698_v57 = vld [vmem:[%s4577_s9 + $0x350] sm:$0xff]  }
 0xc76   :  { %2969 = vmatmul.mubr.bf16.vlgmr.msra.gmra.mrb[44].mxu0 %v4288_v50  ;;  %3467 = vmatpush3.bf16.msra.mxu1 %v3692_v14  ;;  %v3699_v50 = vld [vmem:[%s4577_s9 + $0x3d0] sm:$0xff]  }
 0xc77   :  { %3009 = vmatprep.mubr.bf16.mxu1 %v4324_v30  ;;  %3489 = vmatpush3.bf16.msra.mxu0 %v3693_v16  ;;  %v3710_v30 = vld [vmem:[%s4577_s9 + $0x368] sm:$0xff]  }
 0xc78   :  { %3050 = vmatprep.mubr.bf16.mxu0 %v4326_v31  ;;  %3468 = vmatprep.subr.bf16.mxu1 %v3694_v18  ;;  %v3711_v31 = vld [vmem:[%s4577_s9 + $0x3e8] sm:$0xff]  }
 0xc79   :  { %3490 = vmatprep.subr.bf16.mxu0 %v3695_v19 }
 0xc7a   :  { %3469 = vmatpush3.bf16.msra.mxu1 %v3696_v15 }
 0xc7b   :  { %3491 = vmatpush3.bf16.msra.mxu0 %v3697_v20  ;;  %3470 = vmatprep.subr.bf16.mxu1 %v3698_v57 }
 0xc7c   :  { %3492 = vmatprep.subr.bf16.mxu0 %v3699_v50 }
 0xc7e   :  { %3471 = vmatpush3.bf16.msra.mxu1 %v3700_v21 }
 0xc7f   :  { %3493 = vmatpush3.bf16.msra.mxu0 %v3701_v22  ;;  %3472 = vmatprep.subr.bf16.mxu1 %v3702_v23 }
 0xc80   :  { %3494 = vmatprep.subr.bf16.mxu0 %v3703_v24 }
 0xc82   :  { %3473 = vmatpush3.bf16.msra.mxu1 %v3704_v51 }
 0xc83   :  { %3495 = vmatpush3.bf16.msra.mxu0 %v3705_v25  ;;  %3474 = vmatprep.subr.bf16.mxu1 %v3706_v26 }
 0xc84   :  { %3496 = vmatprep.subr.bf16.mxu0 %v3707_v27 }
 0xc86   :  { %3475 = vmatpush3.bf16.msra.mxu1 %v3708_v11 }
 0xc87   :  { %3497 = vmatpush3.bf16.msra.mxu0 %v3709_v28  ;;  %3476 = vmatprep.subr.bf16.mxu1 %v3710_v30 }
 0xc88   :  { %3498 = vmatprep.subr.bf16.mxu0 %v3711_v31 }
 0xc8a   :  { %3477 = vmatpush3.bf16.msra.mxu1 %v3712_v33 }
 0xc8b   :  { %3499 = vmatpush3.bf16.msra.mxu0 %v3713_v34  ;;  %3478 = vmatprep.subr.bf16.mxu1 %v3714_v35 }
 0xc8c   :  { %3500 = vmatprep.subr.bf16.mxu0 %v3715_v32 }
 0xc8e   :  { %3479 = vmatpush3.bf16.msra.mxu1 %v3716_v36 }
 0xc8f   :  { %3501 = vmatpush3.bf16.msra.mxu0 %v3717_v39  ;;  %3480 = vmatprep.subr.bf16.mxu1 %v3718_v40 }
 0xc90   :  { %3502 = vmatprep.subr.bf16.mxu0 %v3719_v0 }
 0xc92   :  { %3481 = vmatpush3.bf16.msra.mxu1 %v3720_v41 }
 0xc93   :  { %3503 = vmatpush3.bf16.msra.mxu0 %v3721_v60 }
 0xc95   :  { %3010 = vmatmul.mubr.bf16.vlgmr.msra.gmra.mrb[48].mxu1 %v4320_v29 }
 0xc96   :  { %3051 = vmatmul.mubr.bf16.vlgmr.msra.gmra.mrb[48].mxu0 %v4322_v3 }
 0xd08   :  { %v3350_v42 = vpop.f32.mrb[36].mxu1  ;;  %v3372_v43 = vpop.f32.mrb[36].mxu0 }
 0xd09   :  { %v3351_v63 = vpop.f32.mrb[37].mxu1  ;;  %v3373_v17 = vpop.f32.mrb[37].mxu0 }
 0xd0a   :  { %v3352_v56 = vadd.f32 %v3351_v63, %v3350_v42  ;;  %v3374_v45 = vadd.f32 %v3373_v17, %v3372_v43  ;;  %v3353_v46 = vpop.f32.mrb[38].mxu1  ;;  %v3375_v47 = vpop.f32.mrb[38].mxu0 }
 0xd0b   :  { %v3354_v49 = vpop.f32.mrb[39].mxu1  ;;  %v3376_v54 = vpop.f32.mrb[39].mxu0 }
 0xd0c   :  { %v2766_v48 = vadd.f32 %v3352_v56, %v3176_v44  ;;  %v3355_v1 = vadd.f32 %v3354_v49, %v3353_v46  ;;  %v3377_v58 = vadd.f32 %v3376_v54, %v3375_v47 }
 0xd0e   :  { %v2807_v29 = vadd.f32 %v3374_v45, %v2766_v48  ;;  %v2769_v4 = vadd.f32 %v3355_v1, %v3176_v44 }
 0xd10   :  { %v2810_v3 = vadd.f32 %v3377_v58, %v2769_v4 }
 0xd28   :  { %v3394_v59 = vpop.f32.mrb[40].mxu1  ;;  %v3416_v61 = vpop.f32.mrb[40].mxu0 }
 0xd29   :  { %v3395_v62 = vpop.f32.mrb[41].mxu1  ;;  %v3417_v52 = vpop.f32.mrb[41].mxu0 }
 0xd2a   :  { %v3396_v2 = vadd.f32 %v3395_v62, %v3394_v59  ;;  %v3418_v53 = vadd.f32 %v3417_v52, %v3416_v61  ;;  %v3397_v5 = vpop.f32.mrb[42].mxu1  ;;  %v3419_v6 = vpop.f32.mrb[42].mxu0 }
 0xd2b   :  { %v3398_v7 = vpop.f32.mrb[43].mxu1  ;;  %v3420_v8 = vpop.f32.mrb[43].mxu0 }
 0xd2c   :  { %v2848_v55 = vadd.f32 %v3396_v2, %v2807_v29  ;;  %v3399_v9 = vadd.f32 %v3398_v7, %v3397_v5  ;;  %v3421_v10 = vadd.f32 %v3420_v8, %v3419_v6  ;;  %v3306_v7 = vld [vmem:[%s4583_s12] ss:$0 sm:$0xff] }
 0xd2e   :  { %v2889_v12 = vadd.f32 %v3418_v53, %v2848_v55  ;;  %v2851_v13 = vadd.f32 %v3399_v9, %v2810_v3  ;;  %v3305_v53 = vld [vmem:[%s4582_s11] ss:$0 sm:$0xff] }
 0xd30   :  { %v2892_v14 = vadd.f32 %v3421_v10, %v2851_v13 }
 0xd48   :  { %v3438_v16 = vpop.f32.mrb[44].mxu1 }
 0xd49   :  { %v3460_v18 = vpop.f32.mrb[44].mxu0  ;;  %v3439_v19 = vpop.f32.mrb[45].mxu1 }
 0xd4a   :  { %v3440_v15 = vadd.f32 %v3439_v19, %v3438_v16  ;;  %v3461_v20 = vpop.f32.mrb[45].mxu0  ;;  %v3441_v57 = vpop.f32.mrb[46].mxu1 }
 0xd4b   :  { %v3462_v50 = vadd.f32 %v3461_v20, %v3460_v18  ;;  %v3463_v21 = vpop.f32.mrb[46].mxu0  ;;  %v3442_v22 = vpop.f32.mrb[47].mxu1 }
 0xd4c   :  { %v2930_v23 = vadd.f32 %v3440_v15, %v2889_v12  ;;  %v3443_v24 = vadd.f32 %v3442_v22, %v3441_v57  ;;  %v3464_v51 = vpop.f32.mrb[47].mxu0 }
 0xd4d   :  { %v3465_v25 = vadd.f32 %v3464_v51, %v3463_v21 }
 0xd4e   :  { %v2971_v26 = vadd.f32 %v3462_v50, %v2930_v23  ;;  %v2933_v27 = vadd.f32 %v3443_v24, %v2892_v14 }
 0xd50   :  { %v2974_v11 = vadd.f32 %v3465_v25, %v2933_v27 }
 0xd68   :  { %v3482_v28 = vpop.f32.mrb[48].mxu1 }
 0xd69   :  { %v3504_v30 = vpop.f32.mrb[48].mxu0  ;;  %v3483_v31 = vpop.f32.mrb[49].mxu1 }
 0xd6a   :  { %v3484_v33 = vadd.f32 %v3483_v31, %v3482_v28  ;;  %v3505_v34 = vpop.f32.mrb[49].mxu0  ;;  %v3485_v35 = vpop.f32.mrb[50].mxu1 }
 0xd6b   :  { %v3506_v32 = vadd.f32 %v3505_v34, %v3504_v30  ;;  %v3507_v36 = vpop.f32.mrb[50].mxu0  ;;  %v3486_v39 = vpop.f32.mrb[51].mxu1 }
 0xd6c   :  { %v3012_v40 = vadd.f32 %v3484_v33, %v2971_v26  ;;  %v3487_v0 = vadd.f32 %v3486_v39, %v3485_v35  ;;  %v3508_v41 = vpop.f32.mrb[51].mxu0 }
 0xd6d   :  { %v3509_v60 = vadd.f32 %v3508_v41, %v3507_v36 }
 0xd6e   :  { %v3053_v42 = vadd.f32 %v3506_v32, %v3012_v40  ;;  %v3015_v43 = vadd.f32 %v3487_v0, %v2974_v11 }
 0xd70   :  { %v3056_v44 = vadd.f32 %v3509_v60, %v3015_v43  ;;  %v3059_v63 = vadd.f32 %v3053_v42, %v4006_v37 }
 0xd72   :  { %v3061_v17 = vsel %vm71_vm1, %v3059_v63, 0.0  ;;  %v3060_v56 = vadd.f32 %v3056_v44, %v4008_v38 }
 0xd73   :  { %3062 = vadd.xlane.f32.xlu0 %v3061_v17 }
 0xd74   :  { %v3064_v45 = vsel %vm71_vm1, %v3060_v56, 0.0 }
 0xd75   :  { %3065 = vadd.xlane.f32.xlu1 %v3064_v45 }
 0xe00   :  { %v3063_v46 = vpop.xlane.xlu0 %3062 }
 0xe01   :  { %v3067_v47 = vmul.f32 0.03125, %v3063_v46 }
 0xe02   :  { %v3066_v49 = vpop.xlane.xlu1 %3065 }
 0xe03   :  { %v3069_v54 = vsub.f32 %v3059_v63, %v3067_v47  ;;  %v3068_v48 = vmul.f32 0.03125, %v3066_v49 }
 0xe05   :  { %v3070_v1 = vsub.f32 %v3060_v56, %v3068_v48  ;;  %v3071_v58 = vmul.f32 %v3069_v54, %v3069_v54 }
 0xe07   :  { %v3073_v29 = vsel %vm71_vm1, %v3071_v58, 0.0  ;;  %v3072_v4 = vmul.f32 %v3070_v1, %v3070_v1 }
 0xe08   :  { %3074 = vadd.xlane.f32.xlu0 %v3073_v29 }
 0xe09   :  { %v3076_v37 = vsel %vm71_vm1, %v3072_v4, 0.0 }
 0xe0a   :  { %3077 = vadd.xlane.f32.xlu1 %v3076_v37 }
 0xe95   :  { %v3075_v3 = vpop.xlane.xlu0 %3074 }
 0xe96   :  { %v3079_v38 = vmul.f32 0.03125, %v3075_v3 }
 0xe97   :  { %v3078_v59 = vpop.xlane.xlu1 %3077 }
 0xe98   :  { %v3081_v61 = vadd.f32 1e-05, %v3079_v38  ;;  %v3080_v62 = vmul.f32 0.03125, %v3078_v59 }
 0xe9a   :  { %3742 = vrsqrt.f32 %v3081_v61  ;;  %v3082_v52 = vadd.f32 1e-05, %v3080_v62 }
 0xe9c   :  { %3744 = vrsqrt.f32 %v3082_v52 }
 0xea4   :  { %v3743_v2 = vpop.eup %3742 }
 0xea5   :  { %v3085_v5 = vmul.f32 %v3743_v2, %v3069_v54 }
 0xea6   :  { %v3745_v6 = vpop.eup %3744 }
 0xea7   :  { %v3094_v8 = vmul.f32 %v3305_v53, %v3085_v5  ;;  %v3086_v55 = vmul.f32 %v3745_v6, %v3070_v1 }
 0xea9   :  { %v3103_v9 = vadd.f32 %v3306_v7, %v3094_v8  ;;  %v3095_v10 = vmul.f32 %v3305_v53, %v3086_v55 }
 0xeab   :  { %3105 = vst.msk [vmem:[%s4584_s13] sm:$0xff] %vm71_vm1, %v3103_v9  ;;  %v3104_v12 = vadd.f32 %v3306_v7, %v3095_v10 }
 0xead   :  { %3106 = vst.msk [vmem:[%s4584_s13 + $0x8] sm:$0xff] %vm71_vm1, %v3104_v12 }

</bundles_post_ra>
